<compile_context>
chip_gen: v5e
topology: v5e:2x2
jax: 0.10.0
libtpu: 0.0.40
codegen_flags: <defaults>
</compile_context>

<pallas_src>
from functools import partial

import jax
import jax.numpy as jnp
from jax import lax
from jax.experimental import pallas as pl
from jax.experimental.pallas import tpu as pltpu


NEG_INF = -1e30  # additive mask value for non-edges (self-loops guarantee a max)


# ---------------------------------------------------------------------------
# Fully fused kernel: feat_encode + all GATConv layers in one pallas_call
# ---------------------------------------------------------------------------
def gat_fused_kernel(*refs, layer_cfgs, negative_slope):
    # refs (in order):
    #   x_aug  : [N, Kpad]  bf16   padded [block-diag(features) | one-hot(type)]
    #   w_pre  : [Kpad, D0] bf16   stacked [W0; W1; b0; b1; 0-pad] type encoder
    #   adj    : [N, N]     bf16   additive edge mask: 0 edge / -1e30 no edge
    #   per layer l:
    #     W_l   : [Din_l, H_l*Dout_l] bf16  head-fused projection
    #     al_l  : [H_l, H_l*Dout_l]   bf16  block-diag "source" attention rows
    #     arb_l : [H_l*Dout_l, H_l]   bf16  block-diag "destination" attn cols
    #     Wres_l: [Din_l, H_l*Dout_l] bf16  (only if residual == "linear")
    #   o      : [N, H_last*Dout_last] f32  lane-flattened output
    f32, bf16 = jnp.float32, jnp.bfloat16

    it = iter(refs)
    x_ref = next(it)
    wpre_ref = next(it)
    adj_ref = next(it)
    layer_refs = []
    for cfg in layer_cfgs:
        w_ref = next(it)
        al_ref = next(it)
        arb_ref = next(it)
        wres_ref = next(it) if cfg["residual"] == "linear" else None
        layer_refs.append((w_ref, al_ref, arb_ref, wres_ref))
    o_ref = next(it)

    adj_bias = adj_ref[...].astype(f32)                       # [N, N], resident

    # Fused per-type feat_encode: one bf16 matmul (biases ride on the one-hot
    # columns of x_aug).  Zero K-padding contributes nothing.
    h = jnp.dot(x_ref[...], wpre_ref[...], preferred_element_type=f32)  # [N, D0]

    for cfg, (w_ref, al_ref, arb_ref, wres_ref) in zip(layer_cfgs, layer_refs):
        H, D = cfg["num_heads"], cfg["dout"]

        h_bf = h.astype(bf16)
        feat = jnp.dot(h_bf, w_ref[...], preferred_element_type=f32)  # [N, H*D]
        feat_bf = feat.astype(bf16)        # single cast, reused by all heads

        # el[h, src] for every head in one matmul (al is block-diagonal),
        # already lane-major along the source axis.
        el = lax.dot_general(al_ref[...], feat_bf,
                             (((1,), (1,)), ((), ())),
                             preferred_element_type=f32)              # [H, N]
        # er[dst, h] via one skinny block-diagonal matmul (no XLU reduce).
        er = jnp.dot(feat_bf, arb_ref[...], preferred_element_type=f32)  # [N, H]

        head_out = []
        for hh in range(H):                 # static, unrolled (H <= 4)
            s = er[:, hh:hh + 1] + el[hh:hh + 1, :]                   # [N, N]
            s = jnp.where(s > 0, s, negative_slope * s)               # leaky relu
            s = s + adj_bias                                          # edge mask
            s_max = jnp.max(s, axis=-1, keepdims=True)
            p = jnp.exp(s - s_max)
            inv_l = pl.reciprocal(jnp.sum(p, axis=-1, keepdims=True),
                                  approx=True)
            alpha = (p * inv_l).astype(bf16)                          # [N, N]
            head_out.append(jnp.dot(alpha, feat_bf[:, hh * D:(hh + 1) * D],
                                    preferred_element_type=f32))      # [N, D]

        rst = head_out[0] if H == 1 else jnp.concatenate(head_out, axis=-1)

        if cfg["residual"] == "identity":   # in_feats == num_heads * out_feats
            rst = rst + h
        elif cfg["residual"] == "linear":   # DGL res_fc = Linear (no bias)
            rst = rst + jnp.dot(h_bf, wres_ref[...],
                                preferred_element_type=f32)
        # TODO(synk): GATConv bias is zero-initialized in DGL -> omitted (no-op).

        if cfg["apply_elu"]:
            rst = jnp.where(rst > 0, rst,
                            jnp.exp(jnp.minimum(rst, 0.0)) - 1.0)
        h = rst

    o_ref[...] = h.astype(o_ref.dtype)      # single [N, H_last*Dout_last] store


def gat_forward(x_aug, w_pre, adj_bias, layer_params, layer_cfgs,
                negative_slope=0.2):
    """Whole GAT forward (feat_encode + all GATConv layers) in one pallas_call.

    Returns the flattened last-layer output [N, H_last*Dout_last] (f32)."""
    N = x_aug.shape[0]
    out_dim = layer_cfgs[-1]["num_heads"] * layer_cfgs[-1]["dout"]

    inputs = [x_aug, w_pre, adj_bias]
    in_specs = [
        pl.BlockSpec(x_aug.shape, lambda i: (0, 0)),
        pl.BlockSpec(w_pre.shape, lambda i: (0, 0)),
        pl.BlockSpec(adj_bias.shape, lambda i: (0, 0)),
    ]
    for cfg, p in zip(layer_cfgs, layer_params):
        for name in ("W", "al", "arb"):
            inputs.append(p[name])
            in_specs.append(pl.BlockSpec(p[name].shape, lambda i: (0, 0)))
        if cfg["residual"] == "linear":
            inputs.append(p["Wres"])
            in_specs.append(pl.BlockSpec(p["Wres"].shape, lambda i: (0, 0)))

    kern = partial(gat_fused_kernel, layer_cfgs=tuple(layer_cfgs),
                   negative_slope=negative_slope)
    # TODO(synk): for large N, add a source-block grid axis with an online
    # (flash-style) softmax instead of keeping the full [N, N] adj resident.
    return pl.pallas_call(
        kern,
        out_shape=jax.ShapeDtypeStruct((N, out_dim), jnp.float32),
        grid=(1,),
        in_specs=in_specs,
        out_specs=pl.BlockSpec((N, out_dim), lambda i: (0, 0)),
        compiler_params=pltpu.CompilerParams(
            dimension_semantics=("arbitrary",)),
    )(*inputs)


# ---------------------------------------------------------------------------
# Driver: parameter setup / layout plumbing in plain JAX
# ---------------------------------------------------------------------------
if __name__ == "__main__":
    # config (small, consistent with the module)
    num_hidden = 32
    num_classes = 8
    num_layers = 2
    heads = [4, 4, 1]
    negative_slope = 0.2
    in_dims = [24, 40]            # two node types
    n_per_type = [32, 32]
    N = sum(n_per_type)           # 64 nodes total

    key = jax.random.PRNGKey(0)
    keys = iter(jax.random.split(key, 64))
    nxt = lambda: next(keys)  # noqa: E731

    def xavier(k, shape, gain=1.414):
        fan_in, fan_out = shape[-2], shape[-1]
        std = gain * (2.0 / (fan_in + fan_out)) ** 0.5
        return std * jax.random.normal(k, shape, dtype=jnp.float32)

    # --- inputs -------------------------------------------------------------
    features_list = [jax.random.normal(nxt(), (n, d), dtype=jnp.float32)
                     for n, d in zip(n_per_type, in_dims)]

    # dense graph: sparse random edges + self loops; adj[src, dst]
    adj = (jax.random.uniform(nxt(), (N, N)) < 0.1).astype(jnp.float32)
    adj = jnp.maximum(adj, jnp.eye(N, dtype=jnp.float32))
    adj_t = adj.T                                        # adj_t[dst, src]
    # every destination must have >= 1 incoming edge (self loops guarantee it);
    # otherwise the masked softmax would silently become uniform.
    assert bool(jnp.all(adj_t.sum(axis=1) > 0))
    adj_bias = jnp.where(adj_t > 0, 0.0, NEG_INF).astype(jnp.bfloat16)

    # --- feat_encode params, fused into one pre-projection matmul ------------
    # x_aug = [ block-diag(features) | one-hot(node type) | 0-pad ]
    # w_pre = [ W0 ; W1 ; b0 ; b1 ; 0-pad ]  so  x_aug @ w_pre == concat_t(fc_t(x_t))
    fc_w = [xavier(nxt(), (d, num_hidden)) for d in in_dims]
    fc_b = [0.01 * jax.random.normal(nxt(), (1, num_hidden), jnp.float32)
            for _ in in_dims]
    T, d_tot = len(in_dims), sum(in_dims)
    blocks = []
    for t, f in enumerate(features_list):
        left = sum(in_dims[:t])
        right = d_tot - left - in_dims[t]
        parts = []
        if left:
            parts.append(jnp.zeros((f.shape[0], left), jnp.float32))
        parts.append(f)
        if right:
            parts.append(jnp.zeros((f.shape[0], right), jnp.float32))
        parts.append(jnp.zeros((f.shape[0], T), jnp.float32).at[:, t].set(1.0))
        blocks.append(jnp.concatenate(parts, axis=1))
    x_aug = jnp.concatenate(blocks, axis=0)              # [N, d_tot + T]
    w_pre = jnp.concatenate(fc_w + fc_b, axis=0)         # [d_tot + T, num_hidden]

    # zero-pad the fused-encoder K dim (66 -> 128) for clean MXU/DMA tiles
    K_raw = d_tot + T
    K_pad = ((K_raw + 127) // 128) * 128                 # mult of 8 suffices
    x_aug = jnp.pad(x_aug, ((0, 0), (0, K_pad - K_raw))).astype(jnp.bfloat16)
    w_pre = jnp.pad(w_pre, ((0, K_pad - K_raw), (0, 0))).astype(jnp.bfloat16)

    # --- GATConv params (head-fused, bf16 layouts) ----------------------------
    def head_fuse_w(W):        # [H, Din, Dout] -> [Din, H*Dout]
        H, Din, Dout = W.shape
        return jnp.transpose(W, (1, 0, 2)).reshape(Din, H * Dout)

    def attn_rows(a):          # [H, 1, Dout] -> block-diagonal [H, H*Dout]
        H, _, D = a.shape
        m = jnp.zeros((H, H * D), jnp.float32)
        for h in range(H):
            m = m.at[h, h * D:(h + 1) * D].set(a[h, 0])
        return m

    def make_gat_params(din, dout, H, res_linear):
        bf16 = jnp.bfloat16
        p = dict(
            W=head_fuse_w(xavier(nxt(), (H, din, dout))).astype(bf16),
            al=attn_rows(xavier(nxt(), (H, 1, dout))).astype(bf16),
            arb=attn_rows(xavier(nxt(), (H, 1, dout))).T.astype(bf16),
        )
        if res_linear:
            p["Wres"] = xavier(nxt(), (din, H * dout)).astype(bf16)
        return p

    params = [
        make_gat_params(num_hidden, num_hidden, heads[0], False),             # L0
        make_gat_params(num_hidden * heads[0], num_hidden, heads[1], False),  # L1
        make_gat_params(num_hidden * heads[1], num_classes, heads[2], True),  # out
    ]
    layer_cfgs = [
        dict(num_heads=heads[0], dout=num_hidden, apply_elu=True,
             residual="none"),                       # layer 0: no residual, ELU
        dict(num_heads=heads[1], dout=num_hidden, apply_elu=True,
             residual="identity"),                   # layer 1: in == H*out
        dict(num_heads=heads[2], dout=num_classes, apply_elu=False,
             residual="linear"),                     # output: Linear residual
    ]

    # --- forward --------------------------------------------------------------
    # TODO(synk): feat_drop / attn_drop are identity (deterministic eval mode).
    out = gat_forward(x_aug, w_pre, adj_bias, params, layer_cfgs,
                      negative_slope=negative_slope)   # [N, heads[-1]*classes]

    logits = out.reshape(N, heads[-1], num_classes).mean(axis=1)  # .mean(1) heads
    logits = jax.block_until_ready(logits)
    assert logits.shape == (N, num_classes), logits.shape
    assert bool(jnp.all(jnp.isfinite(logits)))
    print("KERNEL_OK")
</pallas_src>

<mosaic_0001>
module attributes {stable_mosaic.version = 11 : i64} {
  func.func @gat_fused_kernel(%arg0: i32, %arg1: memref<64x128xbf16, #tpu.memory_space<vmem>>, %arg2: memref<128x32xbf16, #tpu.memory_space<vmem>>, %arg3: memref<64x64xbf16, #tpu.memory_space<vmem>>, %arg4: memref<32x128xbf16, #tpu.memory_space<vmem>>, %arg5: memref<4x128xbf16, #tpu.memory_space<vmem>>, %arg6: memref<128x4xbf16, #tpu.memory_space<vmem>>, %arg7: memref<128x128xbf16, #tpu.memory_space<vmem>>, %arg8: memref<4x128xbf16, #tpu.memory_space<vmem>>, %arg9: memref<128x4xbf16, #tpu.memory_space<vmem>>, %arg10: memref<128x8xbf16, #tpu.memory_space<vmem>>, %arg11: memref<1x8xbf16, #tpu.memory_space<vmem>>, %arg12: memref<8x1xbf16, #tpu.memory_space<vmem>>, %arg13: memref<128x8xbf16, #tpu.memory_space<vmem>>, %arg14: memref<64x8xf32, #tpu.memory_space<vmem>>) attributes {dimension_semantics = [#tpu.dimension_semantics<arbitrary>], iteration_bounds = array<i64: 1>, scalar_prefetch = 0 : i64, scratch_operands = 0 : i64, tpu.core_type = #tpu.core_type<tc>, window_params = [{pipeline_mode = #tpu.pipeline_mode<synchronous>, transform_indices = @transform_0, window_bounds = array<i64: 64, 128>}, {pipeline_mode = #tpu.pipeline_mode<synchronous>, transform_indices = @transform_1, window_bounds = array<i64: 128, 32>}, {pipeline_mode = #tpu.pipeline_mode<synchronous>, transform_indices = @transform_2, window_bounds = array<i64: 64, 64>}, {pipeline_mode = #tpu.pipeline_mode<synchronous>, transform_indices = @transform_3, window_bounds = array<i64: 32, 128>}, {pipeline_mode = #tpu.pipeline_mode<synchronous>, transform_indices = @transform_4, window_bounds = array<i64: 4, 128>}, {pipeline_mode = #tpu.pipeline_mode<synchronous>, transform_indices = @transform_5, window_bounds = array<i64: 128, 4>}, {pipeline_mode = #tpu.pipeline_mode<synchronous>, transform_indices = @transform_6, window_bounds = array<i64: 128, 128>}, {pipeline_mode = #tpu.pipeline_mode<synchronous>, transform_indices = @transform_7, window_bounds = array<i64: 4, 128>}, {pipeline_mode = #tpu.pipeline_mode<synchronous>, transform_indices = @transform_8, window_bounds = array<i64: 128, 4>}, {pipeline_mode = #tpu.pipeline_mode<synchronous>, transform_indices = @transform_9, window_bounds = array<i64: 128, 8>}, {pipeline_mode = #tpu.pipeline_mode<synchronous>, transform_indices = @transform_10, window_bounds = array<i64: 1, 8>}, {pipeline_mode = #tpu.pipeline_mode<synchronous>, transform_indices = @transform_11, window_bounds = array<i64: 8, 1>}, {pipeline_mode = #tpu.pipeline_mode<synchronous>, transform_indices = @transform_12, window_bounds = array<i64: 128, 8>}, {pipeline_mode = #tpu.pipeline_mode<synchronous>, transform_indices = @transform_13, window_bounds = array<i64: 64, 8>}]} {
    %c0 = arith.constant 0 : index
    %c0_0 = arith.constant 0 : index
    %0 = vector.load %arg3[%c0, %c0_0] : memref<64x64xbf16, #tpu.memory_space<vmem>>, vector<64x64xbf16>
    %1 = arith.extf %0 : vector<64x64xbf16> to vector<64x64xf32>
    %c0_1 = arith.constant 0 : index
    %c0_2 = arith.constant 0 : index
    %2 = vector.load %arg1[%c0_1, %c0_2] : memref<64x128xbf16, #tpu.memory_space<vmem>>, vector<64x128xbf16>
    %c0_3 = arith.constant 0 : index
    %c0_4 = arith.constant 0 : index
    %3 = vector.load %arg2[%c0_3, %c0_4] : memref<128x32xbf16, #tpu.memory_space<vmem>>, vector<128x32xbf16>
    %cst = arith.constant dense<0.000000e+00> : vector<64x32xf32>
    %4 = tpu.matmul %2, %3, %cst {dimension_numbers = #tpu.dot_dimension_numbers<[1], [0], [0], [1], [0, 0, 1, 1], [], []>} : vector<64x128xbf16>, vector<128x32xbf16>, vector<64x32xf32> -> vector<64x32xf32>
    %5 = arith.truncf %4 : vector<64x32xf32> to vector<64x32xbf16>
    %c0_5 = arith.constant 0 : index
    %c0_6 = arith.constant 0 : index
    %6 = vector.load %arg4[%c0_5, %c0_6] : memref<32x128xbf16, #tpu.memory_space<vmem>>, vector<32x128xbf16>
    %cst_7 = arith.constant dense<0.000000e+00> : vector<64x128xf32>
    %7 = tpu.matmul %5, %6, %cst_7 {dimension_numbers = #tpu.dot_dimension_numbers<[1], [0], [0], [1], [0, 0, 1, 1], [], []>} : vector<64x32xbf16>, vector<32x128xbf16>, vector<64x128xf32> -> vector<64x128xf32>
    %8 = arith.truncf %7 : vector<64x128xf32> to vector<64x128xbf16>
    %c0_8 = arith.constant 0 : index
    %c0_9 = arith.constant 0 : index
    %9 = vector.load %arg5[%c0_8, %c0_9] : memref<4x128xbf16, #tpu.memory_space<vmem>>, vector<4x128xbf16>
    %cst_10 = arith.constant dense<0.000000e+00> : vector<4x64xf32>
    %10 = tpu.matmul %9, %8, %cst_10 {dimension_numbers = #tpu.dot_dimension_numbers<[1], [1], [0], [0], [0, 0, 1, 0], [], []>} : vector<4x128xbf16>, vector<64x128xbf16>, vector<4x64xf32> -> vector<4x64xf32>
    %c0_11 = arith.constant 0 : index
    %c0_12 = arith.constant 0 : index
    %11 = vector.load %arg6[%c0_11, %c0_12] : memref<128x4xbf16, #tpu.memory_space<vmem>>, vector<128x4xbf16>
    %cst_13 = arith.constant dense<0.000000e+00> : vector<64x4xf32>
    %12 = tpu.matmul %8, %11, %cst_13 {dimension_numbers = #tpu.dot_dimension_numbers<[1], [0], [0], [1], [0, 0, 1, 1], [], []>} : vector<64x128xbf16>, vector<128x4xbf16>, vector<64x4xf32> -> vector<64x4xf32>
    %13 = vector.extract_strided_slice %12 {offsets = [0, 0], sizes = [64, 1], strides = [1, 1]} : vector<64x4xf32> to vector<64x1xf32>
    %14 = vector.extract_strided_slice %10 {offsets = [0, 0], sizes = [1, 64], strides = [1, 1]} : vector<4x64xf32> to vector<1x64xf32>
    %15 = vector.broadcast %13 : vector<64x1xf32> to vector<64x64xf32>
    %16 = vector.broadcast %14 : vector<1x64xf32> to vector<64x64xf32>
    %17 = arith.addf %15, %16 : vector<64x64xf32>
    %cst_14 = arith.constant 0.000000e+00 : f32
    %18 = vector.broadcast %cst_14 : f32 to vector<64x64xf32>
    %19 = arith.cmpf ogt, %17, %18 : vector<64x64xf32>
    %cst_15 = arith.constant 2.000000e-01 : f32
    %20 = vector.broadcast %cst_15 : f32 to vector<64x64xf32>
    %21 = arith.mulf %20, %17 : vector<64x64xf32>
    %22 = arith.select %19, %17, %21 : vector<64x64xi1>, vector<64x64xf32>
    %23 = arith.addf %22, %1 : vector<64x64xf32>
    %cst_16 = arith.constant dense<0xFF800000> : vector<64xf32>
    %24 = vector.multi_reduction <maximumf>, %23, %cst_16 [1] : vector<64x64xf32> to vector<64xf32>
    %25 = vector.shape_cast %24 : vector<64xf32> to vector<64x1xf32>
    %26 = vector.broadcast %25 : vector<64x1xf32> to vector<64x64xf32>
    %27 = arith.subf %23, %26 : vector<64x64xf32>
    %28 = math.exp %27 : vector<64x64xf32>
    %cst_17 = arith.constant dense<0.000000e+00> : vector<64xf32>
    %29 = vector.multi_reduction <add>, %28, %cst_17 [1] : vector<64x64xf32> to vector<64xf32>
    %30 = vector.shape_cast %29 : vector<64xf32> to vector<64x1xf32>
    %31 = tpu.reciprocal %30 {approx = true} : vector<64x1xf32> -> vector<64x1xf32>
    %32 = vector.broadcast %31 : vector<64x1xf32> to vector<64x64xf32>
    %33 = arith.mulf %28, %32 : vector<64x64xf32>
    %34 = arith.truncf %33 : vector<64x64xf32> to vector<64x64xbf16>
    %35 = vector.extract_strided_slice %8 {offsets = [0, 0], sizes = [64, 32], strides = [1, 1]} : vector<64x128xbf16> to vector<64x32xbf16>
    %cst_18 = arith.constant dense<0.000000e+00> : vector<64x32xf32>
    %36 = tpu.matmul %34, %35, %cst_18 {dimension_numbers = #tpu.dot_dimension_numbers<[1], [0], [0], [1], [0, 0, 1, 1], [], []>} : vector<64x64xbf16>, vector<64x32xbf16>, vector<64x32xf32> -> vector<64x32xf32>
    %37 = vector.extract_strided_slice %12 {offsets = [0, 1], sizes = [64, 1], strides = [1, 1]} : vector<64x4xf32> to vector<64x1xf32>
    %38 = vector.extract_strided_slice %10 {offsets = [1, 0], sizes = [1, 64], strides = [1, 1]} : vector<4x64xf32> to vector<1x64xf32>
    %39 = vector.broadcast %37 : vector<64x1xf32> to vector<64x64xf32>
    %40 = vector.broadcast %38 : vector<1x64xf32> to vector<64x64xf32>
    %41 = arith.addf %39, %40 : vector<64x64xf32>
    %cst_19 = arith.constant 0.000000e+00 : f32
    %42 = vector.broadcast %cst_19 : f32 to vector<64x64xf32>
    %43 = arith.cmpf ogt, %41, %42 : vector<64x64xf32>
    %cst_20 = arith.constant 2.000000e-01 : f32
    %44 = vector.broadcast %cst_20 : f32 to vector<64x64xf32>
    %45 = arith.mulf %44, %41 : vector<64x64xf32>
    %46 = arith.select %43, %41, %45 : vector<64x64xi1>, vector<64x64xf32>
    %47 = arith.addf %46, %1 : vector<64x64xf32>
    %cst_21 = arith.constant dense<0xFF800000> : vector<64xf32>
    %48 = vector.multi_reduction <maximumf>, %47, %cst_21 [1] : vector<64x64xf32> to vector<64xf32>
    %49 = vector.shape_cast %48 : vector<64xf32> to vector<64x1xf32>
    %50 = vector.broadcast %49 : vector<64x1xf32> to vector<64x64xf32>
    %51 = arith.subf %47, %50 : vector<64x64xf32>
    %52 = math.exp %51 : vector<64x64xf32>
    %cst_22 = arith.constant dense<0.000000e+00> : vector<64xf32>
    %53 = vector.multi_reduction <add>, %52, %cst_22 [1] : vector<64x64xf32> to vector<64xf32>
    %54 = vector.shape_cast %53 : vector<64xf32> to vector<64x1xf32>
    %55 = tpu.reciprocal %54 {approx = true} : vector<64x1xf32> -> vector<64x1xf32>
    %56 = vector.broadcast %55 : vector<64x1xf32> to vector<64x64xf32>
    %57 = arith.mulf %52, %56 : vector<64x64xf32>
    %58 = arith.truncf %57 : vector<64x64xf32> to vector<64x64xbf16>
    %59 = vector.extract_strided_slice %8 {offsets = [0, 32], sizes = [64, 32], strides = [1, 1]} : vector<64x128xbf16> to vector<64x32xbf16>
    %cst_23 = arith.constant dense<0.000000e+00> : vector<64x32xf32>
    %60 = tpu.matmul %58, %59, %cst_23 {dimension_numbers = #tpu.dot_dimension_numbers<[1], [0], [0], [1], [0, 0, 1, 1], [], []>} : vector<64x64xbf16>, vector<64x32xbf16>, vector<64x32xf32> -> vector<64x32xf32>
    %61 = vector.extract_strided_slice %12 {offsets = [0, 2], sizes = [64, 1], strides = [1, 1]} : vector<64x4xf32> to vector<64x1xf32>
    %62 = vector.extract_strided_slice %10 {offsets = [2, 0], sizes = [1, 64], strides = [1, 1]} : vector<4x64xf32> to vector<1x64xf32>
    %63 = vector.broadcast %61 : vector<64x1xf32> to vector<64x64xf32>
    %64 = vector.broadcast %62 : vector<1x64xf32> to vector<64x64xf32>
    %65 = arith.addf %63, %64 : vector<64x64xf32>
    %cst_24 = arith.constant 0.000000e+00 : f32
    %66 = vector.broadcast %cst_24 : f32 to vector<64x64xf32>
    %67 = arith.cmpf ogt, %65, %66 : vector<64x64xf32>
    %cst_25 = arith.constant 2.000000e-01 : f32
    %68 = vector.broadcast %cst_25 : f32 to vector<64x64xf32>
    %69 = arith.mulf %68, %65 : vector<64x64xf32>
    %70 = arith.select %67, %65, %69 : vector<64x64xi1>, vector<64x64xf32>
    %71 = arith.addf %70, %1 : vector<64x64xf32>
    %cst_26 = arith.constant dense<0xFF800000> : vector<64xf32>
    %72 = vector.multi_reduction <maximumf>, %71, %cst_26 [1] : vector<64x64xf32> to vector<64xf32>
    %73 = vector.shape_cast %72 : vector<64xf32> to vector<64x1xf32>
    %74 = vector.broadcast %73 : vector<64x1xf32> to vector<64x64xf32>
    %75 = arith.subf %71, %74 : vector<64x64xf32>
    %76 = math.exp %75 : vector<64x64xf32>
    %cst_27 = arith.constant dense<0.000000e+00> : vector<64xf32>
    %77 = vector.multi_reduction <add>, %76, %cst_27 [1] : vector<64x64xf32> to vector<64xf32>
    %78 = vector.shape_cast %77 : vector<64xf32> to vector<64x1xf32>
    %79 = tpu.reciprocal %78 {approx = true} : vector<64x1xf32> -> vector<64x1xf32>
    %80 = vector.broadcast %79 : vector<64x1xf32> to vector<64x64xf32>
    %81 = arith.mulf %76, %80 : vector<64x64xf32>
    %82 = arith.truncf %81 : vector<64x64xf32> to vector<64x64xbf16>
    %83 = vector.extract_strided_slice %8 {offsets = [0, 64], sizes = [64, 32], strides = [1, 1]} : vector<64x128xbf16> to vector<64x32xbf16>
    %cst_28 = arith.constant dense<0.000000e+00> : vector<64x32xf32>
    %84 = tpu.matmul %82, %83, %cst_28 {dimension_numbers = #tpu.dot_dimension_numbers<[1], [0], [0], [1], [0, 0, 1, 1], [], []>} : vector<64x64xbf16>, vector<64x32xbf16>, vector<64x32xf32> -> vector<64x32xf32>
    %85 = vector.extract_strided_slice %12 {offsets = [0, 3], sizes = [64, 1], strides = [1, 1]} : vector<64x4xf32> to vector<64x1xf32>
    %86 = vector.extract_strided_slice %10 {offsets = [3, 0], sizes = [1, 64], strides = [1, 1]} : vector<4x64xf32> to vector<1x64xf32>
    %87 = vector.broadcast %85 : vector<64x1xf32> to vector<64x64xf32>
    %88 = vector.broadcast %86 : vector<1x64xf32> to vector<64x64xf32>
    %89 = arith.addf %87, %88 : vector<64x64xf32>
    %cst_29 = arith.constant 0.000000e+00 : f32
    %90 = vector.broadcast %cst_29 : f32 to vector<64x64xf32>
    %91 = arith.cmpf ogt, %89, %90 : vector<64x64xf32>
    %cst_30 = arith.constant 2.000000e-01 : f32
    %92 = vector.broadcast %cst_30 : f32 to vector<64x64xf32>
    %93 = arith.mulf %92, %89 : vector<64x64xf32>
    %94 = arith.select %91, %89, %93 : vector<64x64xi1>, vector<64x64xf32>
    %95 = arith.addf %94, %1 : vector<64x64xf32>
    %cst_31 = arith.constant dense<0xFF800000> : vector<64xf32>
    %96 = vector.multi_reduction <maximumf>, %95, %cst_31 [1] : vector<64x64xf32> to vector<64xf32>
    %97 = vector.shape_cast %96 : vector<64xf32> to vector<64x1xf32>
    %98 = vector.broadcast %97 : vector<64x1xf32> to vector<64x64xf32>
    %99 = arith.subf %95, %98 : vector<64x64xf32>
    %100 = math.exp %99 : vector<64x64xf32>
    %cst_32 = arith.constant dense<0.000000e+00> : vector<64xf32>
    %101 = vector.multi_reduction <add>, %100, %cst_32 [1] : vector<64x64xf32> to vector<64xf32>
    %102 = vector.shape_cast %101 : vector<64xf32> to vector<64x1xf32>
    %103 = tpu.reciprocal %102 {approx = true} : vector<64x1xf32> -> vector<64x1xf32>
    %104 = vector.broadcast %103 : vector<64x1xf32> to vector<64x64xf32>
    %105 = arith.mulf %100, %104 : vector<64x64xf32>
    %106 = arith.truncf %105 : vector<64x64xf32> to vector<64x64xbf16>
    %107 = vector.extract_strided_slice %8 {offsets = [0, 96], sizes = [64, 32], strides = [1, 1]} : vector<64x128xbf16> to vector<64x32xbf16>
    %cst_33 = arith.constant dense<0.000000e+00> : vector<64x32xf32>
    %108 = tpu.matmul %106, %107, %cst_33 {dimension_numbers = #tpu.dot_dimension_numbers<[1], [0], [0], [1], [0, 0, 1, 1], [], []>} : vector<64x64xbf16>, vector<64x32xbf16>, vector<64x32xf32> -> vector<64x32xf32>
    %109 = tpu.concatenate %36, %60, %84, %108 in 1 : vector<64x32xf32>, vector<64x32xf32>, vector<64x32xf32>, vector<64x32xf32> -> vector<64x128xf32>
    %cst_34 = arith.constant 0.000000e+00 : f32
    %110 = vector.broadcast %cst_34 : f32 to vector<64x128xf32>
    %111 = arith.cmpf ogt, %109, %110 : vector<64x128xf32>
    %cst_35 = arith.constant 0.000000e+00 : f32
    %112 = vector.broadcast %cst_35 : f32 to vector<64x128xf32>
    %113 = arith.minimumf %109, %112 : vector<64x128xf32>
    %114 = math.exp %113 : vector<64x128xf32>
    %cst_36 = arith.constant 1.000000e+00 : f32
    %115 = vector.broadcast %cst_36 : f32 to vector<64x128xf32>
    %116 = arith.subf %114, %115 : vector<64x128xf32>
    %117 = arith.select %111, %109, %116 : vector<64x128xi1>, vector<64x128xf32>
    %118 = arith.truncf %117 : vector<64x128xf32> to vector<64x128xbf16>
    %c0_37 = arith.constant 0 : index
    %c0_38 = arith.constant 0 : index
    %119 = vector.load %arg7[%c0_37, %c0_38] : memref<128x128xbf16, #tpu.memory_space<vmem>>, vector<128x128xbf16>
    %cst_39 = arith.constant dense<0.000000e+00> : vector<64x128xf32>
    %120 = tpu.matmul %118, %119, %cst_39 {dimension_numbers = #tpu.dot_dimension_numbers<[1], [0], [0], [1], [0, 0, 1, 1], [], []>} : vector<64x128xbf16>, vector<128x128xbf16>, vector<64x128xf32> -> vector<64x128xf32>
    %121 = arith.truncf %120 : vector<64x128xf32> to vector<64x128xbf16>
    %c0_40 = arith.constant 0 : index
    %c0_41 = arith.constant 0 : index
    %122 = vector.load %arg8[%c0_40, %c0_41] : memref<4x128xbf16, #tpu.memory_space<vmem>>, vector<4x128xbf16>
    %cst_42 = arith.constant dense<0.000000e+00> : vector<4x64xf32>
    %123 = tpu.matmul %122, %121, %cst_42 {dimension_numbers = #tpu.dot_dimension_numbers<[1], [1], [0], [0], [0, 0, 1, 0], [], []>} : vector<4x128xbf16>, vector<64x128xbf16>, vector<4x64xf32> -> vector<4x64xf32>
    %c0_43 = arith.constant 0 : index
    %c0_44 = arith.constant 0 : index
    %124 = vector.load %arg9[%c0_43, %c0_44] : memref<128x4xbf16, #tpu.memory_space<vmem>>, vector<128x4xbf16>
    %cst_45 = arith.constant dense<0.000000e+00> : vector<64x4xf32>
    %125 = tpu.matmul %121, %124, %cst_45 {dimension_numbers = #tpu.dot_dimension_numbers<[1], [0], [0], [1], [0, 0, 1, 1], [], []>} : vector<64x128xbf16>, vector<128x4xbf16>, vector<64x4xf32> -> vector<64x4xf32>
    %126 = vector.extract_strided_slice %125 {offsets = [0, 0], sizes = [64, 1], strides = [1, 1]} : vector<64x4xf32> to vector<64x1xf32>
    %127 = vector.extract_strided_slice %123 {offsets = [0, 0], sizes = [1, 64], strides = [1, 1]} : vector<4x64xf32> to vector<1x64xf32>
    %128 = vector.broadcast %126 : vector<64x1xf32> to vector<64x64xf32>
    %129 = vector.broadcast %127 : vector<1x64xf32> to vector<64x64xf32>
    %130 = arith.addf %128, %129 : vector<64x64xf32>
    %cst_46 = arith.constant 0.000000e+00 : f32
    %131 = vector.broadcast %cst_46 : f32 to vector<64x64xf32>
    %132 = arith.cmpf ogt, %130, %131 : vector<64x64xf32>
    %cst_47 = arith.constant 2.000000e-01 : f32
    %133 = vector.broadcast %cst_47 : f32 to vector<64x64xf32>
    %134 = arith.mulf %133, %130 : vector<64x64xf32>
    %135 = arith.select %132, %130, %134 : vector<64x64xi1>, vector<64x64xf32>
    %136 = arith.addf %135, %1 : vector<64x64xf32>
    %cst_48 = arith.constant dense<0xFF800000> : vector<64xf32>
    %137 = vector.multi_reduction <maximumf>, %136, %cst_48 [1] : vector<64x64xf32> to vector<64xf32>
    %138 = vector.shape_cast %137 : vector<64xf32> to vector<64x1xf32>
    %139 = vector.broadcast %138 : vector<64x1xf32> to vector<64x64xf32>
    %140 = arith.subf %136, %139 : vector<64x64xf32>
    %141 = math.exp %140 : vector<64x64xf32>
    %cst_49 = arith.constant dense<0.000000e+00> : vector<64xf32>
    %142 = vector.multi_reduction <add>, %141, %cst_49 [1] : vector<64x64xf32> to vector<64xf32>
    %143 = vector.shape_cast %142 : vector<64xf32> to vector<64x1xf32>
    %144 = tpu.reciprocal %143 {approx = true} : vector<64x1xf32> -> vector<64x1xf32>
    %145 = vector.broadcast %144 : vector<64x1xf32> to vector<64x64xf32>
    %146 = arith.mulf %141, %145 : vector<64x64xf32>
    %147 = arith.truncf %146 : vector<64x64xf32> to vector<64x64xbf16>
    %148 = vector.extract_strided_slice %121 {offsets = [0, 0], sizes = [64, 32], strides = [1, 1]} : vector<64x128xbf16> to vector<64x32xbf16>
    %cst_50 = arith.constant dense<0.000000e+00> : vector<64x32xf32>
    %149 = tpu.matmul %147, %148, %cst_50 {dimension_numbers = #tpu.dot_dimension_numbers<[1], [0], [0], [1], [0, 0, 1, 1], [], []>} : vector<64x64xbf16>, vector<64x32xbf16>, vector<64x32xf32> -> vector<64x32xf32>
    %150 = vector.extract_strided_slice %125 {offsets = [0, 1], sizes = [64, 1], strides = [1, 1]} : vector<64x4xf32> to vector<64x1xf32>
    %151 = vector.extract_strided_slice %123 {offsets = [1, 0], sizes = [1, 64], strides = [1, 1]} : vector<4x64xf32> to vector<1x64xf32>
    %152 = vector.broadcast %150 : vector<64x1xf32> to vector<64x64xf32>
    %153 = vector.broadcast %151 : vector<1x64xf32> to vector<64x64xf32>
    %154 = arith.addf %152, %153 : vector<64x64xf32>
    %cst_51 = arith.constant 0.000000e+00 : f32
    %155 = vector.broadcast %cst_51 : f32 to vector<64x64xf32>
    %156 = arith.cmpf ogt, %154, %155 : vector<64x64xf32>
    %cst_52 = arith.constant 2.000000e-01 : f32
    %157 = vector.broadcast %cst_52 : f32 to vector<64x64xf32>
    %158 = arith.mulf %157, %154 : vector<64x64xf32>
    %159 = arith.select %156, %154, %158 : vector<64x64xi1>, vector<64x64xf32>
    %160 = arith.addf %159, %1 : vector<64x64xf32>
    %cst_53 = arith.constant dense<0xFF800000> : vector<64xf32>
    %161 = vector.multi_reduction <maximumf>, %160, %cst_53 [1] : vector<64x64xf32> to vector<64xf32>
    %162 = vector.shape_cast %161 : vector<64xf32> to vector<64x1xf32>
    %163 = vector.broadcast %162 : vector<64x1xf32> to vector<64x64xf32>
    %164 = arith.subf %160, %163 : vector<64x64xf32>
    %165 = math.exp %164 : vector<64x64xf32>
    %cst_54 = arith.constant dense<0.000000e+00> : vector<64xf32>
    %166 = vector.multi_reduction <add>, %165, %cst_54 [1] : vector<64x64xf32> to vector<64xf32>
    %167 = vector.shape_cast %166 : vector<64xf32> to vector<64x1xf32>
    %168 = tpu.reciprocal %167 {approx = true} : vector<64x1xf32> -> vector<64x1xf32>
    %169 = vector.broadcast %168 : vector<64x1xf32> to vector<64x64xf32>
    %170 = arith.mulf %165, %169 : vector<64x64xf32>
    %171 = arith.truncf %170 : vector<64x64xf32> to vector<64x64xbf16>
    %172 = vector.extract_strided_slice %121 {offsets = [0, 32], sizes = [64, 32], strides = [1, 1]} : vector<64x128xbf16> to vector<64x32xbf16>
    %cst_55 = arith.constant dense<0.000000e+00> : vector<64x32xf32>
    %173 = tpu.matmul %171, %172, %cst_55 {dimension_numbers = #tpu.dot_dimension_numbers<[1], [0], [0], [1], [0, 0, 1, 1], [], []>} : vector<64x64xbf16>, vector<64x32xbf16>, vector<64x32xf32> -> vector<64x32xf32>
    %174 = vector.extract_strided_slice %125 {offsets = [0, 2], sizes = [64, 1], strides = [1, 1]} : vector<64x4xf32> to vector<64x1xf32>
    %175 = vector.extract_strided_slice %123 {offsets = [2, 0], sizes = [1, 64], strides = [1, 1]} : vector<4x64xf32> to vector<1x64xf32>
    %176 = vector.broadcast %174 : vector<64x1xf32> to vector<64x64xf32>
    %177 = vector.broadcast %175 : vector<1x64xf32> to vector<64x64xf32>
    %178 = arith.addf %176, %177 : vector<64x64xf32>
    %cst_56 = arith.constant 0.000000e+00 : f32
    %179 = vector.broadcast %cst_56 : f32 to vector<64x64xf32>
    %180 = arith.cmpf ogt, %178, %179 : vector<64x64xf32>
    %cst_57 = arith.constant 2.000000e-01 : f32
    %181 = vector.broadcast %cst_57 : f32 to vector<64x64xf32>
    %182 = arith.mulf %181, %178 : vector<64x64xf32>
    %183 = arith.select %180, %178, %182 : vector<64x64xi1>, vector<64x64xf32>
    %184 = arith.addf %183, %1 : vector<64x64xf32>
    %cst_58 = arith.constant dense<0xFF800000> : vector<64xf32>
    %185 = vector.multi_reduction <maximumf>, %184, %cst_58 [1] : vector<64x64xf32> to vector<64xf32>
    %186 = vector.shape_cast %185 : vector<64xf32> to vector<64x1xf32>
    %187 = vector.broadcast %186 : vector<64x1xf32> to vector<64x64xf32>
    %188 = arith.subf %184, %187 : vector<64x64xf32>
    %189 = math.exp %188 : vector<64x64xf32>
    %cst_59 = arith.constant dense<0.000000e+00> : vector<64xf32>
    %190 = vector.multi_reduction <add>, %189, %cst_59 [1] : vector<64x64xf32> to vector<64xf32>
    %191 = vector.shape_cast %190 : vector<64xf32> to vector<64x1xf32>
    %192 = tpu.reciprocal %191 {approx = true} : vector<64x1xf32> -> vector<64x1xf32>
    %193 = vector.broadcast %192 : vector<64x1xf32> to vector<64x64xf32>
    %194 = arith.mulf %189, %193 : vector<64x64xf32>
    %195 = arith.truncf %194 : vector<64x64xf32> to vector<64x64xbf16>
    %196 = vector.extract_strided_slice %121 {offsets = [0, 64], sizes = [64, 32], strides = [1, 1]} : vector<64x128xbf16> to vector<64x32xbf16>
    %cst_60 = arith.constant dense<0.000000e+00> : vector<64x32xf32>
    %197 = tpu.matmul %195, %196, %cst_60 {dimension_numbers = #tpu.dot_dimension_numbers<[1], [0], [0], [1], [0, 0, 1, 1], [], []>} : vector<64x64xbf16>, vector<64x32xbf16>, vector<64x32xf32> -> vector<64x32xf32>
    %198 = vector.extract_strided_slice %125 {offsets = [0, 3], sizes = [64, 1], strides = [1, 1]} : vector<64x4xf32> to vector<64x1xf32>
    %199 = vector.extract_strided_slice %123 {offsets = [3, 0], sizes = [1, 64], strides = [1, 1]} : vector<4x64xf32> to vector<1x64xf32>
    %200 = vector.broadcast %198 : vector<64x1xf32> to vector<64x64xf32>
    %201 = vector.broadcast %199 : vector<1x64xf32> to vector<64x64xf32>
    %202 = arith.addf %200, %201 : vector<64x64xf32>
    %cst_61 = arith.constant 0.000000e+00 : f32
    %203 = vector.broadcast %cst_61 : f32 to vector<64x64xf32>
    %204 = arith.cmpf ogt, %202, %203 : vector<64x64xf32>
    %cst_62 = arith.constant 2.000000e-01 : f32
    %205 = vector.broadcast %cst_62 : f32 to vector<64x64xf32>
    %206 = arith.mulf %205, %202 : vector<64x64xf32>
    %207 = arith.select %204, %202, %206 : vector<64x64xi1>, vector<64x64xf32>
    %208 = arith.addf %207, %1 : vector<64x64xf32>
    %cst_63 = arith.constant dense<0xFF800000> : vector<64xf32>
    %209 = vector.multi_reduction <maximumf>, %208, %cst_63 [1] : vector<64x64xf32> to vector<64xf32>
    %210 = vector.shape_cast %209 : vector<64xf32> to vector<64x1xf32>
    %211 = vector.broadcast %210 : vector<64x1xf32> to vector<64x64xf32>
    %212 = arith.subf %208, %211 : vector<64x64xf32>
    %213 = math.exp %212 : vector<64x64xf32>
    %cst_64 = arith.constant dense<0.000000e+00> : vector<64xf32>
    %214 = vector.multi_reduction <add>, %213, %cst_64 [1] : vector<64x64xf32> to vector<64xf32>
    %215 = vector.shape_cast %214 : vector<64xf32> to vector<64x1xf32>
    %216 = tpu.reciprocal %215 {approx = true} : vector<64x1xf32> -> vector<64x1xf32>
    %217 = vector.broadcast %216 : vector<64x1xf32> to vector<64x64xf32>
    %218 = arith.mulf %213, %217 : vector<64x64xf32>
    %219 = arith.truncf %218 : vector<64x64xf32> to vector<64x64xbf16>
    %220 = vector.extract_strided_slice %121 {offsets = [0, 96], sizes = [64, 32], strides = [1, 1]} : vector<64x128xbf16> to vector<64x32xbf16>
    %cst_65 = arith.constant dense<0.000000e+00> : vector<64x32xf32>
    %221 = tpu.matmul %219, %220, %cst_65 {dimension_numbers = #tpu.dot_dimension_numbers<[1], [0], [0], [1], [0, 0, 1, 1], [], []>} : vector<64x64xbf16>, vector<64x32xbf16>, vector<64x32xf32> -> vector<64x32xf32>
    %222 = tpu.concatenate %149, %173, %197, %221 in 1 : vector<64x32xf32>, vector<64x32xf32>, vector<64x32xf32>, vector<64x32xf32> -> vector<64x128xf32>
    %223 = arith.addf %222, %117 : vector<64x128xf32>
    %cst_66 = arith.constant 0.000000e+00 : f32
    %224 = vector.broadcast %cst_66 : f32 to vector<64x128xf32>
    %225 = arith.cmpf ogt, %223, %224 : vector<64x128xf32>
    %cst_67 = arith.constant 0.000000e+00 : f32
    %226 = vector.broadcast %cst_67 : f32 to vector<64x128xf32>
    %227 = arith.minimumf %223, %226 : vector<64x128xf32>
    %228 = math.exp %227 : vector<64x128xf32>
    %cst_68 = arith.constant 1.000000e+00 : f32
    %229 = vector.broadcast %cst_68 : f32 to vector<64x128xf32>
    %230 = arith.subf %228, %229 : vector<64x128xf32>
    %231 = arith.select %225, %223, %230 : vector<64x128xi1>, vector<64x128xf32>
    %232 = arith.truncf %231 : vector<64x128xf32> to vector<64x128xbf16>
    %c0_69 = arith.constant 0 : index
    %c0_70 = arith.constant 0 : index
    %233 = vector.load %arg10[%c0_69, %c0_70] : memref<128x8xbf16, #tpu.memory_space<vmem>>, vector<128x8xbf16>
    %cst_71 = arith.constant dense<0.000000e+00> : vector<64x8xf32>
    %234 = tpu.matmul %232, %233, %cst_71 {dimension_numbers = #tpu.dot_dimension_numbers<[1], [0], [0], [1], [0, 0, 1, 1], [], []>} : vector<64x128xbf16>, vector<128x8xbf16>, vector<64x8xf32> -> vector<64x8xf32>
    %235 = arith.truncf %234 : vector<64x8xf32> to vector<64x8xbf16>
    %c0_72 = arith.constant 0 : index
    %c0_73 = arith.constant 0 : index
    %236 = vector.load %arg11[%c0_72, %c0_73] : memref<1x8xbf16, #tpu.memory_space<vmem>>, vector<1x8xbf16>
    %cst_74 = arith.constant dense<0.000000e+00> : vector<1x64xf32>
    %237 = tpu.matmul %236, %235, %cst_74 {dimension_numbers = #tpu.dot_dimension_numbers<[1], [1], [0], [0], [0, 0, 1, 0], [], []>} : vector<1x8xbf16>, vector<64x8xbf16>, vector<1x64xf32> -> vector<1x64xf32>
    %c0_75 = arith.constant 0 : index
    %c0_76 = arith.constant 0 : index
    %238 = vector.load %arg12[%c0_75, %c0_76] : memref<8x1xbf16, #tpu.memory_space<vmem>>, vector<8x1xbf16>
    %cst_77 = arith.constant dense<0.000000e+00> : vector<64x1xf32>
    %239 = tpu.matmul %235, %238, %cst_77 {dimension_numbers = #tpu.dot_dimension_numbers<[1], [0], [0], [1], [0, 0, 1, 1], [], []>} : vector<64x8xbf16>, vector<8x1xbf16>, vector<64x1xf32> -> vector<64x1xf32>
    %240 = vector.broadcast %239 : vector<64x1xf32> to vector<64x64xf32>
    %241 = vector.broadcast %237 : vector<1x64xf32> to vector<64x64xf32>
    %242 = arith.addf %240, %241 : vector<64x64xf32>
    %cst_78 = arith.constant 0.000000e+00 : f32
    %243 = vector.broadcast %cst_78 : f32 to vector<64x64xf32>
    %244 = arith.cmpf ogt, %242, %243 : vector<64x64xf32>
    %cst_79 = arith.constant 2.000000e-01 : f32
    %245 = vector.broadcast %cst_79 : f32 to vector<64x64xf32>
    %246 = arith.mulf %245, %242 : vector<64x64xf32>
    %247 = arith.select %244, %242, %246 : vector<64x64xi1>, vector<64x64xf32>
    %248 = arith.addf %247, %1 : vector<64x64xf32>
    %cst_80 = arith.constant dense<0xFF800000> : vector<64xf32>
    %249 = vector.multi_reduction <maximumf>, %248, %cst_80 [1] : vector<64x64xf32> to vector<64xf32>
    %250 = vector.shape_cast %249 : vector<64xf32> to vector<64x1xf32>
    %251 = vector.broadcast %250 : vector<64x1xf32> to vector<64x64xf32>
    %252 = arith.subf %248, %251 : vector<64x64xf32>
    %253 = math.exp %252 : vector<64x64xf32>
    %cst_81 = arith.constant dense<0.000000e+00> : vector<64xf32>
    %254 = vector.multi_reduction <add>, %253, %cst_81 [1] : vector<64x64xf32> to vector<64xf32>
    %255 = vector.shape_cast %254 : vector<64xf32> to vector<64x1xf32>
    %256 = tpu.reciprocal %255 {approx = true} : vector<64x1xf32> -> vector<64x1xf32>
    %257 = vector.broadcast %256 : vector<64x1xf32> to vector<64x64xf32>
    %258 = arith.mulf %253, %257 : vector<64x64xf32>
    %259 = arith.truncf %258 : vector<64x64xf32> to vector<64x64xbf16>
    %cst_82 = arith.constant dense<0.000000e+00> : vector<64x8xf32>
    %260 = tpu.matmul %259, %235, %cst_82 {dimension_numbers = #tpu.dot_dimension_numbers<[1], [0], [0], [1], [0, 0, 1, 1], [], []>} : vector<64x64xbf16>, vector<64x8xbf16>, vector<64x8xf32> -> vector<64x8xf32>
    %c0_83 = arith.constant 0 : index
    %c0_84 = arith.constant 0 : index
    %261 = vector.load %arg13[%c0_83, %c0_84] : memref<128x8xbf16, #tpu.memory_space<vmem>>, vector<128x8xbf16>
    %cst_85 = arith.constant dense<0.000000e+00> : vector<64x8xf32>
    %262 = tpu.matmul %232, %261, %cst_85 {dimension_numbers = #tpu.dot_dimension_numbers<[1], [0], [0], [1], [0, 0, 1, 1], [], []>} : vector<64x128xbf16>, vector<128x8xbf16>, vector<64x8xf32> -> vector<64x8xf32>
    %263 = arith.addf %260, %262 : vector<64x8xf32>
    %c0_86 = arith.constant 0 : index
    %c0_87 = arith.constant 0 : index
    %264 = vector.load %arg14[%c0_86, %c0_87] : memref<64x8xf32, #tpu.memory_space<vmem>>, vector<64x8xf32>
    tpu.vector_store %arg14[%c0_86, %c0_87], %263 {strides = array<i32>} : memref<64x8xf32, #tpu.memory_space<vmem>>, vector<64x8xf32>,
    return
  }
  func.func @transform_0(%arg0: i32) -> (i32, i32) {
    %c0_i32 = arith.constant 0 : i32
    %c0_i32_0 = arith.constant 0 : i32
    %c0_i32_1 = arith.constant 0 : i32
    return %c0_i32, %c0_i32_0 : i32, i32
  }
  func.func @transform_1(%arg0: i32) -> (i32, i32) {
    %c0_i32 = arith.constant 0 : i32
    %c0_i32_0 = arith.constant 0 : i32
    %c0_i32_1 = arith.constant 0 : i32
    return %c0_i32, %c0_i32_0 : i32, i32
  }
  func.func @transform_2(%arg0: i32) -> (i32, i32) {
    %c0_i32 = arith.constant 0 : i32
    %c0_i32_0 = arith.constant 0 : i32
    %c0_i32_1 = arith.constant 0 : i32
    return %c0_i32, %c0_i32_0 : i32, i32
  }
  func.func @transform_3(%arg0: i32) -> (i32, i32) {
    %c0_i32 = arith.constant 0 : i32
    %c0_i32_0 = arith.constant 0 : i32
    %c0_i32_1 = arith.constant 0 : i32
    return %c0_i32, %c0_i32_0 : i32, i32
  }
  func.func @transform_4(%arg0: i32) -> (i32, i32) {
    %c0_i32 = arith.constant 0 : i32
    %c0_i32_0 = arith.constant 0 : i32
    %c0_i32_1 = arith.constant 0 : i32
    return %c0_i32, %c0_i32_0 : i32, i32
  }
  func.func @transform_5(%arg0: i32) -> (i32, i32) {
    %c0_i32 = arith.constant 0 : i32
    %c0_i32_0 = arith.constant 0 : i32
    %c0_i32_1 = arith.constant 0 : i32
    return %c0_i32, %c0_i32_0 : i32, i32
  }
  func.func @transform_6(%arg0: i32) -> (i32, i32) {
    %c0_i32 = arith.constant 0 : i32
    %c0_i32_0 = arith.constant 0 : i32
    %c0_i32_1 = arith.constant 0 : i32
    return %c0_i32, %c0_i32_0 : i32, i32
  }
  func.func @transform_7(%arg0: i32) -> (i32, i32) {
    %c0_i32 = arith.constant 0 : i32
    %c0_i32_0 = arith.constant 0 : i32
    %c0_i32_1 = arith.constant 0 : i32
    return %c0_i32, %c0_i32_0 : i32, i32
  }
  func.func @transform_8(%arg0: i32) -> (i32, i32) {
    %c0_i32 = arith.constant 0 : i32
    %c0_i32_0 = arith.constant 0 : i32
    %c0_i32_1 = arith.constant 0 : i32
    return %c0_i32, %c0_i32_0 : i32, i32
  }
  func.func @transform_9(%arg0: i32) -> (i32, i32) {
    %c0_i32 = arith.constant 0 : i32
    %c0_i32_0 = arith.constant 0 : i32
    %c0_i32_1 = arith.constant 0 : i32
    return %c0_i32, %c0_i32_0 : i32, i32
  }
  func.func @transform_10(%arg0: i32) -> (i32, i32) {
    %c0_i32 = arith.constant 0 : i32
    %c0_i32_0 = arith.constant 0 : i32
    %c0_i32_1 = arith.constant 0 : i32
    return %c0_i32, %c0_i32_0 : i32, i32
  }
  func.func @transform_11(%arg0: i32) -> (i32, i32) {
    %c0_i32 = arith.constant 0 : i32
    %c0_i32_0 = arith.constant 0 : i32
    %c0_i32_1 = arith.constant 0 : i32
    return %c0_i32, %c0_i32_0 : i32, i32
  }
  func.func @transform_12(%arg0: i32) -> (i32, i32) {
    %c0_i32 = arith.constant 0 : i32
    %c0_i32_0 = arith.constant 0 : i32
    %c0_i32_1 = arith.constant 0 : i32
    return %c0_i32, %c0_i32_0 : i32, i32
  }
  func.func @transform_13(%arg0: i32) -> (i32, i32) {
    %c0_i32 = arith.constant 0 : i32
    %c0_i32_0 = arith.constant 0 : i32
    %c0_i32_1 = arith.constant 0 : i32
    return %c0_i32, %c0_i32_0 : i32, i32
  }
}

</mosaic_0001>

<bundles_post_ra>
// kernel: tpu_custom_call.1
= control target key start
LH: loop header
LB: loop body
LE: loop exit
PB: predicated region body
PF: predicated region fallthrough
CT: control target
= control target key end

     0   :  { %vm206_vm0 = vcmask 261120   ;;  %s3932_s15 = smov 64   ;;  %v3933_v63 = vmov 3   ;;  %vm468_vm3 = vcmask 523264   ;;  %s5520_s1 = inlined_call_operand.vmem [shape: bf16[128,32], index: 1, kind: input, shape index: {}]   ;;  %s5521_s0 = inlined_call_operand.vmem [shape: bf16[64,128], index: 0, kind: input, shape index: {}]   ;;  %s5522_s3 = inlined_call_operand.vmem [shape: bf16[32,128], index: 3, kind: input, shape index: {}]   ;;  %s5523_s5 = inlined_call_operand.vmem [shape: bf16[128,4], index: 5, kind: input, shape index: {}]   ;;  %s5524_s4 = inlined_call_operand.vmem [shape: bf16[4,128], index: 4, kind: input, shape index: {}]   ;;  %s5525_s2 = inlined_call_operand.vmem [shape: bf16[64,64], index: 2, kind: input, shape index: {}]   ;;  %s5526_s6 = inlined_call_operand.vmem [shape: bf16[128,128], index: 6, kind: input, shape index: {}]   ;;  %s5527_s8 = inlined_call_operand.vmem [shape: bf16[128,4], index: 8, kind: input, shape index: {}]   ;;  %s5528_s7 = inlined_call_operand.vmem [shape: bf16[4,128], index: 7, kind: input, shape index: {}]   ;;  %s5529_s9 = inlined_call_operand.vmem [shape: bf16[128,8], index: 9, kind: input, shape index: {}]   ;;  %s5530_s11 = inlined_call_operand.vmem [shape: bf16[8,1], index: 11, kind: input, shape index: {}]   ;;  %s5531_s12 = inlined_call_operand.vmem [shape: bf16[128,8], index: 12, kind: input, shape index: {}]   ;;  %s5532_s10 = inlined_call_operand.vmem [shape: bf16[1,8], index: 10, kind: input, shape index: {}]   ;;  %s5533_s13 = inlined_call_operand.vmem [shape: f32[64,8], index: 13, kind: output, shape index: {}]  }
   0x1   :  { %v3477_v0 = vld [vmem:[%s5520_s1 + $0x38] sm:$0xff]  ;;  %v3476_v1 = vld [vmem:[%s5520_s1 + $0x30] sm:$0xff]  ;;  %v3475_v2 = vld [vmem:[%s5520_s1 + $0x28] sm:$0xff]  ;;  %3551 = vset.pattern.permute.xlu2 %v3933_v63 }
   0x2   :  { %157 = vmatpush.bf16.msra.mxu0 %v3477_v0  ;;  %v3474_v3 = vld [vmem:[%s5520_s1 + $0x20] sm:$0xff]  ;;  %v3473_v4 = vld [vmem:[%s5520_s1 + $0x18] sm:$0xff]  ;;  %v3472_v5 = vld [vmem:[%s5520_s1 + $0x10] sm:$0xff]  ;;  %v3934_v0 = vmov 1  }
   0x3   :  { %v3471_v6 = vld [vmem:[%s5520_s1 + $0x8] sm:$0xff]  ;;  %v3470_v7 = vld [vmem:[%s5520_s1] sm:$0xff]  ;;  %v3468_v10 = vld [vmem:[%s5521_s0 + $0x10] sm:$0xff]  ;;  %s3930_s1 = smov 96   ;;  %3550 = vset.pattern.permute.xlu0 %v3934_v0 }
   0x4   :  { %v3466_v8 = vld [vmem:[%s5521_s0] sm:$0xff]  ;;  %v3467_v9 = vld [vmem:[%s5521_s0 + $0x8] sm:$0xff]  ;;  %v3469_v11 = vld [vmem:[%s5521_s0 + $0x18] sm:$0xff] }
   0x5   :  { %v3479_v12 = vld [vmem:[%s5522_s3 + $0x8] sm:$0xff]  ;;  %v3478_v13 = vld [vmem:[%s5522_s3] sm:$0xff]  ;;  %v3487_v20 = vld [vmem:[%s5523_s5 + $0x38] sm:$0xff] }
   0x6   :  { %158 = vmatpush.bf16.msra.mxu0 %v3476_v1  ;;  %225 = vmatpush.bf16.msra.mxu1 %v3479_v12  ;;  %v3486_v21 = vld [vmem:[%s5523_s5 + $0x30] sm:$0xff]  ;;  %v3485_v23 = vld [vmem:[%s5523_s5 + $0x28] sm:$0xff]  ;;  %v3484_v24 = vld [vmem:[%s5523_s5 + $0x20] sm:$0xff]  ;;  %v3935_v1 = vmov 2  }
   0x7   :  { %358 = vmatpush.bf16.msra.mxu3 %v3487_v20  ;;  %v3483_v30 = vld [vmem:[%s5523_s5 + $0x18] sm:$0xff]  ;;  %v3482_v31 = vld [vmem:[%s5523_s5 + $0x10] sm:$0xff]  ;;  %v3481_v32 = vld [vmem:[%s5523_s5 + $0x8] sm:$0xff]  ;;  %3555 = vset.pattern.permute.xlu1 %v3935_v1 }
   0x8   :  { %v3480_v33 = vld [vmem:[%s5523_s5] sm:$0xff]  ;;  %s3931_s5 = smov 32  }
   0x9   :  { %v256_v62 = vld [vmem:[%s5524_s4] sm:$0x3] }
   0xa   :  { %159 = vmatpush.bf16.msra.mxu0 %v3475_v2  ;;  %226 = vmatpush.bf16.msra.mxu1 %v3478_v13 }
   0xb   :  { %359 = vmatpush.bf16.msra.mxu3 %v3486_v21 }
   0xe   :  { %160 = vmatpush.bf16.msra.mxu0 %v3474_v3 }
   0xf   :  { %360 = vmatpush.bf16.msra.mxu3 %v3485_v23 }
  0x12   :  { %161 = vmatpush.bf16.msra.mxu0 %v3473_v4 }
  0x13   :  { %361 = vmatpush.bf16.msra.mxu3 %v3484_v24 }
  0x16   :  { %162 = vmatpush.bf16.msra.mxu0 %v3472_v5 }
  0x17   :  { %362 = vmatpush.bf16.msra.mxu3 %v3483_v30 }
  0x1a   :  { %163 = vmatpush.bf16.msra.mxu0 %v3471_v6 }
  0x1b   :  { %363 = vmatpush.bf16.msra.mxu3 %v3482_v31 }
  0x1e   :  { %164 = vmatpush.bf16.msra.mxu0 %v3470_v7 }
  0x1f   :  { %364 = vmatpush.bf16.msra.mxu3 %v3481_v32 }
  0x21   :  { %165 = vmatmul.bf16.vlgmr.msra.gmra.mxu0 %v3466_v8 }
  0x23   :  { %365 = vmatpush.bf16.msra.mxu3 %v3480_v33 }
  0x31   :  { %170 = vmatmul.bf16.gmra.mxu0 %v3467_v9 }
  0x41   :  { %175 = vmatmul.bf16.gmra.mxu0 %v3468_v10  ;;  %v3936_v10 = vmov 0  }
  0x51   :  { %180 = vmatmul.bf16.gmra.mxu0 %v3469_v11 }
  0x9e   :  { %v166_v14 = vpop.f32.mrf.mxu0 }
  0xa6   :  { %v168_v15 = vpop.f32.mrf.mxu0 }
  0xa7   :  { %v186_v16 = vpack.c.bf16 %v168_v15, %v166_v14 }
  0xa9   :  { %3245 = vmatmul.msk.bf16.vlgmr.msra.gmra.mxu1 %vm206_vm0, %v186_v16 }
  0xae   :  { %v171_v17 = vpop.f32.mrf.mxu0 }
  0xb6   :  { %v173_v18 = vpop.f32.mrf.mxu0 }
  0xb7   :  { %v187_v19 = vpack.c.bf16 %v173_v18, %v171_v17 }
  0xb9   :  { %3246 = vmatmul.msk.bf16.gmra.mxu1 %vm206_vm0, %v187_v19 }
  0xbe   :  { %v176_v22 = vpop.f32.mrf.mxu0 }
  0xc6   :  { %v178_v25 = vpop.f32.mrf.mxu0 }
  0xc7   :  { %v188_v26 = vpack.c.bf16 %v178_v25, %v176_v22 }
  0xc9   :  { %3247 = vmatmul.msk.bf16.gmra.mxu1 %vm206_vm0, %v188_v26 }
  0xce   :  { %v181_v27 = vpop.f32.mrf.mxu0 }
  0xd6   :  { %v183_v28 = vpop.f32.mrf.mxu0 }
  0xd7   :  { %v189_v29 = vpack.c.bf16 %v183_v28, %v181_v27  ;;  %v3521_v27 = vld [vmem:[%s5525_s2] sm:$0xff]  }
  0xd9   :  { %3248 = vmatmul.msk.bf16.gmra.mxu1 %vm206_vm0, %v189_v29  ;;  %v4149_v29 = vunpack.c.l.bf16 %v3521_v27 }
  0xdb   :  { %5546 = vst [vmem:[#allocation2_spill] sm:$0xff] %v4149_v29 }
 0x126   :  { %v228_v34 = vpop.f32.mrf.mxu1 }
 0x127   :  { %v248_v35 = vpack.c.bf16 %v228_v34, %v228_v34 }
 0x129   :  { %v265_v38 = vunpack.c.l.b16 %v248_v35 }
 0x12e   :  { %v230_v36 = vpop.f32.mrf.mxu1 }
 0x12f   :  { %v249_v37 = vpack.c.bf16 %v230_v36, %v230_v36 }
 0x131   :  { %v266_v39 = vunpack.c.l.b16 %v249_v37 }
 0x133   :  { %v4077_v40 = vpack.c.b16 %v266_v39, %v265_v38 }
 0x135   :  { %767 = vrot.lane.b32.xlu2 %v4077_v40, %s3930_s1  ;;  %366 = vmatmul.bf16.vlgmr.msra.gmra.mxu3 %v4077_v40 }
 0x136   :  { %v233_v41 = vpop.f32.mrf.mxu1 }
 0x137   :  { %v250_v42 = vpack.c.bf16 %v233_v41, %v233_v41 }
 0x139   :  { %v267_v45 = vunpack.c.l.b16 %v250_v42 }
 0x13e   :  { %v235_v43 = vpop.f32.mrf.mxu1 }
 0x13f   :  { %v251_v44 = vpack.c.bf16 %v235_v43, %v235_v43 }
 0x141   :  { %v268_v46 = vunpack.c.l.b16 %v251_v44 }
 0x143   :  { %v4082_v47 = vpack.c.b16 %v268_v46, %v267_v45 }
 0x145   :  { %1205 = vrot.lane.b32.xlu1 %v4082_v47, %s3931_s5  ;;  %769 = vrot.lane.b32.xlu0 %v4082_v47, %s3930_s1 }
 0x146   :  { %371 = vmatmul.bf16.gmra.mxu3 %v4082_v47  ;;  %v238_v48 = vpop.f32.mrf.mxu1 }
 0x147   :  { %v252_v49 = vpack.c.bf16 %v238_v48, %v238_v48 }
 0x149   :  { %v269_v51 = vunpack.c.l.b16 %v252_v49 }
 0x14e   :  { %v240_v50 = vpop.f32.mrf.mxu1 }
 0x14f   :  { %v253_v52 = vpack.c.bf16 %v240_v50, %v240_v50 }
 0x151   :  { %v270_v53 = vunpack.c.l.b16 %v253_v52 }
 0x153   :  { %v4089_v54 = vpack.c.b16 %v270_v53, %v269_v51  ;;  %v4178_v53 = vunpack.c.h.bf16 %v3521_v27 }
 0x155   :  { %771 = vrot.lane.b32.xlu0 %v4089_v54, %s3930_s1  ;;  %5547 = vst [vmem:[#allocation3_spill] sm:$0xff] %v4178_v53 }
 0x156   :  { %376 = vmatmul.bf16.gmra.mxu3 %v4089_v54  ;;  %v243_v55 = vpop.f32.mrf.mxu1 }
 0x157   :  { %v254_v56 = vpack.c.bf16 %v243_v55, %v243_v55 }
 0x159   :  { %v271_v58 = vunpack.c.l.b16 %v254_v56 }
 0x15d   :  { %1207 = vrot.lane.b32.xlu0 %v4089_v54, %s3931_s5 }
 0x15e   :  { %v245_v57 = vpop.f32.mrf.mxu1 }
 0x15f   :  { %v255_v59 = vpack.c.bf16 %v245_v57, %v245_v57 }
 0x161   :  { %v272_v60 = vunpack.c.l.b16 %v255_v59 }
 0x163   :  { %v276_v61 = vpack.c.b16 %v272_v60, %v271_v58 }
 0x165   :  { %285 = vmatpush.bf16.xpose.msra.mxu2 %v276_v61  ;;  %773 = vrot.lane.b32.xlu2 %v276_v61, %s3930_s1 }
 0x166   :  { %381 = vmatmul.bf16.gmra.mxu3 %v276_v61  ;;  %991 = vrot.lane.b32.xlu1 %v276_v61, %s3932_s15 }
 0x16d   :  { %286 = vmatpush.bf16.xpose.msra.mxu2 %v4089_v54  ;;  %1209 = vrot.lane.b32.xlu2 %v276_v61, %s3931_s5 }
 0x175   :  { %287 = vmatpush.bf16.xpose.msra.mxu2 %v4082_v47 }
 0x17d   :  { %288 = vmatpush.bf16.xpose.msra.mxu2 %v4077_v40 }
 0x184   :  { %289 = vmatmul.bf16.vlgmr.msra.gmra.mxu2 %v256_v62 }
 0x185   :  { %577 = vmatpush.bf16.msrb.mxu2 %v276_v61 }
 0x189   :  { %578 = vmatpush.bf16.msrb.mxu2 %v4089_v54 }
 0x18d   :  { %579 = vmatpush.bf16.msrb.mxu2 %v4082_v47 }
 0x18f   :  { %v768_v2 = vpop.permute.xlu2 %767 }
 0x191   :  { %580 = vmatpush.bf16.msrb.mxu2 %v4077_v40 }
 0x1b7   :  { %v770_v4 = vpop.permute.xlu0 %769  ;;  %v1206_v13 = vpop.permute.xlu1 %1205 }
 0x1b8   :  { %v367_v3 = vpop.f32.mrf.mxu3 }
 0x1b9   :  { %603 = vperm.xlu0 %3550, %v367_v3   ;;  %1039 = vperm.xlu2 %3551, %v367_v3  }
 0x1bf   :  { %v774_v5 = vpop.permute.xlu2 %773 }
 0x1c0   :  { %v369_v6 = vpop.f32.mrf.mxu3  ;;  %795 = vmatpush.bf16.msrb.mxu0 %v774_v5  ;;  %3539 = vmatpush.bf16.msrb.mxu1 %v774_v5 }
 0x1c1   :  { %3552 = vset.pattern.permute.xlu0 %v3935_v1  ;;  %825 = vperm.xlu1 %3555, %v369_v6  }
 0x1c2   :  { %1043 = vperm.xlu2 %3551, %v369_v6   ;;  %821 = vperm.xlu0 %3552, %v367_v3  }
 0x1c7   :  { %v772_v7 = vpop.permute.xlu0 %771  ;;  %v1210_v8 = vpop.permute.xlu2 %1209 }
 0x1c8   :  { %796 = vmatpush.bf16.msrb.mxu0 %v772_v7  ;;  %3540 = vmatpush.bf16.msrb.mxu1 %v772_v7 }
 0x1c9   :  { %v372_v9 = vpop.f32.mrf.mxu3  ;;  %3557 = vset.pattern.permute.xlu1 %v3934_v0  ;;  %1231 = vmatpush.bf16.msrb.mxu3 %v1210_v8 }
 0x1ca   :  { %3556 = vset.pattern.permute.xlu2 %v3936_v10  ;;  %3553 = vset.pattern.permute.xlu0 %v3936_v10 }
 0x1cb   :  { %611 = vperm.xlu1 %3557, %v372_v9   ;;  %394 = vperm.xlu2 %3556, %v369_v6  }
 0x1cc   :  { %389 = vperm.xlu0 %3553, %v367_v3   ;;  %797 = vmatpush.bf16.msrb.mxu0 %v770_v4 }
 0x1cd   :  { %3541 = vmatpush.bf16.msrb.mxu1 %v770_v4 }
 0x1cf   :  { %v1208_v11 = vpop.permute.xlu0 %1207 }
 0x1d0   :  { %798 = vmatpush.bf16.msrb.mxu0 %v768_v2  ;;  %1232 = vmatpush.bf16.msrb.mxu3 %v1208_v11 }
 0x1d1   :  { %v374_v12 = vpop.f32.mrf.mxu3  ;;  %3542 = vmatpush.bf16.msrb.mxu1 %v768_v2 }
 0x1d3   :  { %3559 = vset.pattern.permute.xlu1 %v3935_v1  ;;  %3558 = vset.pattern.permute.xlu2 %v3933_v63 }
 0x1d4   :  { %3554 = vset.pattern.permute.xlu0 %v3934_v0  ;;  %829 = vperm.xlu1 %3559, %v372_v9  }
 0x1d5   :  { %1047 = vperm.xlu2 %3558, %v372_v9   ;;  %607 = vperm.xlu0 %3554, %v369_v6  }
 0x1d6   :  { %1233 = vmatpush.bf16.msrb.mxu3 %v1206_v13  ;;  %v3536_v13 = vld [vmem:[%s5525_s2 + $0x8] sm:$0xff]  }
 0x1d8   :  { %v992_v16 = vpop.permute.xlu1 %991 }
 0x1d9   :  { %v377_v14 = vpop.f32.mrf.mxu3  ;;  %1013 = vmatpush.bf16.msra.mxu0 %v992_v16 }
 0x1dc   :  { %3560 = vset.pattern.permute.xlu1 %v3936_v10 }
 0x1dd   :  { %3564 = vset.pattern.permute.xlu2 %v3936_v10  ;;  %3568 = vset.pattern.permute.xlu0 %v3936_v10 }
 0x1de   :  { %399 = vperm.xlu1 %3560, %v372_v9   ;;  %404 = vperm.xlu2 %3564, %v374_v12  }
 0x1df   :  { %409 = vperm.xlu0 %3568, %v377_v14  }
 0x1e1   :  { %v379_v15 = vpop.f32.mrf.mxu3 }
 0x1e6   :  { %3561 = vset.pattern.permute.xlu1 %v3934_v0  ;;  %3567 = vset.pattern.permute.xlu2 %v3935_v1 }
 0x1e7   :  { %615 = vperm.xlu1 %3561, %v374_v12   ;;  %837 = vperm.xlu2 %3567, %v377_v14  }
 0x1e8   :  { %3573 = vset.pattern.permute.xlu0 %v3933_v63 }
 0x1e9   :  { %v382_v17 = vpop.f32.mrf.mxu3 }
 0x1ea   :  { %1063 = vperm.xlu0 %3573, %v382_v17  }
 0x1ef   :  { %3562 = vset.pattern.permute.xlu1 %v3933_v63  ;;  %3570 = vset.pattern.permute.xlu2 %v3934_v0 }
 0x1f0   :  { %1051 = vperm.xlu1 %3562, %v374_v12   ;;  %623 = vperm.xlu2 %3570, %v379_v15  }
 0x1f1   :  { %v4129_v18 = vpop.f32.mrf.mxu3 }
 0x1f2   :  { %3574 = vset.pattern.permute.xlu0 %v3934_v0 }
 0x1f3   :  { %627 = vperm.xlu0 %3574, %v382_v17  }
 0x1f8   :  { %3563 = vset.pattern.permute.xlu1 %v3935_v1  ;;  %3571 = vset.pattern.permute.xlu2 %v3935_v1 }
 0x1f9   :  { %833 = vperm.xlu1 %3563, %v374_v12   ;;  %841 = vperm.xlu2 %3571, %v379_v15  }
 0x1fb   :  { %3580 = vset.pattern.permute.xlu0 %v3936_v10 }
 0x1fc   :  { %424 = vperm.xlu0 %3580, %v4129_v18  }
 0x201   :  { %3565 = vset.pattern.permute.xlu1 %v3933_v63 }
 0x202   :  { %1055 = vperm.xlu1 %3565, %v377_v14  }
 0x204   :  { %3582 = vset.pattern.permute.xlu0 %v3934_v0 }
 0x207   :  { %v290_v19 = vpop.f32.mrf.mxu2 }
 0x208   :  { %v4139_v21 = vperm.slane %v290_v19, 1  ;;  %v4141_v22 = vperm.slane %v290_v19, 3  ;;  %v4151_v30 = vperm.slane %v290_v19, 2  ;;  %v4174_v51 = vperm.slane %v290_v19, 0 }
 0x20a   :  { %3566 = vset.pattern.permute.xlu1 %v3934_v0 }
 0x20b   :  { %619 = vperm.xlu1 %3566, %v377_v14  }
 0x20f   :  { %v292_v20 = vpop.f32.mrf.mxu2 }
 0x213   :  { %3569 = vset.pattern.permute.xlu1 %v3933_v63  ;;  %v1040_v23 = vpop.permute.xlu2 %1039 }
 0x214   :  { %1059 = vperm.xlu1 %3569, %v379_v15   ;;  %v1071_v25 = vadd.f32 %v4141_v22, %v1040_v23 }
 0x216   :  { %v1087_v31 = vmul.f32 0.2, %v1071_v25  ;;  %vm1079_vm2 = vcmp.gt.f32.partialorder %v1071_v25, 0.0 }
 0x218   :  { %v1095_v38 = vsel %vm1079_vm2, %v1071_v25, %v1087_v31 }
 0x219   :  { %v4162_v42 = vadd.f32 %v4149_v29, %v1095_v38 }
 0x21b   :  { %v1111_v48 = vsel %vm468_vm3, %v4162_v42, -inf }
 0x21c   :  { %3572 = vset.pattern.permute.xlu1 %v3936_v10  ;;  %v4164_v43 = vpop.permute.xlu2 %1043 }
 0x21d   :  { %414 = vperm.xlu1 %3572, %v379_v15  }
 0x225   :  { %3575 = vset.pattern.permute.xlu1 %v3935_v1  ;;  %v4186_v59 = vpop.permute.xlu2 %394 }
 0x226   :  { %845 = vperm.xlu1 %3575, %v382_v17  }
 0x22b   :  { %v604_v24 = vpop.permute.xlu0 %603 }
 0x22c   :  { %v635_v26 = vadd.f32 %v4139_v21, %v604_v24 }
 0x22e   :  { %v651_v28 = vmul.f32 0.2, %v635_v26  ;;  %3576 = vset.pattern.permute.xlu1 %v3936_v10  ;;  %vm643_vm1 = vcmp.gt.f32.partialorder %v635_v26, 0.0 }
 0x22f   :  { %419 = vperm.xlu1 %3576, %v382_v17   ;;  %v4199_v8 = vpop.permute.xlu2 %1047 }
 0x230   :  { %v659_v32 = vsel %vm643_vm1, %v635_v26, %v651_v28 }
 0x231   :  { %v4154_v33 = vadd.f32 %v4149_v29, %v659_v32 }
 0x233   :  { %v826_v34 = vpop.permute.xlu1 %825  ;;  %v675_v35 = vsel %vm468_vm3, %v4154_v33, -inf }
 0x234   :  { %v854_v36 = vadd.f32 %v4151_v30, %v826_v34  ;;  %v822_v37 = vpop.permute.xlu0 %821  ;;  %676 = vmax.xlane.f32.xlu2 %v675_v35  ;;  %v4226_v34 = vunpack.c.h.bf16 %v3536_v13 }
 0x235   :  { %v853_v39 = vadd.f32 %v4151_v30, %v822_v37 }
 0x236   :  { %v870_v44 = vmul.f32 0.2, %v854_v36  ;;  %vm862_vm5 = vcmp.gt.f32.partialorder %v854_v36, 0.0  ;;  %5549 = vst [vmem:[#allocation5_spill] sm:$0xff] %v4226_v34 }
 0x237   :  { %v869_v41 = vmul.f32 0.2, %v853_v39  ;;  %3577 = vset.pattern.permute.xlu1 %v3933_v63  ;;  %vm861_vm4 = vcmp.gt.f32.partialorder %v853_v39, 0.0 }
 0x238   :  { %1067 = vperm.xlu1 %3577, %v4129_v18   ;;  %v878_v50 = vsel %vm862_vm5, %v854_v36, %v870_v44  ;;  %v4216_v24 = vpop.permute.xlu2 %404 }
 0x239   :  { %v877_v45 = vsel %vm861_vm4, %v853_v39, %v869_v41  ;;  %v4182_v57 = vadd.f32 %v4178_v53, %v878_v50 }
 0x23a   :  { %v4168_v46 = vadd.f32 %v4149_v29, %v877_v45 }
 0x23b   :  { %v896_v60 = vsel %vm468_vm3, %v4182_v57, -inf }
 0x23c   :  { %1112 = vmax.xlane.f32.xlu2 %v1111_v48  ;;  %v893_v49 = vsel %vm468_vm3, %v4168_v46, -inf  ;;  %v1072_v48 = vadd.f32 %v4141_v22, %v4164_v43 }
 0x23d   :  { %v4176_v52 = vpop.permute.xlu1 %611  ;;  %894 = vmax.xlane.f32.xlu0 %v893_v49 }
 0x23e   :  { %v390_v55 = vpop.permute.xlu0 %389  ;;  %vm1080_vm13 = vcmp.gt.f32.partialorder %v1072_v48, 0.0 }
 0x23f   :  { %v428_v56 = vadd.f32 %v4174_v51, %v390_v55 }
 0x240   :  { %3578 = vset.pattern.permute.xlu1 %v3934_v0 }
 0x241   :  { %v444_v58 = vmul.f32 0.2, %v428_v56  ;;  %631 = vperm.xlu1 %3578, %v4129_v18   ;;  %vm436_vm6 = vcmp.gt.f32.partialorder %v428_v56, 0.0  ;;  %v838_v35 = vpop.permute.xlu2 %837 }
 0x242   :  { %v857_v44 = vadd.f32 %v4151_v30, %v838_v35 }
 0x243   :  { %v452_v61 = vsel %vm436_vm6, %v428_v56, %v444_v58  ;;  %v3537_v56 = vld [vmem:[%s5525_s2 + $0x10] sm:$0xff]   ;;  %v1088_v58 = vmul.f32 0.2, %v1072_v48 }
 0x244   :  { %897 = vmax.xlane.f32.xlu2 %v896_v60  ;;  %v4191_v62 = vadd.f32 %v4149_v29, %v452_v61  ;;  %v873_v50 = vmul.f32 0.2, %v857_v44  ;;  %vm865_vm12 = vcmp.gt.f32.partialorder %v857_v44, 0.0 }
 0x246   :  { %v830_v2 = vpop.permute.xlu1 %829  ;;  %v469_v3 = vsel %vm468_vm3, %v4191_v62, -inf }
 0x247   :  { %v608_v4 = vpop.permute.xlu0 %607  ;;  %470 = vmax.xlane.f32.xlu0 %v469_v3  ;;  %v855_v5 = vadd.f32 %v4151_v30, %v830_v2  ;;  %v4249_v3 = vunpack.c.l.bf16 %v3537_v56 }
 0x248   :  { %v636_v6 = vadd.f32 %v4139_v21, %v608_v4 }
 0x249   :  { %3579 = vset.pattern.permute.xlu1 %v3935_v1  ;;  %v871_v9 = vmul.f32 0.2, %v855_v5  ;;  %vm863_vm8 = vcmp.gt.f32.partialorder %v855_v5, 0.0  ;;  %5550 = vst [vmem:[#allocation6_spill] sm:$0xff] %v4249_v3 }
 0x24a   :  { %v652_v7 = vmul.f32 0.2, %v636_v6  ;;  %849 = vperm.xlu1 %3579, %v4129_v18   ;;  %vm644_vm7 = vcmp.gt.f32.partialorder %v636_v6, 0.0  ;;  %v4210_v18 = vunpack.c.l.bf16 %v3536_v13  ;;  %v4242_v60 = vpop.permute.xlu2 %623 }
 0x24b   :  { %v879_v16 = vsel %vm863_vm8, %v855_v5, %v871_v9 }
 0x24c   :  { %v660_v11 = vsel %vm644_vm7, %v636_v6, %v652_v7  ;;  %5548 = vst [vmem:[#allocation4_spill] sm:$0xff] %v4210_v18  ;;  %v4214_v20 = vadd.f32 %v4210_v18, %v879_v16  ;;  %v881_v6 = vsel %vm865_vm12, %v857_v44, %v873_v50  ;;  %v429_v7 = vadd.f32 %v4174_v51, %v4186_v59 }
 0x24d   :  { %v4202_v12 = vadd.f32 %v4178_v53, %v660_v11  ;;  %v1096_v11 = vsel %vm1080_vm13, %v1072_v48, %v1088_v58 }
 0x24e   :  { %v899_v26 = vsel %vm468_vm3, %v4214_v20, -inf  ;;  %v4259_v16 = vadd.f32 %v4178_v53, %v1096_v11  ;;  %vm437_vm1 = vcmp.gt.f32.partialorder %v429_v7, 0.0 }
 0x24f   :  { %v678_v14 = vsel %vm468_vm3, %v4202_v12, -inf }
 0x250   :  { %v400_v15 = vpop.permute.xlu1 %399  ;;  %679 = vmax.xlane.f32.xlu0 %v678_v14  ;;  %v4256_v14 = vadd.f32 %v4249_v3, %v881_v6 }
 0x251   :  { %v430_v17 = vadd.f32 %v4174_v51, %v400_v15  ;;  %v4231_v38 = vpop.permute.xlu0 %409 }
 0x252   :  { %3581 = vset.pattern.permute.xlu1 %v3936_v10 }
 0x253   :  { %v446_v19 = vmul.f32 0.2, %v430_v17  ;;  %vm438_vm9 = vcmp.gt.f32.partialorder %v430_v17, 0.0 }
 0x255   :  { %v454_v23 = vsel %vm438_vm9, %v430_v17, %v446_v19  ;;  %v4264_v17 = vld [vmem:[%s5525_s2 + $0x18] sm:$0xff]   ;;  %v445_v19 = vmul.f32 0.2, %v429_v7 }
 0x256   :  { %v4219_v25 = vadd.f32 %v4210_v18, %v454_v23 }
 0x258   :  { %v475_v27 = vsel %vm468_vm3, %v4219_v25, -inf  ;;  %900 = vmax.xlane.f32.xlu0 %v899_v26  ;;  %v842_v26 = vpop.permute.xlu2 %841 }
 0x259   :  { %v616_v28 = vpop.permute.xlu1 %615  ;;  %476 = vmax.xlane.f32.xlu2 %v475_v27  ;;  %v905_v27 = vsel %vm468_vm3, %v4256_v14, -inf  ;;  %v858_v44 = vadd.f32 %v4151_v30, %v842_v26  ;;  %v431_v26 = vadd.f32 %v4174_v51, %v4216_v24 }
 0x25a   :  { %v638_v31 = vadd.f32 %v4139_v21, %v616_v28  ;;  %v4272_v28 = vunpack.c.l.bf16 %v4264_v17 }
 0x25b   :  { %v874_v58 = vmul.f32 0.2, %v858_v44  ;;  %vm866_vm5 = vcmp.gt.f32.partialorder %v858_v44, 0.0  ;;  %vm439_vm7 = vcmp.gt.f32.partialorder %v431_v26, 0.0 }
 0x25c   :  { %v654_v32 = vmul.f32 0.2, %v638_v31  ;;  %vm646_vm10 = vcmp.gt.f32.partialorder %v638_v31, 0.0  ;;  %v1064_v61 = vpop.permute.xlu0 %1063  ;;  %5551 = vst [vmem:[#allocation7_spill] sm:$0xff] %v4272_v28 }
 0x25d   :  { %v1077_v4 = vadd.f32 %v4141_v22, %v1064_v61  ;;  %v882_v11 = vsel %vm866_vm5, %v858_v44, %v874_v58 }
 0x25e   :  { %v662_v36 = vsel %vm646_vm10, %v638_v31, %v654_v32  ;;  %v1114_v31 = vsel %vm468_vm3, %v4259_v16, -inf }
 0x25f   :  { %v4229_v37 = vadd.f32 %v4226_v34, %v662_v36  ;;  %v1093_v15 = vmul.f32 0.2, %v1077_v4  ;;  %vm1085_vm15 = vcmp.gt.f32.partialorder %v1077_v4, 0.0  ;;  %v637_v36 = vadd.f32 %v4139_v21, %v4176_v52 }
 0x261   :  { %v684_v39 = vsel %vm468_vm3, %v4229_v37, -inf  ;;  %v1101_v35 = vsel %vm1085_vm15, %v1077_v4, %v1093_v15  ;;  %vm645_vm4 = vcmp.gt.f32.partialorder %v637_v36, 0.0 }
 0x262   :  { %v1052_v41 = vpop.permute.xlu1 %1051  ;;  %685 = vmax.xlane.f32.xlu0 %v684_v39  ;;  %v4283_v48 = vadd.f32 %v4272_v28, %v1101_v35  ;;  %v447_v35 = vmul.f32 0.2, %v431_v26 }
 0x263   :  { %v1074_v45 = vadd.f32 %v4141_v22, %v1052_v41  ;;  %v453_v41 = vsel %vm437_vm1, %v429_v7, %v445_v19 }
 0x264   :  { %v4286_v50 = vadd.f32 %v4178_v53, %v453_v41  ;;  %v1129_v52 = vsel %vm468_vm3, %v4283_v48, -inf  ;;  %v455_v41 = vsel %vm439_vm7, %v431_v26, %v447_v35 }
 0x265   :  { %v1090_v49 = vmul.f32 0.2, %v1074_v45  ;;  %vm1082_vm11 = vcmp.gt.f32.partialorder %v1074_v45, 0.0  ;;  %v4322_v44 = vadd.f32 %v4226_v34, %v455_v41 }
 0x266   :  { %v472_v4 = vsel %vm468_vm3, %v4286_v50, -inf }
 0x267   :  { %v1098_v55 = vsel %vm1082_vm11, %v1074_v45, %v1090_v49 }
 0x268   :  { %v4245_v2 = vadd.f32 %v4226_v34, %v1098_v55  ;;  %v653_v55 = vmul.f32 0.2, %v637_v36 }
 0x26a   :  { %v1120_v43 = vsel %vm468_vm3, %v4245_v2, -inf  ;;  %v661_v7 = vsel %vm645_vm4, %v637_v36, %v653_v55 }
 0x26b   :  { %v834_v5 = vpop.permute.xlu1 %833  ;;  %1121 = vmax.xlane.f32.xlu2 %v1120_v43  ;;  %v4302_v15 = vadd.f32 %v4210_v18, %v661_v7 }
 0x26c   :  { %v856_v9 = vadd.f32 %v4151_v30, %v834_v5  ;;  %v1073_v5 = vadd.f32 %v4141_v22, %v4199_v8 }
 0x26d   :  { %v681_v8 = vsel %vm468_vm3, %v4302_v15, -inf }
 0x26e   :  { %v872_v13 = vmul.f32 0.2, %v856_v9  ;;  %vm864_vm14 = vcmp.gt.f32.partialorder %v856_v9, 0.0  ;;  %v1089_v19 = vmul.f32 0.2, %v1073_v5  ;;  %vm1081_vm6 = vcmp.gt.f32.partialorder %v1073_v5, 0.0 }
 0x270   :  { %v880_v23 = vsel %vm864_vm14, %v856_v9, %v872_v13  ;;  %v4299_v13 = vunpack.c.h.bf16 %v3537_v56  ;;  %v1097_v56 = vsel %vm1081_vm6, %v1073_v5, %v1089_v19  ;;  %vm1368_vm6 = vcmask 785408  }
 0x271   :  { %v4267_v59 = vadd.f32 %v4226_v34, %v880_v23 }
 0x272   :  { %5552 = vst [vmem:[#allocation8_spill] sm:$0xff] %v4299_v13  ;;  %v4305_v23 = vadd.f32 %v4299_v13, %v882_v11 }
 0x273   :  { %906 = vmax.xlane.f32.xlu2 %v905_v27  ;;  %v902_v32 = vsel %vm468_vm3, %v4267_v59, -inf }
 0x274   :  { %v1056_v39 = vpop.permute.xlu1 %1055  ;;  %1115 = vmax.xlane.f32.xlu1 %v1114_v31  ;;  %903 = vmax.xlane.f32.xlu0 %v902_v32  ;;  %v908_v27 = vsel %vm468_vm3, %v4305_v23, -inf  ;;  %v4314_v32 = vadd.f32 %v4210_v18, %v1097_v56 }
 0x275   :  { %v1075_v45 = vadd.f32 %v4141_v22, %v1056_v39 }
 0x276   :  { %v1117_v36 = vsel %vm468_vm3, %v4314_v32, -inf }
 0x277   :  { %v1091_v49 = vmul.f32 0.2, %v1075_v45  ;;  %vm1083_vm2 = vcmp.gt.f32.partialorder %v1075_v45, 0.0 }
 0x279   :  { %v1099_v61 = vsel %vm1083_vm2, %v1075_v45, %v1091_v49  ;;  %v478_v49 = vsel %vm468_vm3, %v4322_v44, -inf }
 0x27a   :  { %v4291_v43 = vadd.f32 %v4249_v3, %v1099_v61 }
 0x27b   :  { %1130 = vmax.xlane.f32.xlu2 %v1129_v52 }
 0x27c   :  { %473 = vmax.xlane.f32.xlu1 %v472_v4  ;;  %v1123_v6 = vsel %vm468_vm3, %v4291_v43, -inf }
 0x27d   :  { %v620_v9 = vpop.permute.xlu1 %619  ;;  %1124 = vmax.xlane.f32.xlu0 %v1123_v6 }
 0x27e   :  { %v639_v39 = vadd.f32 %v4139_v21, %v620_v9  ;;  %v640_v9 = vadd.f32 %v4139_v21, %v4242_v60 }
 0x280   :  { %v655_v45 = vmul.f32 0.2, %v639_v39  ;;  %vm647_vm8 = vcmp.gt.f32.partialorder %v639_v39, 0.0  ;;  %v656_v56 = vmul.f32 0.2, %v640_v9  ;;  %vm648_vm11 = vcmp.gt.f32.partialorder %v640_v9, 0.0 }
 0x282   :  { %v663_v58 = vsel %vm647_vm8, %v639_v39, %v655_v45  ;;  %v664_v39 = vsel %vm648_vm11, %v640_v9, %v656_v56 }
 0x283   :  { %v4328_v61 = vadd.f32 %v4249_v3, %v663_v58  ;;  %v4349_v41 = vadd.f32 %v4299_v13, %v664_v39 }
 0x284   :  { %682 = vmax.xlane.f32.xlu1 %v681_v8  ;;  %v628_v8 = vpop.permute.xlu0 %627 }
 0x285   :  { %909 = vmax.xlane.f32.xlu0 %v908_v27  ;;  %v687_v7 = vsel %vm468_vm3, %v4328_v61, -inf }
 0x286   :  { %v1060_v31 = vpop.permute.xlu1 %1059 }
 0x287   :  { %v1076_v55 = vadd.f32 %v4141_v22, %v1060_v31 }
 0x289   :  { %v1092_v52 = vmul.f32 0.2, %v1076_v55  ;;  %vm1084_vm9 = vcmp.gt.f32.partialorder %v1076_v55, 0.0 }
 0x28b   :  { %v1100_v11 = vsel %vm1084_vm9, %v1076_v55, %v1092_v52  ;;  %v690_v52 = vsel %vm468_vm3, %v4349_v41, -inf }
 0x28c   :  { %1118 = vmax.xlane.f32.xlu1 %v1117_v36  ;;  %v4339_v27 = vadd.f32 %v4299_v13, %v1100_v11  ;;  %v641_v36 = vadd.f32 %v4139_v21, %v628_v8 }
 0x28e   :  { %v1126_v60 = vsel %vm468_vm3, %v4339_v27, -inf  ;;  %v657_v45 = vmul.f32 0.2, %v641_v36  ;;  %vm649_vm12 = vcmp.gt.f32.partialorder %v641_v36, 0.0 }
 0x28f   :  { %v4319_v24 = vpop.permute.xlu1 %414 }
 0x294   :  { %479 = vmax.xlane.f32.xlu1 %v478_v49  ;;  %v4351_v49 = vpop.permute.xlu0 %424 }
 0x298   :  { %v846_v4 = vpop.permute.xlu1 %845 }
 0x299   :  { %v859_v5 = vadd.f32 %v4151_v30, %v846_v4  ;;  %v665_v4 = vsel %vm649_vm12, %v641_v36, %v657_v45 }
 0x29a   :  { %v4360_v9 = vadd.f32 %v4272_v28, %v665_v4 }
 0x29b   :  { %v875_v6 = vmul.f32 0.2, %v859_v5  ;;  %vm867_vm10 = vcmp.gt.f32.partialorder %v859_v5, 0.0 }
 0x29c   :  { %688 = vmax.xlane.f32.xlu1 %v687_v7 }
 0x29d   :  { %v883_v19 = vsel %vm867_vm10, %v859_v5, %v875_v6  ;;  %v4357_v6 = vunpack.c.h.bf16 %v4264_v17 }
 0x29e   :  { %v4336_v26 = vadd.f32 %v4272_v28, %v883_v19 }
 0x29f   :  { %5553 = vst [vmem:[#allocation9_spill] sm:$0xff] %v4357_v6 }
 0x2a0   :  { %v911_v31 = vsel %vm468_vm3, %v4336_v26, -inf }
 0x2a1   :  { %v4343_v35 = vpop.permute.xlu1 %419  ;;  %912 = vmax.xlane.f32.xlu0 %v911_v31  ;;  %v693_v31 = vsel %vm468_vm3, %v4360_v9, -inf }
 0x2a4   :  { %1127 = vmax.xlane.f32.xlu1 %v1126_v60 }
 0x2a7   :  { %v677_v60 = vpop.xlane.xlu2 %676 }
 0x2aa   :  { %v1068_v55 = vpop.permute.xlu1 %1067 }
 0x2ab   :  { %v1078_v58 = vadd.f32 %v4141_v22, %v1068_v55 }
 0x2ac   :  { %691 = vmax.xlane.f32.xlu1 %v690_v52 }
 0x2ad   :  { %v1094_v5 = vmul.f32 0.2, %v1078_v58  ;;  %vm1086_vm13 = vcmp.gt.f32.partialorder %v1078_v58, 0.0 }
 0x2af   :  { %v1102_v7 = vsel %vm1086_vm13, %v1078_v58, %v1094_v5  ;;  %v699_v58 = vsub.f32 %v4154_v33, %v677_v60 }
 0x2b0   :  { %v895_v11 = vpop.xlane.xlu0 %894  ;;  %v4363_v19 = vadd.f32 %v4357_v6, %v1102_v7 }
 0x2b1   :  { %v917_v22 = vsub.f32 %v4168_v46, %v895_v11  ;;  %v707_v5 = vmul.f32 1.442695, %v699_v58 }
 0x2b2   :  { %v1132_v8 = vsel %vm468_vm3, %v4363_v19, -inf }
 0x2b3   :  { %v632_v56 = vpop.permute.xlu1 %631  ;;  %1133 = vmax.xlane.f32.xlu2 %v1132_v8  ;;  %v925_v36 = vmul.f32 1.442695, %v917_v22  ;;  %v1113_v22 = vpop.xlane.xlu2 %1112 }
 0x2b4   :  { %v642_v17 = vadd.f32 %v4139_v21, %v632_v56  ;;  %694 = vmax.xlane.f32.xlu1 %v693_v31  ;;  %v1135_v33 = vsub.f32 %v4162_v42, %v1113_v22  ;;  %v433_v22 = vadd.f32 %v4174_v51, %v4319_v24 }
 0x2b5   :  { %3610 = vpow2.f32 %v925_v36 }
 0x2b6   :  { %v658_v39 = vmul.f32 0.2, %v642_v17  ;;  %vm650_vm14 = vcmp.gt.f32.partialorder %v642_v17, 0.0  ;;  %3612 = vpow2.f32 %v707_v5  ;;  %vm441_vm1 = vcmp.gt.f32.partialorder %v433_v22, 0.0 }
 0x2b8   :  { %v666_v45 = vsel %vm650_vm14, %v642_v17, %v658_v39  ;;  %v1143_v39 = vmul.f32 1.442695, %v1135_v33  ;;  %v449_v33 = vmul.f32 0.2, %v433_v22 }
 0x2b9   :  { %v4372_v55 = vadd.f32 %v4357_v6, %v666_v45 }
 0x2ba   :  { %v4374_v46 = vpop.xlane.xlu0 %470 }
 0x2bb   :  { %v696_v52 = vsel %vm468_vm3, %v4372_v55, -inf  ;;  %v4380_v11 = vpop.eup %3610 }
 0x2bc   :  { %v850_v4 = vpop.permute.xlu1 %849  ;;  %697 = vmax.xlane.f32.xlu0 %v696_v52  ;;  %v941_v31 = vsel %vm468_vm3, %v4380_v11, 0.0  ;;  %v4391_v45 = vpop.eup %3612 }
 0x2bd   :  { %v860_v21 = vadd.f32 %v4151_v30, %v850_v4  ;;  %v723_v42 = vsel %vm468_vm3, %v4391_v45, 0.0 }
 0x2bf   :  { %v876_v7 = vmul.f32 0.2, %v860_v21  ;;  %vm868_vm15 = vcmp.gt.f32.partialorder %v860_v21, 0.0 }
 0x2c1   :  { %v884_v8 = vsel %vm868_vm15, %v860_v21, %v876_v7 }
 0x2c2   :  { %v4383_v56 = vadd.f32 %v4357_v6, %v884_v8 }
 0x2c3   :  { %v680_v17 = vpop.xlane.xlu0 %679 }
 0x2c4   :  { %942 = vadd.xlane.f32.xlu0 %v941_v31  ;;  %v700_v30 = vsub.f32 %v4202_v12, %v680_v17  ;;  %v914_v60 = vsel %vm468_vm3, %v4383_v56, -inf }
 0x2c5   :  { %915 = vmax.xlane.f32.xlu1 %v914_v60  ;;  %v898_v60 = vpop.xlane.xlu2 %897 }
 0x2c6   :  { %v709_v36 = vmul.f32 1.442695, %v700_v30 }
 0x2c8   :  { %3614 = vpow2.f32 %v709_v36 }
 0x2c9   :  { %3616 = vpow2.f32 %v1143_v39 }
 0x2cb   :  { %v901_v30 = vpop.xlane.xlu0 %900 }
 0x2cd   :  { %724 = vadd.xlane.f32.xlu1 %v723_v42  ;;  %v919_v42 = vsub.f32 %v4214_v20, %v901_v30 }
 0x2ce   :  { %v4395_v58 = vpop.eup %3614 }
 0x2cf   :  { %v726_v52 = vsel %vm468_vm3, %v4395_v58, 0.0  ;;  %v4399_v12 = vpop.eup %3616 }
 0x2d0   :  { %727 = vadd.xlane.f32.xlu2 %v726_v52  ;;  %v1159_v4 = vsel %vm468_vm3, %v4399_v12, 0.0 }
 0x2d5   :  { %1160 = vadd.xlane.f32.xlu1 %v1159_v4  ;;  %v4424_v4 = vpop.xlane.xlu2 %476 }
 0x2e7   :  { %v1116_v21 = vpop.xlane.xlu1 %1115 }
 0x2e8   :  { %v1136_v5 = vsub.f32 %v4259_v16, %v1116_v21  ;;  %989 = vrot.lane.b32.xlu2 %v4089_v54, %s3932_s15  ;;  %v434_v16 = vadd.f32 %v4174_v51, %v4343_v35  ;;  %v457_v54 = vsel %vm441_vm1, %v433_v22, %v449_v33  ;;  %v929_v21 = vmul.f32 1.442695, %v919_v42 }
 0x2e9   :  { %v4419_v36 = vadd.f32 %v4299_v13, %v457_v54 }
 0x2ea   :  { %v1145_v7 = vmul.f32 1.442695, %v1136_v5  ;;  %v450_v39 = vmul.f32 0.2, %v434_v16  ;;  %vm442_vm2 = vcmp.gt.f32.partialorder %v434_v16, 0.0  ;;  %v918_v5 = vsub.f32 %v4182_v57, %v898_v60 }
 0x2eb   :  { %v484_v52 = vsel %vm468_vm3, %v4419_v36, -inf }
 0x2ec   :  { %3618 = vpow2.f32 %v1145_v7  ;;  %v458_v35 = vsel %vm442_vm2, %v434_v16, %v450_v39  ;;  %v686_v7 = vpop.xlane.xlu0 %685  ;;  %v1122_v16 = vpop.xlane.xlu2 %1121 }
 0x2ed   :  { %v4428_v22 = vadd.f32 %v4272_v28, %v458_v35  ;;  %3620 = vpow2.f32 %v929_v21  ;;  %v702_v33 = vsub.f32 %v4229_v37, %v686_v7  ;;  %v1138_v60 = vsub.f32 %v4245_v2, %v1122_v16 }
 0x2ee   :  { %1203 = vrot.lane.b32.xlu1 %v4077_v40, %s3931_s5 }
 0x2ef   :  { %v474_v8 = vpop.xlane.xlu1 %473  ;;  %v487_v20 = vsel %vm468_vm3, %v4428_v22, -inf  ;;  %v713_v54 = vmul.f32 1.442695, %v702_v33  ;;  %v1149_v21 = vmul.f32 1.442695, %v1138_v60 }
 0x2f0   :  { %v494_v30 = vsub.f32 %v4286_v50, %v474_v8 }
 0x2f2   :  { %v4410_v31 = vpop.eup %3618 }
 0x2f3   :  { %v1162_v17 = vsel %vm468_vm3, %v4410_v31, 0.0  ;;  %v4434_v39 = vpop.eup %3620 }
 0x2f4   :  { %1163 = vadd.xlane.f32.xlu0 %v1162_v17  ;;  %v927_v17 = vmul.f32 1.442695, %v918_v5  ;;  %v904_v42 = vpop.xlane.xlu0 %903  ;;  %v947_v37 = vsel %vm468_vm3, %v4434_v39, 0.0 }
 0x2f5   :  { %v920_v2 = vsub.f32 %v4267_v59, %v904_v42 }
 0x2f6   :  { %987 = vrot.lane.b32.xlu1 %v4082_v47, %s3932_s15  ;;  %3622 = vpow2.f32 %v927_v17 }
 0x2f7   :  { %v683_v24 = vpop.xlane.xlu1 %682  ;;  %3624 = vpow2.f32 %v713_v54 }
 0x2f8   :  { %v701_v5 = vsub.f32 %v4302_v15, %v683_v24 }
 0x2fa   :  { %v711_v33 = vmul.f32 1.442695, %v701_v5 }
 0x2fc   :  { %485 = vmax.xlane.f32.xlu0 %v484_v52  ;;  %v503_v52 = vmul.f32 1.442695, %v494_v30  ;;  %v4441_v35 = vpop.eup %3622  ;;  %v1125_v24 = vpop.xlane.xlu0 %1124 }
 0x2fd   :  { %v4445_v8 = vpop.eup %3624  ;;  %v944_v7 = vsel %vm468_vm3, %v4441_v35, 0.0  ;;  %v907_v30 = vpop.xlane.xlu2 %906  ;;  %v1139_v60 = vsub.f32 %v4291_v43, %v1125_v24 }
 0x2fe   :  { %3626 = vpow2.f32 %v503_v52  ;;  %v732_v54 = vsel %vm468_vm3, %v4445_v8, 0.0 }
 0x2ff   :  { %v1119_v47 = vpop.xlane.xlu1 %1118  ;;  %3628 = vpow2.f32 %v1149_v21 }
 0x300   :  { %v1137_v50 = vsub.f32 %v4314_v32, %v1119_v47  ;;  %v931_v32 = vmul.f32 1.442695, %v920_v2  ;;  %3630 = vpow2.f32 %v711_v33 }
 0x304   :  { %488 = vmax.xlane.f32.xlu0 %v487_v20  ;;  %v1147_v20 = vmul.f32 1.442695, %v1137_v50  ;;  %v4452_v15 = vpop.eup %3626  ;;  %v4466_v50 = vpop.xlane.xlu0 %909 }
 0x305   :  { %v4455_v16 = vpop.eup %3628  ;;  %v520_v59 = vsel %vm468_vm3, %v4452_v15, 0.0  ;;  %v1131_v24 = vpop.xlane.xlu2 %1130 }
 0x306   :  { %3632 = vpow2.f32 %v1147_v20  ;;  %v1168_v52 = vsel %vm468_vm3, %v4455_v16, 0.0 }
 0x307   :  { %v4436_v57 = vpop.xlane.xlu1 %479  ;;  %3634 = vpow2.f32 %v931_v32 }
 0x30c   :  { %948 = vadd.xlane.f32.xlu0 %v947_v37  ;;  %v4462_v37 = vpop.eup %3630 }
 0x30d   :  { %v4464_v5 = vpop.eup %3632  ;;  %v729_v2 = vsel %vm468_vm3, %v4462_v37, 0.0 }
 0x30e   :  { %v4471_v43 = vpop.eup %3634  ;;  %v1165_v33 = vsel %vm468_vm3, %v4464_v5, 0.0 }
 0x30f   :  { %v689_v17 = vpop.xlane.xlu1 %688 }
 0x310   :  { %v703_v47 = vsub.f32 %v4328_v61, %v689_v17  ;;  %v1151_v61 = vmul.f32 1.442695, %v1139_v60  ;;  %v921_v17 = vsub.f32 %v4256_v14, %v907_v30 }
 0x311   :  { %945 = vadd.xlane.f32.xlu2 %v944_v7 }
 0x312   :  { %v715_v42 = vmul.f32 1.442695, %v703_v47  ;;  %v933_v32 = vmul.f32 1.442695, %v921_v17 }
 0x314   :  { %733 = vadd.xlane.f32.xlu0 %v732_v54  ;;  %3636 = vpow2.f32 %v715_v42  ;;  %v950_v54 = vsel %vm468_vm3, %v4471_v43, 0.0  ;;  %v913_v60 = vpop.xlane.xlu0 %912 }
 0x315   :  { %3638 = vpow2.f32 %v1151_v61 }
 0x317   :  { %v1128_v21 = vpop.xlane.xlu1 %1127 }
 0x318   :  { %v1140_v7 = vsub.f32 %v4339_v27, %v1128_v21 }
 0x319   :  { %521 = vadd.xlane.f32.xlu2 %v520_v59  ;;  %v1141_v59 = vsub.f32 %v4283_v48, %v1131_v24 }
 0x31a   :  { %v1153_v20 = vmul.f32 1.442695, %v1140_v7  ;;  %v4478_v27 = vpop.eup %3636 }
 0x31b   :  { %v4481_v42 = vpop.eup %3638  ;;  %v735_v14 = vsel %vm468_vm3, %v4478_v27, 0.0 }
 0x31c   :  { %1169 = vadd.xlane.f32.xlu0 %v1168_v52  ;;  %3640 = vpow2.f32 %v1153_v20  ;;  %v1155_v52 = vmul.f32 1.442695, %v1141_v59  ;;  %v1171_v21 = vsel %vm468_vm3, %v4481_v42, 0.0 }
 0x31d   :  { %3642 = vpow2.f32 %v933_v32 }
 0x31e   :  { %3644 = vpow2.f32 %v1155_v52 }
 0x31f   :  { %v692_v47 = vpop.xlane.xlu1 %691 }
 0x320   :  { %730 = vadd.xlane.f32.xlu1 %v729_v2  ;;  %v704_v30 = vsub.f32 %v4349_v41, %v692_v47  ;;  %v495_v41 = vsub.f32 %v4219_v25, %v4424_v4 }
 0x321   :  { %1166 = vadd.xlane.f32.xlu2 %v1165_v33 }
 0x322   :  { %v4488_v61 = vpop.eup %3640  ;;  %v717_v7 = vmul.f32 1.442695, %v704_v30  ;;  %v505_v47 = vmul.f32 1.442695, %v495_v41 }
 0x323   :  { %v4490_v2 = vpop.eup %3642  ;;  %v1174_v20 = vsel %vm468_vm3, %v4488_v61, 0.0 }
 0x324   :  { %951 = vadd.xlane.f32.xlu0 %v950_v54  ;;  %3646 = vpow2.f32 %v717_v7  ;;  %v953_v24 = vsel %vm468_vm3, %v4490_v2, 0.0  ;;  %v4501_v32 = vpop.eup %3644 }
 0x325   :  { %v1177_v52 = vsel %vm468_vm3, %v4501_v32, 0.0 }
 0x326   :  { %v1134_v59 = vpop.xlane.xlu2 %1133 }
 0x327   :  { %v4492_v33 = vpop.xlane.xlu1 %694  ;;  %v1142_v25 = vsub.f32 %v4363_v19, %v1134_v59 }
 0x329   :  { %736 = vadd.xlane.f32.xlu2 %v735_v14  ;;  %v923_v14 = vsub.f32 %v4336_v26, %v913_v60  ;;  %v1157_v60 = vmul.f32 1.442695, %v1142_v25 }
 0x32b   :  { %v937_v4 = vmul.f32 1.442695, %v923_v14 }
 0x32c   :  { %1172 = vadd.xlane.f32.xlu0 %v1171_v21 }
 0x32f   :  { %v698_v48 = vpop.xlane.xlu0 %697 }
 0x330   :  { %v706_v17 = vsub.f32 %v4372_v55, %v698_v48  ;;  %v4504_v55 = vpop.eup %3646 }
 0x331   :  { %1175 = vadd.xlane.f32.xlu2 %v1174_v20  ;;  %v738_v21 = vsel %vm468_vm3, %v4504_v55, 0.0 }
 0x332   :  { %v721_v54 = vmul.f32 1.442695, %v706_v17 }
 0x334   :  { %954 = vadd.xlane.f32.xlu0 %v953_v24  ;;  %3648 = vpow2.f32 %v721_v54 }
 0x335   :  { %3650 = vpow2.f32 %v505_v47 }
 0x336   :  { %3652 = vpow2.f32 %v937_v4 }
 0x337   :  { %3654 = vpow2.f32 %v1157_v60  ;;  %v432_v60 = vadd.f32 %v4174_v51, %v4231_v38  ;;  %v493_v38 = vsub.f32 %v4191_v62, %v4374_v46 }
 0x338   :  { %v916_v30 = vpop.xlane.xlu1 %915 }
 0x339   :  { %985 = vrot.lane.b32.xlu1 %v4077_v40, %s3932_s15  ;;  %1178 = vadd.xlane.f32.xlu2 %v1177_v52  ;;  %v924_v40 = vsub.f32 %v4383_v56, %v916_v30  ;;  %vm440_vm4 = vcmp.gt.f32.partialorder %v432_v60, 0.0 }
 0x33a   :  { %v4513_v26 = vpop.eup %3648 }
 0x33b   :  { %v4515_v7 = vpop.eup %3650  ;;  %v744_v19 = vsel %vm468_vm3, %v4513_v26, 0.0  ;;  %v939_v54 = vmul.f32 1.442695, %v924_v40 }
 0x33c   :  { %739 = vadd.xlane.f32.xlu0 %v738_v21  ;;  %v523_v20 = vsel %vm468_vm3, %v4515_v7, 0.0  ;;  %v4522_v41 = vpop.eup %3652 }
 0x33d   :  { %v4524_v24 = vpop.eup %3654  ;;  %v959_v59 = vsel %vm468_vm3, %v4522_v41, 0.0 }
 0x33e   :  { %v1180_v25 = vsel %vm468_vm3, %v4524_v24, 0.0 }
 0x340   :  { %v725_v48 = vpop.xlane.xlu1 %724 }
 0x341   :  { %745 = vadd.xlane.f32.xlu2 %v744_v19  ;;  %3656 = vrcp.f32 %v725_v48  ;;  %v435_v19 = vadd.f32 %v4174_v51, %v4351_v49 }
 0x343   :  { %v728_v17 = vpop.xlane.xlu2 %727  ;;  %vm443_vm5 = vcmp.gt.f32.partialorder %v435_v19, 0.0 }
 0x344   :  { %3658 = vrcp.f32 %v728_v17  ;;  %524 = vadd.xlane.f32.xlu0 %v523_v20  ;;  %v451_v20 = vmul.f32 0.2, %v435_v19 }
 0x345   :  { %3660 = vpow2.f32 %v939_v54  ;;  %v4544_v54 = vpop.xlane.xlu0 %942 }
 0x347   :  { %v3657_v47 = vpop.eup %3656 }
 0x348   :  { %v755_v56 = vmul.f32 %v3657_v47, %v4391_v45  ;;  %v448_v45 = vmul.f32 0.2, %v432_v60 }
 0x349   :  { %960 = vadd.xlane.f32.xlu2 %v959_v59 }
 0x34a   :  { %v3659_v14 = vpop.eup %3658  ;;  %v456_v40 = vsel %vm440_vm4, %v432_v60, %v448_v45 }
 0x34b   :  { %v756_v30 = vmul.f32 %v3659_v14, %v4395_v58  ;;  %v990_v52 = vpop.permute.xlu2 %989  ;;  %v4533_v21 = vpop.eup %3660  ;;  %v4542_v17 = vadd.f32 %v4249_v3, %v456_v40  ;;  %v459_v14 = vsel %vm443_vm5, %v435_v19, %v451_v20 }
 0x34c   :  { %1181 = vadd.xlane.f32.xlu0 %v1180_v25  ;;  %1014 = vmatpush.bf16.msra.mxu0 %v990_v52  ;;  %v962_v48 = vsel %vm468_vm3, %v4533_v21, 0.0  ;;  %v1161_v58 = vpop.xlane.xlu1 %1160  ;;  %v4551_v51 = vadd.f32 %v4357_v6, %v459_v14  ;;  %v922_v52 = vsub.f32 %v4305_v23, %v4466_v50  ;;  %v705_v23 = vsub.f32 %v4360_v9, %v4492_v33 }
 0x34d   :  { %v763_v4 = vpack.c.bf16 %v756_v30, %v755_v56  ;;  %v481_v59 = vsel %vm468_vm3, %v4542_v17, -inf  ;;  %v501_v56 = vmul.f32 1.442695, %v493_v38  ;;  %3662 = vrcp.f32 %v1161_v58 }
 0x34e   :  { %v490_v62 = vsel %vm468_vm3, %v4551_v51, -inf  ;;  %v935_v25 = vmul.f32 1.442695, %v922_v52 }
 0x34f   :  { %3285 = vmatmul.msk.bf16.vlgmr.msrb.gmra.mxu0 %vm468_vm3, %v763_v4 }
 0x353   :  { %v3663_v46 = vpop.eup %3662 }
 0x354   :  { %963 = vadd.xlane.f32.xlu0 %v962_v48  ;;  %v1191_v48 = vmul.f32 %v3663_v46, %v4399_v12 }
 0x360   :  { %v1204_v47 = vpop.permute.xlu1 %1203 }
 0x361   :  { %1234 = vmatpush.bf16.msrb.mxu3 %v1204_v47  ;;  %v719_v47 = vmul.f32 1.442695, %v705_v23 }
 0x363   :  { %482 = vmax.xlane.f32.xlu1 %v481_v59 }
 0x367   :  { %v1164_v49 = vpop.xlane.xlu0 %1163 }
 0x368   :  { %3664 = vrcp.f32 %v1164_v49  ;;  %v988_v30 = vpop.permute.xlu1 %987 }
 0x369   :  { %3666 = vpow2.f32 %v501_v56  ;;  %1015 = vmatpush.bf16.msra.mxu0 %v988_v30 }
 0x36a   :  { %3668 = vpow2.f32 %v935_v25 }
 0x36b   :  { %491 = vmax.xlane.f32.xlu1 %v490_v62 }
 0x36e   :  { %v3665_v4 = vpop.eup %3664 }
 0x36f   :  { %v4557_v60 = vpop.eup %3666  ;;  %v1192_v45 = vmul.f32 %v3665_v4, %v4410_v31  ;;  %v486_v58 = vpop.xlane.xlu0 %485 }
 0x370   :  { %v498_v19 = vsub.f32 %v4419_v36, %v486_v58  ;;  %v517_v20 = vsel %vm468_vm3, %v4557_v60, 0.0  ;;  %v4567_v12 = vpop.eup %3668  ;;  %v496_v36 = vsub.f32 %v4322_v44, %v4436_v57 }
 0x371   :  { %v1199_v50 = vpack.c.bf16 %v1192_v45, %v1191_v48  ;;  %v956_v59 = vsel %vm468_vm3, %v4567_v12, 0.0 }
 0x372   :  { %v511_v40 = vmul.f32 1.442695, %v498_v19  ;;  %v507_v56 = vmul.f32 1.442695, %v496_v36 }
 0x373   :  { %518 = vadd.xlane.f32.xlu1 %v517_v20  ;;  %3293 = vmatmul.msk.bf16.vlgmr.msrb.gmra.mxu3 %vm468_vm3, %v1199_v50 }
 0x374   :  { %3670 = vpow2.f32 %v511_v40 }
 0x375   :  { %3672 = vpow2.f32 %v719_v47 }
 0x377   :  { %v489_v31 = vpop.xlane.xlu0 %488 }
 0x378   :  { %v499_v38 = vsub.f32 %v4428_v22, %v489_v31 }
 0x37a   :  { %v4572_v9 = vpop.eup %3670  ;;  %v513_v33 = vmul.f32 1.442695, %v499_v38 }
 0x37b   :  { %957 = vadd.xlane.f32.xlu1 %v956_v59  ;;  %v532_v14 = vsel %vm468_vm3, %v4572_v9, 0.0  ;;  %v4578_v49 = vpop.eup %3672 }
 0x37c   :  { %3674 = vpow2.f32 %v513_v33  ;;  %533 = vadd.xlane.f32.xlu2 %v532_v14  ;;  %v741_v44 = vsel %vm468_vm3, %v4578_v49, 0.0 }
 0x37d   :  { %3676 = vpow2.f32 %v507_v56 }
 0x37f   :  { %v949_v22 = vpop.xlane.xlu0 %948 }
 0x382   :  { %v4580_v30 = vpop.eup %3674 }
 0x383   :  { %742 = vadd.xlane.f32.xlu1 %v741_v44  ;;  %v535_v57 = vsel %vm468_vm3, %v4580_v30, 0.0  ;;  %v4586_v62 = vpop.eup %3676 }
 0x384   :  { %536 = vadd.xlane.f32.xlu0 %v535_v57  ;;  %v946_v52 = vpop.xlane.xlu2 %945  ;;  %v526_v25 = vsel %vm468_vm3, %v4586_v62, 0.0 }
 0x387   :  { %v734_v46 = vpop.xlane.xlu0 %733 }
 0x388   :  { %3678 = vrcp.f32 %v734_v46 }
 0x38b   :  { %527 = vadd.xlane.f32.xlu1 %v526_v25 }
 0x38c   :  { %v4590_v4 = vpop.xlane.xlu2 %521 }
 0x38e   :  { %v3679_v23 = vpop.eup %3678 }
 0x38f   :  { %v1170_v48 = vpop.xlane.xlu0 %1169  ;;  %v758_v31 = vmul.f32 %v3679_v23, %v4445_v8 }
 0x390   :  { %3680 = vrcp.f32 %v1170_v48 }
 0x393   :  { %v731_v45 = vpop.xlane.xlu1 %730 }
 0x394   :  { %3682 = vrcp.f32 %v731_v45  ;;  %v1167_v58 = vpop.xlane.xlu2 %1166 }
 0x395   :  { %3684 = vrcp.f32 %v1167_v58 }
 0x396   :  { %v3681_v50 = vpop.eup %3680  ;;  %3686 = vrcp.f32 %v946_v52 }
 0x397   :  { %v952_v19 = vpop.xlane.xlu0 %951  ;;  %v1194_v33 = vmul.f32 %v3681_v50, %v4455_v16  ;;  %3688 = vrcp.f32 %v4544_v54 }
 0x39a   :  { %v3683_v40 = vpop.eup %3682 }
 0x39b   :  { %v3685_v20 = vpop.eup %3684  ;;  %v757_v47 = vmul.f32 %v3683_v40, %v4462_v37 }
 0x39c   :  { %v737_v38 = vpop.xlane.xlu2 %736  ;;  %v1193_v36 = vmul.f32 %v3685_v20, %v4464_v5  ;;  %v3687_v37 = vpop.eup %3686 }
 0x39d   :  { %v764_v59 = vpack.c.bf16 %v758_v31, %v757_v47  ;;  %v3689_v57 = vpop.eup %3688  ;;  %v974_v16 = vmul.f32 %v3687_v37, %v4441_v35 }
 0x39e   :  { %v1200_v14 = vpack.c.bf16 %v1194_v33, %v1193_v36  ;;  %v973_v25 = vmul.f32 %v3689_v57, %v4380_v11 }
 0x39f   :  { %3286 = vmatmul.msk.bf16.gmra.mxu0 %vm468_vm3, %v764_v59  ;;  %v1173_v56 = vpop.xlane.xlu0 %1172 }
 0x3a0   :  { %3294 = vmatmul.msk.bf16.gmra.mxu3 %vm468_vm3, %v1200_v14  ;;  %3690 = vrcp.f32 %v1173_v56  ;;  %v981_v54 = vpack.c.bf16 %v974_v16, %v973_v25 }
 0x3a4   :  { %v1176_v44 = vpop.xlane.xlu2 %1175 }
 0x3a5   :  { %3692 = vrcp.f32 %v1176_v44 }
 0x3a6   :  { %v3691_v5 = vpop.eup %3690  ;;  %3694 = vrcp.f32 %v737_v38 }
 0x3a7   :  { %v4599_v8 = vpop.xlane.xlu0 %954  ;;  %v1195_v52 = vmul.f32 %v3691_v5, %v4481_v42  ;;  %3696 = vrcp.f32 %v952_v19 }
 0x3ab   :  { %v3693_v46 = vpop.eup %3692  ;;  %v986_v48 = vpop.permute.xlu1 %985 }
 0x3ac   :  { %1016 = vmatpush.bf16.msra.mxu0 %v986_v48  ;;  %v1196_v45 = vmul.f32 %v3693_v46, %v4488_v61  ;;  %v3695_v35 = vpop.eup %3694  ;;  %v1179_v31 = vpop.xlane.xlu2 %1178 }
 0x3ad   :  { %v3697_v50 = vpop.eup %3696  ;;  %v759_v40 = vmul.f32 %v3695_v35, %v4478_v27 }
 0x3ae   :  { %v1201_v58 = vpack.c.bf16 %v1196_v45, %v1195_v52  ;;  %v976_v19 = vmul.f32 %v3697_v50, %v4471_v43 }
 0x3af   :  { %3289 = vmatmul.msk.bf16.vlgmr.msra.gmra.mxu0 %vm468_vm3, %v981_v54  ;;  %v740_v23 = vpop.xlane.xlu0 %739 }
 0x3b0   :  { %3698 = vrcp.f32 %v740_v23  ;;  %3295 = vmatmul.msk.bf16.gmra.mxu3 %vm468_vm3, %v1201_v58 }
 0x3b1   :  { %3700 = vrcp.f32 %v949_v22 }
 0x3b2   :  { %3702 = vrcp.f32 %v1179_v31 }
 0x3b4   :  { %v746_v58 = vpop.xlane.xlu2 %745 }
 0x3b6   :  { %v3699_v11 = vpop.eup %3698 }
 0x3b7   :  { %v760_v42 = vmul.f32 %v3699_v11, %v4504_v55  ;;  %v4609_v20 = vpop.xlane.xlu0 %524  ;;  %v3701_v61 = vpop.eup %3700 }
 0x3b8   :  { %v975_v38 = vmul.f32 %v3701_v61, %v4434_v39  ;;  %v3703_v27 = vpop.eup %3702 }
 0x3b9   :  { %v765_v47 = vpack.c.bf16 %v760_v42, %v759_v40  ;;  %v1197_v55 = vmul.f32 %v3703_v27, %v4501_v32 }
 0x3ba   :  { %v982_v36 = vpack.c.bf16 %v976_v19, %v975_v38 }
 0x3bb   :  { %3287 = vmatmul.msk.bf16.vlgmr.msrb.gmra.mxu1 %vm468_vm3, %v765_v47 }
 0x3bf   :  { %3290 = vmatmul.msk.bf16.gmra.mxu0 %vm468_vm3, %v982_v36  ;;  %v1182_v22 = vpop.xlane.xlu0 %1181 }
 0x3c0   :  { %3704 = vrcp.f32 %v1182_v22 }
 0x3c6   :  { %v3705_v33 = vpop.eup %3704 }
 0x3c7   :  { %v1198_v59 = vmul.f32 %v3705_v33, %v4524_v24 }
 0x3c9   :  { %v1202_v14 = vpack.c.bf16 %v1198_v59, %v1197_v55 }
 0x3cb   :  { %3296 = vmatmul.msk.bf16.gmra.mxu3 %vm468_vm3, %v1202_v14 }
 0x3cc   :  { %v800_v43 = vpop.f32.mrf.mxu0 }
 0x3cd   :  { %1264 = vrot.lane.b32.xlu2 %v800_v43, %s3931_s5 }
 0x3d4   :  { %v802_v56 = vpop.f32.mrf.mxu0 }
 0x3d5   :  { %1266 = vrot.lane.b32.xlu0 %v802_v56, %s3931_s5 }
 0x3d6   :  { %v483_v39 = vpop.xlane.xlu1 %482 }
 0x3d7   :  { %v497_v44 = vsub.f32 %v4542_v17, %v483_v39 }
 0x3d9   :  { %v509_v37 = vmul.f32 1.442695, %v497_v44 }
 0x3db   :  { %3706 = vpow2.f32 %v509_v37 }
 0x3de   :  { %v492_v57 = vpop.xlane.xlu1 %491 }
 0x3df   :  { %v500_v5 = vsub.f32 %v4551_v51, %v492_v57 }
 0x3e1   :  { %v4622_v32 = vpop.eup %3706  ;;  %v515_v24 = vmul.f32 1.442695, %v500_v5 }
 0x3e2   :  { %v529_v16 = vsel %vm468_vm3, %v4622_v32, 0.0 }
 0x3e3   :  { %3708 = vpow2.f32 %v515_v24  ;;  %530 = vadd.xlane.f32.xlu1 %v529_v16 }
 0x3e4   :  { %3710 = vrcp.f32 %v4590_v4 }
 0x3e6   :  { %v519_v46 = vpop.xlane.xlu1 %518 }
 0x3e7   :  { %3712 = vrcp.f32 %v519_v46 }
 0x3e8   :  { %3714 = vrcp.f32 %v4599_v8  ;;  %v961_v8 = vpop.xlane.xlu2 %960 }
 0x3e9   :  { %v4627_v25 = vpop.eup %3708 }
 0x3ea   :  { %v538_v17 = vsel %vm468_vm3, %v4627_v25, 0.0  ;;  %v3711_v48 = vpop.eup %3710 }
 0x3eb   :  { %539 = vadd.xlane.f32.xlu1 %v538_v17  ;;  %v550_v52 = vmul.f32 %v3711_v48, %v4452_v15  ;;  %v964_v15 = vpop.xlane.xlu0 %963 }
 0x3ed   :  { %v3713_v51 = vpop.eup %3712 }
 0x3ee   :  { %v549_v45 = vmul.f32 %v3713_v51, %v4557_v60  ;;  %v958_v54 = vpop.xlane.xlu1 %957  ;;  %v3715_v23 = vpop.eup %3714 }
 0x3ef   :  { %3716 = vrcp.f32 %v958_v54  ;;  %v977_v40 = vmul.f32 %v3715_v23, %v4490_v2 }
 0x3f0   :  { %v557_v4 = vpack.c.bf16 %v550_v52, %v549_v45  ;;  %3718 = vrcp.f32 %v746_v58  ;;  %v534_v24 = vpop.xlane.xlu2 %533 }
 0x3f2   :  { %3281 = vmatmul.msk.bf16.vlgmr.msrb.gmra.mxu2 %vm468_vm3, %v557_v4 }
 0x3f5   :  { %v3717_v35 = vpop.eup %3716 }
 0x3f6   :  { %v743_v50 = vpop.xlane.xlu1 %742  ;;  %v1236_v11 = vpop.f32.mrf.mxu3  ;;  %v978_v42 = vmul.f32 %v3717_v35, %v4567_v12 }
 0x3f7   :  { %3720 = vrcp.f32 %v743_v50  ;;  %1328 = vrot.lane.b32.xlu2 %v1236_v11, %s3930_s1  ;;  %v3719_v61 = vpop.eup %3718  ;;  %v537_v54 = vpop.xlane.xlu0 %536 }
 0x3f8   :  { %v983_v60 = vpack.c.bf16 %v978_v42, %v977_v40  ;;  %3722 = vrcp.f32 %v964_v15  ;;  %v762_v2 = vmul.f32 %v3719_v61, %v4513_v26  ;;  %v3492_v61 = vld [vmem:[%s5526_s6 + $0x20] sm:$0xff] }
 0x3f9   :  { %3724 = vrcp.f32 %v4609_v20 }
 0x3fa   :  { %3291 = vmatmul.msk.bf16.gmra.mxu0 %vm468_vm3, %v983_v60  ;;  %3726 = vrcp.f32 %v961_v8  ;;  %v3493_v8 = vld [vmem:[%s5526_s6 + $0x28] sm:$0xff] }
 0x3fd   :  { %v3721_v47 = vpop.eup %3720 }
 0x3fe   :  { %v528_v19 = vpop.xlane.xlu1 %527  ;;  %v761_v31 = vmul.f32 %v3721_v47, %v4578_v49  ;;  %v3723_v38 = vpop.eup %3722 }
 0x3ff   :  { %3728 = vrcp.f32 %v528_v19  ;;  %v3725_v36 = vpop.eup %3724  ;;  %v980_v27 = vmul.f32 %v3723_v38, %v4533_v21  ;;  %v1238_v43 = vpop.f32.mrf.mxu3 }
 0x400   :  { %v766_v12 = vpack.c.bf16 %v762_v2, %v761_v31  ;;  %v3727_v22 = vpop.eup %3726  ;;  %v551_v55 = vmul.f32 %v3725_v36, %v4515_v7  ;;  %3730 = vrcp.f32 %v534_v24  ;;  %v3491_v31 = vld [vmem:[%s5526_s6 + $0x18] sm:$0xff]  ;;  %v3490_v2 = vld [vmem:[%s5526_s6 + $0x10] sm:$0xff]  ;;  %v3488_v36 = vld [vmem:[%s5526_s6] sm:$0xff] }
 0x401   :  { %v979_v59 = vmul.f32 %v3727_v22, %v4522_v41 }
 0x402   :  { %3288 = vmatmul.msk.bf16.gmra.mxu1 %vm468_vm3, %v766_v12  ;;  %v3489_v12 = vld [vmem:[%s5526_s6 + $0x8] sm:$0xff] }
 0x403   :  { %v984_v49 = vpack.c.bf16 %v980_v27, %v979_v59 }
 0x405   :  { %v3729_v33 = vpop.eup %3728 }
 0x406   :  { %v552_v20 = vmul.f32 %v3729_v33, %v4586_v62  ;;  %v3731_v46 = vpop.eup %3730 }
 0x407   :  { %v554_v51 = vmul.f32 %v3731_v46, %v4572_v9  ;;  %v3495_v9 = vld [vmem:[%s5526_s6 + $0x38] sm:$0xff] }
 0x408   :  { %v558_v14 = vpack.c.bf16 %v552_v20, %v551_v55  ;;  %1493 = vmatpush.bf16.msra.mxu2 %v3495_v9 }
 0x40a   :  { %3282 = vmatmul.msk.bf16.gmra.mxu2 %vm468_vm3, %v558_v14  ;;  %3292 = vmatmul.msk.bf16.gmra.mxu0 %vm468_vm3, %v984_v49 }
 0x41c   :  { %v805_v26 = vpop.f32.mrf.mxu0 }
 0x423   :  { %v1241_v39 = vpop.f32.mrf.mxu3 }
 0x424   :  { %v807_v56 = vpop.f32.mrf.mxu0 }
 0x425   :  { %1270 = vrot.lane.b32.xlu2 %v807_v56, %s3931_s5 }
 0x427   :  { %v1265_v38 = vpop.permute.xlu2 %1264 }
 0x42b   :  { %v1243_v44 = vpop.f32.mrf.mxu3 }
 0x42c   :  { %v1018_v21 = vpop.f32.mrf.mxu0 }
 0x42d   :  { %1296 = vrot.lane.b32.xlu1 %v1018_v21, %s3932_s15  ;;  %1332 = vrot.lane.b32.xlu2 %v1241_v39, %s3930_s1 }
 0x433   :  { %v1246_v5 = vpop.f32.mrf.mxu3 }
 0x434   :  { %v1020_v7 = vpop.f32.mrf.mxu0 }
 0x435   :  { %1268 = vrot.lane.b32.xlu1 %v805_v26, %s3931_s5  ;;  %1298 = vrot.lane.b32.xlu0 %v1020_v7, %s3932_s15 }
 0x438   :  { %v810_v41 = vpop.f32.mrf.mxu1 }
 0x43b   :  { %v1248_v11 = vpop.f32.mrf.mxu3 }
 0x43c   :  { %v1023_v62 = vpop.f32.mrf.mxu0 }
 0x43d   :  { %1330 = vrot.lane.b32.xlu0 %v1238_v43, %s3930_s1 }
 0x440   :  { %v812_v37 = vpop.f32.mrf.mxu1 }
 0x441   :  { %1274 = vrot.lane.b32.xlu2 %v812_v37, %s3931_s5 }
 0x444   :  { %v1025_v57 = vpop.f32.mrf.mxu0 }
 0x445   :  { %1300 = vrot.lane.b32.xlu0 %v1023_v62, %s3932_s15  ;;  %1302 = vrot.lane.b32.xlu1 %v1025_v57, %s3932_s15 }
 0x447   :  { %v1267_v22 = vpop.permute.xlu0 %1266 }
 0x449   :  { %1336 = vrot.lane.b32.xlu2 %v1246_v5, %s3930_s1 }
 0x44d   :  { %1334 = vrot.lane.b32.xlu0 %v1243_v44, %s3930_s1  ;;  %1272 = vrot.lane.b32.xlu1 %v810_v41, %s3931_s5 }
 0x451   :  { %v1329_v59 = vpop.permute.xlu2 %1328 }
 0x456   :  { %v531_v16 = vpop.xlane.xlu1 %530 }
 0x457   :  { %3732 = vrcp.f32 %v531_v16 }
 0x45d   :  { %v3733_v17 = vpop.eup %3732 }
 0x45e   :  { %v553_v48 = vmul.f32 %v3733_v17, %v4622_v32  ;;  %v540_v52 = vpop.xlane.xlu1 %539 }
 0x45f   :  { %3734 = vrcp.f32 %v540_v52 }
 0x460   :  { %v559_v45 = vpack.c.bf16 %v554_v51, %v553_v48  ;;  %3736 = vrcp.f32 %v537_v54 }
 0x462   :  { %3283 = vmatmul.msk.bf16.gmra.mxu2 %vm468_vm3, %v559_v45 }
 0x465   :  { %v3735_v58 = vpop.eup %3734 }
 0x466   :  { %v3737_v4 = vpop.eup %3736  ;;  %v556_v23 = vmul.f32 %v3735_v58, %v4627_v25  ;;  %v1251_v25 = vpop.f32.mrf.mxu3 }
 0x467   :  { %v555_v35 = vmul.f32 %v3737_v4, %v4580_v30  ;;  %v3494_v30 = vld [vmem:[%s5526_s6 + $0x30] sm:$0xff] }
 0x468   :  { %1494 = vmatpush.bf16.msra.mxu2 %v3494_v30 }
 0x469   :  { %v560_v50 = vpack.c.bf16 %v556_v23, %v555_v35 }
 0x46c   :  { %1495 = vmatpush.bf16.msra.mxu2 %v3493_v8 }
 0x46e   :  { %v1253_v47 = vpop.f32.mrf.mxu3 }
 0x470   :  { %1496 = vmatpush.bf16.msra.mxu2 %v3492_v61 }
 0x472   :  { %3284 = vmatmul.msk.bf16.gmra.mxu2 %vm468_vm3, %v560_v50 }
 0x474   :  { %1497 = vmatpush.bf16.msra.mxu2 %v3491_v31 }
 0x475   :  { %v582_v27 = vpop.f32.mrf.mxu2 }
 0x476   :  { %v1352_v55 = vsel %vm206_vm0, %v582_v27, %v1265_v38 }
 0x477   :  { %v1028_v32 = vpop.f32.mrf.mxu0 }
 0x478   :  { %1304 = vrot.lane.b32.xlu0 %v1028_v32, %s3932_s15  ;;  %1498 = vmatpush.bf16.msra.mxu2 %v3490_v2 }
 0x47c   :  { %1499 = vmatpush.bf16.msra.mxu2 %v3489_v12 }
 0x47d   :  { %v584_v26 = vpop.f32.mrf.mxu2 }
 0x47e   :  { %v1353_v39 = vsel %vm206_vm0, %v584_v26, %v1267_v22 }
 0x47f   :  { %v815_v40 = vpop.f32.mrf.mxu1  ;;  %v1030_v42 = vpop.f32.mrf.mxu0 }
 0x480   :  { %1338 = vrot.lane.b32.xlu0 %v1248_v11, %s3930_s1  ;;  %1306 = vrot.lane.b32.xlu1 %v1030_v42, %s3932_s15  ;;  %v1271_v21 = vpop.permute.xlu2 %1270 }
 0x481   :  { %1500 = vmatpush.bf16.msra.mxu2 %v3488_v36 }
 0x487   :  { %v817_v15 = vpop.f32.mrf.mxu1  ;;  %v1033_v60 = vpop.f32.mrf.mxu0 }
 0x488   :  { %1278 = vrot.lane.b32.xlu2 %v817_v15, %s3931_s5  ;;  %1276 = vrot.lane.b32.xlu1 %v815_v40, %s3931_s5  ;;  %v1333_v17 = vpop.permute.xlu2 %1332 }
 0x489   :  { %1308 = vrot.lane.b32.xlu0 %v1033_v60, %s3932_s15 }
 0x48d   :  { %v587_v44 = vpop.f32.mrf.mxu2 }
 0x48f   :  { %v1035_v19 = vpop.f32.mrf.mxu0 }
 0x490   :  { %1340 = vrot.lane.b32.xlu2 %v1251_v25, %s3930_s1  ;;  %1310 = vrot.lane.b32.xlu1 %v1035_v19, %s3932_s15 }
 0x491   :  { %1342 = vrot.lane.b32.xlu0 %v1253_v47, %s3930_s1 }
 0x495   :  { %v589_v58 = vpop.f32.mrf.mxu2 }
 0x496   :  { %v1355_v50 = vsel %vm206_vm0, %v589_v58, %v1271_v21 }
 0x49b   :  { %v1275_v12 = vpop.permute.xlu2 %1274 }
 0x49f   :  { %v1297_v33 = vpop.permute.xlu1 %1296 }
 0x4a0   :  { %v1360_v20 = vsel %vm468_vm3, %v1352_v55, %v1297_v33 }
 0x4a1   :  { %v1369_v14 = vsel %vm1368_vm6, %v1360_v20, %v1329_v59 }
 0x4a2   :  { %v1385_v43 = vmin.f32 %v1369_v14, 0.0  ;;  %vm1377_vm7 = vcmp.gt.f32.partialorder %v1369_v14, 0.0 }
 0x4a3   :  { %v1337_v33 = vpop.permute.xlu2 %1336 }
 0x4a4   :  { %v1393_v56 = vmul.f32 1.442695, %v1385_v43 }
 0x4a6   :  { %3738 = vpow2.f32 %v1393_v56 }
 0x4a7   :  { %v1299_v49 = vpop.permute.xlu0 %1298  ;;  %v1269_v5 = vpop.permute.xlu1 %1268 }
 0x4a8   :  { %v1361_v7 = vsel %vm468_vm3, %v1353_v39, %v1299_v49  ;;  %v1354_v16 = vsel %vm206_vm0, %v587_v44, %v1269_v5  ;;  %v3503_v44 = vld [vmem:[%s5527_s8 + $0x38] sm:$0xff] }
 0x4a9   :  { %1632 = vmatpush.bf16.msrb.mxu0 %v3503_v44 }
 0x4ac   :  { %v3739_v24 = vpop.eup %3738 }
 0x4ad   :  { %v3297_v52 = vadd.f32 -1.0, %v3739_v24 }
 0x4af   :  { %v1331_v41 = vpop.permute.xlu0 %1330  ;;  %v4710_v9 = vsel %vm1377_vm7, %v1369_v14, %v3297_v52 }
 0x4b0   :  { %v1370_v62 = vsel %vm1368_vm6, %v1361_v7, %v1331_v41 }
 0x4b1   :  { %v1386_v37 = vmin.f32 %v1370_v62, 0.0  ;;  %vm1378_vm8 = vcmp.gt.f32.partialorder %v1370_v62, 0.0 }
 0x4b3   :  { %v1395_v57 = vmul.f32 1.442695, %v1386_v37 }
 0x4b5   :  { %3740 = vpow2.f32 %v1395_v57  ;;  %v3502_v57 = vld [vmem:[%s5527_s8 + $0x30] sm:$0xff] }
 0x4b6   :  { %1633 = vmatpush.bf16.msrb.mxu0 %v3502_v57 }
 0x4b7   :  { %v1301_v46 = vpop.permute.xlu0 %1300  ;;  %v1303_v23 = vpop.permute.xlu1 %1302 }
 0x4b8   :  { %v1362_v48 = vsel %vm468_vm3, %v1354_v16, %v1301_v46  ;;  %v1363_v40 = vsel %vm468_vm3, %v1355_v50, %v1303_v23  ;;  %v3500_v23 = vld [vmem:[%s5527_s8 + $0x20] sm:$0xff] }
 0x4b9   :  { %v1371_v51 = vsel %vm1368_vm6, %v1362_v48, %v1333_v17  ;;  %v3501_v17 = vld [vmem:[%s5527_s8 + $0x28] sm:$0xff] }
 0x4ba   :  { %v1387_v45 = vmin.f32 %v1371_v51, 0.0  ;;  %vm1379_vm10 = vcmp.gt.f32.partialorder %v1371_v51, 0.0  ;;  %1634 = vmatpush.bf16.msrb.mxu0 %v3501_v17 }
 0x4bb   :  { %v3741_v54 = vpop.eup %3740 }
 0x4bc   :  { %v3298_v4 = vadd.f32 -1.0, %v3741_v54  ;;  %v1397_v35 = vmul.f32 1.442695, %v1387_v45 }
 0x4be   :  { %v4712_v32 = vsel %vm1378_vm8, %v1370_v62, %v3298_v4  ;;  %3742 = vpow2.f32 %v1397_v35  ;;  %1635 = vmatpush.bf16.msrb.mxu0 %v3500_v23 }
 0x4bf   :  { %v1425_v11 = vpack.c.bf16 %v4712_v32, %v4710_v9  ;;  %v1335_v42 = vpop.permute.xlu0 %1334  ;;  %v1273_v36 = vpop.permute.xlu1 %1272 }
 0x4c0   :  { %v1372_v30 = vsel %vm1368_vm6, %v1363_v40, %v1335_v42 }
 0x4c1   :  { %v1388_v25 = vmin.f32 %v1372_v30, 0.0  ;;  %1501 = vmatmul.bf16.vlgmr.msra.gmra.mxu2 %v1425_v11  ;;  %vm1380_vm9 = vcmp.gt.f32.partialorder %v1372_v30, 0.0 }
 0x4c3   :  { %v1399_v15 = vmul.f32 1.442695, %v1388_v25 }
 0x4c4   :  { %v3743_v60 = vpop.eup %3742 }
 0x4c5   :  { %3744 = vpow2.f32 %v1399_v15  ;;  %v3299_v8 = vadd.f32 -1.0, %v3743_v60 }
 0x4c7   :  { %v4718_v19 = vsel %vm1379_vm10, %v1371_v51, %v3299_v8 }
 0x4cb   :  { %v3745_v61 = vpop.eup %3744 }
 0x4cc   :  { %v3300_v47 = vadd.f32 -1.0, %v3745_v61 }
 0x4ce   :  { %v4720_v31 = vsel %vm1380_vm9, %v1372_v30, %v3300_v47 }
 0x4cf   :  { %v1426_v2 = vpack.c.bf16 %v4720_v31, %v4718_v19 }
 0x4d1   :  { %1506 = vmatmul.bf16.gmra.mxu2 %v1426_v2 }
 0x4e2   :  { %v1279_v43 = vpop.permute.xlu2 %1278 }
 0x4e5   :  { %v592_v38 = vpop.f32.mrf.mxu2 }
 0x4e6   :  { %v1356_v22 = vsel %vm206_vm0, %v592_v38, %v1273_v36 }
 0x4ea   :  { %v1305_v27 = vpop.permute.xlu0 %1304  ;;  %v1341_v48 = vpop.permute.xlu2 %1340 }
 0x4eb   :  { %v1364_v55 = vsel %vm468_vm3, %v1356_v22, %v1305_v27 }
 0x4ec   :  { %v1373_v20 = vsel %vm1368_vm6, %v1364_v55, %v1337_v33  ;;  %v3499_v55 = vld [vmem:[%s5527_s8 + $0x18] sm:$0xff] }
 0x4ed   :  { %v594_v59 = vpop.f32.mrf.mxu2  ;;  %v1389_v14 = vmin.f32 %v1373_v20, 0.0  ;;  %vm1381_vm12 = vcmp.gt.f32.partialorder %v1373_v20, 0.0  ;;  %1636 = vmatpush.bf16.msrb.mxu0 %v3499_v55 }
 0x4ee   :  { %v1357_v56 = vsel %vm206_vm0, %v594_v59, %v1275_v12  ;;  %v3497_v59 = vld [vmem:[%s5527_s8 + $0x8] sm:$0xff] }
 0x4ef   :  { %v1401_v49 = vmul.f32 1.442695, %v1389_v14  ;;  %v3496_v14 = vld [vmem:[%s5527_s8] sm:$0xff] }
 0x4f1   :  { %3746 = vpow2.f32 %v1401_v49 }
 0x4f2   :  { %v1339_v26 = vpop.permute.xlu0 %1338  ;;  %v1307_v39 = vpop.permute.xlu1 %1306 }
 0x4f3   :  { %v1365_v21 = vsel %vm468_vm3, %v1357_v56, %v1307_v39 }
 0x4f4   :  { %v1374_v7 = vsel %vm1368_vm6, %v1365_v21, %v1339_v26 }
 0x4f5   :  { %v1390_v41 = vmin.f32 %v1374_v7, 0.0  ;;  %v597_v62 = vpop.f32.mrf.mxu2  ;;  %vm1382_vm11 = vcmp.gt.f32.partialorder %v1374_v7, 0.0 }
 0x4f7   :  { %v1403_v37 = vmul.f32 1.442695, %v1390_v41  ;;  %v3747_v16 = vpop.eup %3746 }
 0x4f8   :  { %v3301_v54 = vadd.f32 -1.0, %v3747_v16 }
 0x4f9   :  { %3748 = vpow2.f32 %v1403_v37 }
 0x4fa   :  { %v1277_v5 = vpop.permute.xlu1 %1276  ;;  %v4746_v30 = vsel %vm1381_vm12, %v1373_v20, %v3301_v54  ;;  %v3498_v20 = vld [vmem:[%s5527_s8 + $0x10] sm:$0xff] }
 0x4fb   :  { %v1309_v24 = vpop.permute.xlu0 %1308  ;;  %v1358_v46 = vsel %vm206_vm0, %v597_v62, %v1277_v5  ;;  %5554 = vst [vmem:[#allocation10_spill] sm:$0xff] %v4746_v30  ;;  %1637 = vmatpush.bf16.msrb.mxu0 %v3498_v20 }
 0x4fc   :  { %v1366_v51 = vsel %vm468_vm3, %v1358_v46, %v1309_v24 }
 0x4fd   :  { %v1375_v52 = vsel %vm1368_vm6, %v1366_v51, %v1341_v48  ;;  %v599_v4 = vpop.f32.mrf.mxu2 }
 0x4fe   :  { %v1391_v45 = vmin.f32 %v1375_v52, 0.0  ;;  %v1359_v11 = vsel %vm206_vm0, %v599_v4, %v1279_v43  ;;  %vm1383_vm14 = vcmp.gt.f32.partialorder %v1375_v52, 0.0 }
 0x4ff   :  { %v3749_v58 = vpop.eup %3748  ;;  %1638 = vmatpush.bf16.msrb.mxu0 %v3497_v59 }
 0x500   :  { %v3302_v35 = vadd.f32 -1.0, %v3749_v58  ;;  %v1405_v50 = vmul.f32 1.442695, %v1391_v45 }
 0x502   :  { %v1311_v40 = vpop.permute.xlu1 %1310  ;;  %v4748_v25 = vsel %vm1382_vm11, %v1374_v7, %v3302_v35  ;;  %3750 = vpow2.f32 %v1405_v50 }
 0x503   :  { %v1343_v42 = vpop.permute.xlu0 %1342  ;;  %5555 = vst [vmem:[#allocation11_spill] sm:$0xff] %v4748_v25  ;;  %v1367_v15 = vsel %vm468_vm3, %v1359_v11, %v1311_v40  ;;  %v1427_v60 = vpack.c.bf16 %v4748_v25, %v4746_v30  ;;  %1639 = vmatpush.bf16.msrb.mxu0 %v3496_v14  ;;  %v1530_v40 = vld [vmem:[%s5528_s7] sm:$0x3] }
 0x504   :  { %v1376_v8 = vsel %vm1368_vm6, %v1367_v15, %v1343_v42 }
 0x505   :  { %v1392_v61 = vmin.f32 %v1376_v8, 0.0  ;;  %1511 = vmatmul.bf16.gmra.mxu2 %v1427_v60  ;;  %vm1384_vm13 = vcmp.gt.f32.partialorder %v1376_v8, 0.0 }
 0x507   :  { %v1407_v47 = vmul.f32 1.442695, %v1392_v61 }
 0x508   :  { %v3751_v2 = vpop.eup %3750 }
 0x509   :  { %3752 = vpow2.f32 %v1407_v47  ;;  %v3303_v12 = vadd.f32 -1.0, %v3751_v2 }
 0x50b   :  { %v4754_v22 = vsel %vm1383_vm14, %v1375_v52, %v3303_v12 }
 0x50c   :  { %5556 = vst [vmem:[#allocation12_spill] sm:$0xff] %v4754_v22 }
 0x50f   :  { %v3753_v38 = vpop.eup %3752 }
 0x510   :  { %v3304_v36 = vadd.f32 -1.0, %v3753_v38 }
 0x512   :  { %v4756_v27 = vsel %vm1384_vm13, %v1376_v8, %v3304_v36 }
 0x513   :  { %5557 = vst [vmem:[#allocation13_spill] sm:$0xff] %v4756_v27  ;;  %v1428_v33 = vpack.c.bf16 %v4756_v27, %v4754_v22 }
 0x515   :  { %1516 = vmatmul.bf16.gmra.mxu2 %v1428_v33 }
 0x544   :  { %v1502_v49 = vpop.f32.mrf.mxu2 }
 0x545   :  { %v1522_v26 = vpack.c.bf16 %v1502_v49, %v1502_v49 }
 0x547   :  { %v1539_v39 = vunpack.c.l.b16 %v1522_v26 }
 0x54c   :  { %v1504_v43 = vpop.f32.mrf.mxu2 }
 0x54d   :  { %v1523_v56 = vpack.c.bf16 %v1504_v43, %v1504_v43 }
 0x54f   :  { %v1540_v21 = vunpack.c.l.b16 %v1523_v56 }
 0x551   :  { %v4772_v7 = vpack.c.b16 %v1540_v21, %v1539_v39 }
 0x553   :  { %2040 = vrot.lane.b32.xlu0 %v4772_v7, %s3930_s1  ;;  %1640 = vmatmul.bf16.vlgmr.msrb.gmra.mxu0 %v4772_v7 }
 0x554   :  { %v1507_v41 = vpop.f32.mrf.mxu2 }
 0x555   :  { %v1524_v62 = vpack.c.bf16 %v1507_v41, %v1507_v41 }
 0x557   :  { %v1541_v57 = vunpack.c.l.b16 %v1524_v62 }
 0x55c   :  { %v1509_v44 = vpop.f32.mrf.mxu2 }
 0x55d   :  { %v1525_v37 = vpack.c.bf16 %v1509_v44, %v1509_v44 }
 0x55f   :  { %v1542_v5 = vunpack.c.l.b16 %v1525_v37 }
 0x561   :  { %v4777_v24 = vpack.c.b16 %v1542_v5, %v1541_v57 }
 0x563   :  { %2260 = vrot.lane.b32.xlu2 %v4777_v24, %s3932_s15  ;;  %2042 = vrot.lane.b32.xlu1 %v4777_v24, %s3930_s1 }
 0x564   :  { %1645 = vmatmul.bf16.gmra.mxu0 %v4777_v24 }
 0x588   :  { %v1512_v16 = vpop.f32.mrf.mxu2 }
 0x589   :  { %v1526_v46 = vpack.c.bf16 %v1512_v16, %v1512_v16 }
 0x58b   :  { %v1543_v51 = vunpack.c.l.b16 %v1526_v46 }
 0x590   :  { %v1514_v17 = vpop.f32.mrf.mxu2 }
 0x591   :  { %v1527_v48 = vpack.c.bf16 %v1514_v17, %v1514_v17 }
 0x593   :  { %v1544_v52 = vunpack.c.l.b16 %v1527_v48 }
 0x595   :  { %v1549_v45 = vpack.c.b16 %v1544_v52, %v1543_v51 }
 0x597   :  { %2262 = vrot.lane.b32.xlu0 %v1549_v45, %s3932_s15  ;;  %2044 = vrot.lane.b32.xlu2 %v1549_v45, %s3930_s1 }
 0x598   :  { %1650 = vmatmul.bf16.gmra.mxu0 %v1549_v45  ;;  %v1517_v54 = vpop.f32.mrf.mxu2 }
 0x599   :  { %v1528_v58 = vpack.c.bf16 %v1517_v54, %v1517_v54 }
 0x59b   :  { %v1545_v35 = vunpack.c.l.b16 %v1528_v58 }
 0x59f   :  { %2480 = vrot.lane.b32.xlu2 %v1549_v45, %s3931_s5 }
 0x5a0   :  { %v1519_v4 = vpop.f32.mrf.mxu2 }
 0x5a1   :  { %v1529_v23 = vpack.c.bf16 %v1519_v4, %v1519_v4 }
 0x5a3   :  { %v1546_v50 = vunpack.c.l.b16 %v1529_v23 }
 0x5a5   :  { %v1550_v11 = vpack.c.b16 %v1546_v50, %v1545_v35 }
 0x5a7   :  { %2482 = vrot.lane.b32.xlu1 %v1550_v11, %s3931_s5  ;;  %2264 = vrot.lane.b32.xlu0 %v1550_v11, %s3932_s15 }
 0x5a8   :  { %2046 = vrot.lane.b32.xlu2 %v1550_v11, %s3930_s1  ;;  %1559 = vmatpush.bf16.xpose.msra.mxu1 %v1550_v11 }
 0x5a9   :  { %1655 = vmatmul.bf16.gmra.mxu0 %v1550_v11 }
 0x5b0   :  { %1560 = vmatpush.bf16.xpose.msra.mxu1 %v1549_v45 }
 0x5b8   :  { %1561 = vmatpush.bf16.xpose.msra.mxu1 %v4777_v24 }
 0x5bd   :  { %v2261_v61 = vpop.permute.xlu2 %2260 }
 0x5c0   :  { %1562 = vmatpush.bf16.xpose.msra.mxu1 %v4772_v7 }
 0x5c5   :  { %v2041_v38 = vpop.permute.xlu0 %2040 }
 0x5c7   :  { %1563 = vmatmul.bf16.vlgmr.msra.gmra.mxu1 %v1530_v40 }
 0x5c8   :  { %1850 = vmatpush.bf16.msrb.mxu1 %v1550_v11 }
 0x5cc   :  { %1851 = vmatpush.bf16.msrb.mxu1 %v1549_v45 }
 0x5d0   :  { %1852 = vmatpush.bf16.msrb.mxu1 %v4777_v24  ;;  %v1641_v42 = vpop.f32.mrf.mxu0 }
 0x5d1   :  { %1663 = vperm.xlu1 %3581, %v1641_v42   ;;  %1876 = vperm.xlu0 %3582, %v1641_v42  }
 0x5d2   :  { %2094 = vperm.xlu2 %3571, %v1641_v42  }
 0x5d4   :  { %1853 = vmatpush.bf16.msrb.mxu1 %v4772_v7 }
 0x5d5   :  { %v2043_v36 = vpop.permute.xlu1 %2042 }
 0x5d8   :  { %v1643_v15 = vpop.f32.mrf.mxu0 }
 0x5d9   :  { %3583 = vset.pattern.permute.xlu1 %v3933_v63  ;;  %1880 = vperm.xlu0 %3582, %v1643_v15  }
 0x5da   :  { %3584 = vset.pattern.permute.xlu2 %v3936_v10  ;;  %2312 = vperm.xlu1 %3583, %v1641_v42  }
 0x5db   :  { %1668 = vperm.xlu2 %3584, %v1643_v15  }
 0x5e1   :  { %v1646_v60 = vpop.f32.mrf.mxu0  ;;  %3587 = vset.pattern.permute.xlu0 %v3936_v10 }
 0x5e2   :  { %3585 = vset.pattern.permute.xlu1 %v3935_v1  ;;  %1673 = vperm.xlu0 %3587, %v1646_v60  }
 0x5e3   :  { %2098 = vperm.xlu1 %3585, %v1643_v15   ;;  %3594 = vset.pattern.permute.xlu2 %v3933_v63 }
 0x5e9   :  { %v1648_v8 = vpop.f32.mrf.mxu0 }
 0x5ea   :  { %2324 = vperm.xlu2 %3594, %v1648_v8   ;;  %3590 = vset.pattern.permute.xlu0 %v3933_v63 }
 0x5eb   :  { %3586 = vset.pattern.permute.xlu1 %v3933_v63  ;;  %2320 = vperm.xlu0 %3590, %v1646_v60  }
 0x5ec   :  { %2316 = vperm.xlu1 %3586, %v1643_v15  }
 0x5f1   :  { %v2045_v47 = vpop.permute.xlu2 %2044 }
 0x5f2   :  { %3595 = vset.pattern.permute.xlu2 %v3936_v10 }
 0x5f3   :  { %3592 = vset.pattern.permute.xlu0 %v3934_v0 }
 0x5f4   :  { %3588 = vset.pattern.permute.xlu1 %v3934_v0  ;;  %1888 = vperm.xlu0 %3592, %v1648_v8  }
 0x5f5   :  { %1884 = vperm.xlu1 %3588, %v1646_v60  }
 0x5f9   :  { %v2481_v2 = vpop.permute.xlu2 %2480 }
 0x5fd   :  { %3589 = vset.pattern.permute.xlu1 %v3935_v1 }
 0x5fe   :  { %2102 = vperm.xlu1 %3589, %v1646_v60  }
 0x602   :  { %v2047_v12 = vpop.permute.xlu2 %2046 }
 0x603   :  { %2068 = vmatpush.bf16.msra.mxu3 %v2047_v12 }
 0x606   :  { %3591 = vset.pattern.permute.xlu1 %v3936_v10 }
 0x607   :  { %1678 = vperm.xlu1 %3591, %v1648_v8   ;;  %2069 = vmatpush.bf16.msra.mxu3 %v2045_v47 }
 0x609   :  { %v2263_v33 = vpop.permute.xlu0 %2262 }
 0x60b   :  { %2070 = vmatpush.bf16.msra.mxu3 %v2043_v36 }
 0x60f   :  { %3593 = vset.pattern.permute.xlu1 %v3935_v1  ;;  %2071 = vmatpush.bf16.msra.mxu3 %v2041_v38 }
 0x610   :  { %2106 = vperm.xlu1 %3593, %v1648_v8  }
 0x615   :  { %v1651_v55 = vpop.f32.mrf.mxu0 }
 0x616   :  { %1892 = vperm.xlu0 %3592, %v1651_v55   ;;  %1683 = vperm.xlu2 %3595, %v1651_v55  }
 0x618   :  { %3601 = vset.pattern.permute.xlu1 %v3933_v63 }
 0x619   :  { %v2483_v20 = vpop.permute.xlu1 %2482  ;;  %v2265_v59 = vpop.permute.xlu0 %2264 }
 0x61a   :  { %2286 = vmatpush.bf16.msrb.mxu2 %v2265_v59  ;;  %2504 = vmatpush.bf16.msra.mxu1 %v2483_v20 }
 0x61d   :  { %v1653_v14 = vpop.f32.mrf.mxu0 }
 0x61e   :  { %2332 = vperm.xlu1 %3601, %v1653_v14   ;;  %3596 = vset.pattern.permute.xlu0 %v3935_v1 }
 0x61f   :  { %3599 = vset.pattern.permute.xlu2 %v3934_v0  ;;  %2110 = vperm.xlu0 %3596, %v1651_v55  }
 0x620   :  { %2287 = vmatpush.bf16.msrb.mxu2 %v2263_v33  ;;  %1896 = vperm.xlu2 %3599, %v1653_v14  }
 0x621   :  { %2505 = vmatpush.bf16.msra.mxu1 %v2481_v2 }
 0x624   :  { %2288 = vmatpush.bf16.msrb.mxu2 %v2261_v61 }
 0x626   :  { %v1656_v49 = vpop.f32.mrf.mxu0 }
 0x627   :  { %2336 = vperm.xlu1 %3601, %v1656_v49   ;;  %3597 = vset.pattern.permute.xlu0 %v3933_v63 }
 0x628   :  { %3600 = vset.pattern.permute.xlu2 %v3935_v1  ;;  %2328 = vperm.xlu0 %3597, %v1651_v55  }
 0x629   :  { %2114 = vperm.xlu2 %3600, %v1653_v14  }
 0x62c   :  { %v2095_v46 = vpop.permute.xlu2 %2094 }
 0x62e   :  { %v1658_v26 = vpop.f32.mrf.mxu0 }
 0x62f   :  { %3605 = vset.pattern.permute.xlu1 %v3935_v1 }
 0x630   :  { %2122 = vperm.xlu1 %3605, %v1658_v26   ;;  %3598 = vset.pattern.permute.xlu0 %v3936_v10 }
 0x631   :  { %3602 = vset.pattern.permute.xlu2 %v3934_v0  ;;  %1688 = vperm.xlu0 %3598, %v1653_v14  }
 0x632   :  { %1900 = vperm.xlu2 %3602, %v1656_v49  }
 0x635   :  { %v1669_v11 = vpop.permute.xlu2 %1668 }
 0x638   :  { %3606 = vset.pattern.permute.xlu1 %v3933_v63 }
 0x639   :  { %2340 = vperm.xlu1 %3606, %v1658_v26   ;;  %1693 = vperm.xlu0 %3598, %v1656_v49  }
 0x63a   :  { %3603 = vset.pattern.permute.xlu2 %v3935_v1 }
 0x63b   :  { %2118 = vperm.xlu2 %3603, %v1656_v49  }
 0x641   :  { %1698 = vperm.xlu0 %3598, %v1658_v26   ;;  %3608 = vset.pattern.permute.xlu1 %v3936_v10 }
 0x643   :  { %v1664_v43 = vpop.permute.xlu1 %1663  ;;  %3609 = vset.pattern.permute.xlu2 %v3936_v10  ;;  %v1877_v39 = vpop.permute.xlu0 %1876 }
 0x644   :  { %v1564_v56 = vpop.f32.mrf.mxu1 }
 0x645   :  { %v4823_v62 = vperm.slane %v1564_v56, 0  ;;  %v4825_v63 = vperm.slane %v1564_v56, 1  ;;  %v4830_v5 = vperm.slane %v1564_v56, 2  ;;  %v4832_v17 = vperm.slane %v1564_v56, 3 }
 0x647   :  { %v1702_v44 = vadd.f32 %v4823_v62, %v1664_v43  ;;  %v1908_v57 = vadd.f32 %v4825_v63, %v1877_v39  ;;  %v2126_v51 = vadd.f32 %v4830_v5, %v2095_v46  ;;  %v1703_v61 = vadd.f32 %v4823_v62, %v1669_v11 }
 0x649   :  { %3604 = vset.pattern.permute.xlu0 %v3934_v0  ;;  %v1718_v16 = vmul.f32 0.2, %v1702_v44  ;;  %vm1710_vm15 = vcmp.gt.f32.partialorder %v1702_v44, 0.0  ;;  %v1924_v0 = vmul.f32 0.2, %v1908_v57  ;;  %vm1916_vm1 = vcmp.gt.f32.partialorder %v1908_v57, 0.0 }
 0x64a   :  { %1904 = vperm.xlu0 %3604, %v1658_v26   ;;  %v2142_v23 = vmul.f32 0.2, %v2126_v51  ;;  %vm2134_vm2 = vcmp.gt.f32.partialorder %v2126_v51, 0.0  ;;  %v1719_v55 = vmul.f32 0.2, %v1703_v61  ;;  %vm1711_vm8 = vcmp.gt.f32.partialorder %v1703_v61, 0.0 }
 0x64b   :  { %v1881_v1 = vpop.permute.xlu0 %1880  ;;  %v1726_v48 = vsel %vm1710_vm15, %v1702_v44, %v1718_v16  ;;  %v1932_v52 = vsel %vm1916_vm1, %v1908_v57, %v1924_v0  ;;  %v2325_v57 = vpop.permute.xlu2 %2324 }
 0x64c   :  { %v2313_v21 = vpop.permute.xlu1 %2312  ;;  %v1566_v41 = vpop.f32.mrf.mxu1  ;;  %v4837_v58 = vadd.f32 %v4149_v29, %v1726_v48  ;;  %v4840_v4 = vadd.f32 %v4149_v29, %v1932_v52  ;;  %v2150_v15 = vsel %vm2134_vm2, %v2126_v51, %v2142_v23  ;;  %v1909_v59 = vadd.f32 %v4825_v63, %v1881_v1 }
 0x64d   :  { %v4850_v2 = vadd.f32 %v4149_v29, %v2150_v15  ;;  %v1727_v43 = vsel %vm1711_vm8, %v1703_v61, %v1719_v55 }
 0x64e   :  { %v1742_v50 = vsel %vm468_vm3, %v4837_v58, -inf  ;;  %v1948_v42 = vsel %vm468_vm3, %v4840_v4, -inf  ;;  %v4865_v44 = vadd.f32 %v4178_v53, %v1727_v43  ;;  %vm1917_vm9 = vcmp.gt.f32.partialorder %v1909_v59, 0.0 }
 0x64f   :  { %v2166_v20 = vsel %vm468_vm3, %v4850_v2, -inf }
 0x650   :  { %v1745_v46 = vsel %vm468_vm3, %v4865_v44, -inf }
 0x652   :  { %3607 = vset.pattern.permute.xlu0 %v3936_v10  ;;  %v2344_v10 = vadd.f32 %v4832_v17, %v2313_v21  ;;  %v1925_v21 = vmul.f32 0.2, %v1909_v59 }
 0x654   :  { %v1674_v45 = vpop.permute.xlu0 %1673  ;;  %v2360_v35 = vmul.f32 0.2, %v2344_v10  ;;  %vm2352_vm4 = vcmp.gt.f32.partialorder %v2344_v10, 0.0  ;;  %v1933_v51 = vsel %vm1917_vm9, %v1909_v59, %v1925_v21 }
 0x655   :  { %v2099_v37 = vpop.permute.xlu1 %2098  ;;  %v1704_v26 = vadd.f32 %v4823_v62, %v1674_v45 }
 0x656   :  { %v2127_v40 = vadd.f32 %v4830_v5, %v2099_v37  ;;  %v2368_v8 = vsel %vm2352_vm4, %v2344_v10, %v2360_v35 }
 0x657   :  { %v4853_v36 = vadd.f32 %v4149_v29, %v2368_v8  ;;  %v1720_v37 = vmul.f32 0.2, %v1704_v26  ;;  %vm1712_vm10 = vcmp.gt.f32.partialorder %v1704_v26, 0.0 }
 0x658   :  { %v2143_v12 = vmul.f32 0.2, %v2127_v40  ;;  %vm2135_vm5 = vcmp.gt.f32.partialorder %v2127_v40, 0.0 }
 0x659   :  { %v2384_v14 = vsel %vm468_vm3, %v4853_v36, -inf  ;;  %v1728_v45 = vsel %vm1712_vm10, %v1704_v26, %v1720_v37  ;;  %v2347_v26 = vadd.f32 %v4832_v17, %v2325_v57 }
 0x65a   :  { %v2151_v49 = vsel %vm2135_vm5, %v2127_v40, %v2143_v12  ;;  %v4882_v23 = vadd.f32 %v4210_v18, %v1728_v45 }
 0x65b   :  { %v4862_v39 = vadd.f32 %v4178_v53, %v2151_v49  ;;  %vm2355_vm1 = vcmp.gt.f32.partialorder %v2347_v26, 0.0 }
 0x65c   :  { %v1748_v15 = vsel %vm468_vm3, %v4882_v23, -inf }
 0x65d   :  { %v2321_v38 = vpop.permute.xlu0 %2320  ;;  %v2169_v0 = vsel %vm468_vm3, %v4862_v39, -inf }
 0x65e   :  { %v2317_v54 = vpop.permute.xlu1 %2316  ;;  %v2346_v43 = vadd.f32 %v4832_v17, %v2321_v38 }
 0x65f   :  { %v2345_v60 = vadd.f32 %v4832_v17, %v2317_v54  ;;  %v4879_v54 = vadd.f32 %v4178_v53, %v1933_v51 }
 0x660   :  { %vm2354_vm15 = vcmp.gt.f32.partialorder %v2346_v43, 0.0 }
 0x661   :  { %v2361_v33 = vmul.f32 0.2, %v2345_v60  ;;  %vm2353_vm7 = vcmp.gt.f32.partialorder %v2345_v60, 0.0 }
 0x663   :  { %1743 = vmax.xlane.f32.xlu1 %v1742_v50  ;;  %v2369_v56 = vsel %vm2353_vm7, %v2345_v60, %v2361_v33 }
 0x664   :  { %1949 = vmax.xlane.f32.xlu2 %v1948_v42  ;;  %v4868_v1 = vadd.f32 %v4178_v53, %v2369_v56  ;;  %v1951_v42 = vsel %vm468_vm3, %v4879_v54, -inf }
 0x666   :  { %v1889_v16 = vpop.permute.xlu0 %1888  ;;  %v2387_v48 = vsel %vm468_vm3, %v4868_v1, -inf }
 0x667   :  { %v1885_v47 = vpop.permute.xlu1 %1884  ;;  %v1911_v10 = vadd.f32 %v4825_v63, %v1889_v16 }
 0x668   :  { %v1910_v52 = vadd.f32 %v4825_v63, %v1885_v47 }
 0x669   :  { %v1927_v35 = vmul.f32 0.2, %v1911_v10  ;;  %vm1919_vm11 = vcmp.gt.f32.partialorder %v1911_v10, 0.0 }
 0x66a   :  { %v1926_v50 = vmul.f32 0.2, %v1910_v52  ;;  %vm1918_vm12 = vcmp.gt.f32.partialorder %v1910_v52, 0.0 }
 0x66b   :  { %2167 = vmax.xlane.f32.xlu1 %v2166_v20  ;;  %v1935_v61 = vsel %vm1919_vm11, %v1911_v10, %v1927_v35 }
 0x66c   :  { %2385 = vmax.xlane.f32.xlu2 %v2384_v14  ;;  %v1934_v8 = vsel %vm1918_vm12, %v1910_v52, %v1926_v50  ;;  %v4893_v12 = vadd.f32 %v4226_v34, %v1935_v61 }
 0x66d   :  { %v4890_v47 = vadd.f32 %v4210_v18, %v1934_v8 }
 0x66e   :  { %v1957_v49 = vsel %vm468_vm3, %v4893_v12, -inf }
 0x66f   :  { %v1954_v14 = vsel %vm468_vm3, %v4890_v47, -inf }
 0x670   :  { %v2103_v41 = vpop.permute.xlu1 %2102  ;;  %v1684_v40 = vpop.permute.xlu2 %1683 }
 0x671   :  { %v2128_v60 = vadd.f32 %v4830_v5, %v2103_v41 }
 0x673   :  { %2170 = vmax.xlane.f32.xlu1 %v2169_v0  ;;  %v2144_v33 = vmul.f32 0.2, %v2128_v60  ;;  %vm2136_vm13 = vcmp.gt.f32.partialorder %v2128_v60, 0.0  ;;  %v2362_v0 = vmul.f32 0.2, %v2346_v43 }
 0x674   :  { %1746 = vmax.xlane.f32.xlu2 %v1745_v46  ;;  %2388 = vmax.xlane.f32.xlu0 %v2387_v48  ;;  %v2363_v48 = vmul.f32 0.2, %v2347_v26 }
 0x675   :  { %v2152_v21 = vsel %vm2136_vm13, %v2128_v60, %v2144_v33  ;;  %v2370_v45 = vsel %vm2354_vm15, %v2346_v43, %v2362_v0 }
 0x676   :  { %v4905_v37 = vadd.f32 %v4210_v18, %v2152_v21  ;;  %v2371_v35 = vsel %vm2355_vm1, %v2347_v26, %v2363_v48  ;;  %v4920_v60 = vadd.f32 %v4210_v18, %v2370_v45 }
 0x677   :  { %v4923_v8 = vadd.f32 %v4226_v34, %v2371_v35 }
 0x678   :  { %v2172_v10 = vsel %vm468_vm3, %v4905_v37, -inf }
 0x679   :  { %v1679_v11 = vpop.permute.xlu1 %1678  ;;  %v2393_v26 = vsel %vm468_vm3, %v4923_v8, -inf }
 0x67a   :  { %v4896_v59 = vpop.permute.xlu2 %1896  ;;  %v1705_v52 = vadd.f32 %v4823_v62, %v1679_v11 }
 0x67c   :  { %1952 = vmax.xlane.f32.xlu2 %v1951_v42  ;;  %1749 = vmax.xlane.f32.xlu0 %v1748_v15  ;;  %v1721_v61 = vmul.f32 0.2, %v1705_v52  ;;  %vm1713_vm4 = vcmp.gt.f32.partialorder %v1705_v52, 0.0 }
 0x67e   :  { %v1729_v21 = vsel %vm1713_vm4, %v1705_v52, %v1721_v61 }
 0x682   :  { %v2107_v55 = vpop.permute.xlu1 %2106 }
 0x683   :  { %v2129_v20 = vadd.f32 %v4830_v5, %v2107_v55  ;;  %v2115_v50 = vpop.permute.xlu2 %2114 }
 0x684   :  { %1955 = vmax.xlane.f32.xlu2 %v1954_v14  ;;  %1958 = vmax.xlane.f32.xlu0 %v1957_v49  ;;  %v1706_v14 = vadd.f32 %v4823_v62, %v1684_v40  ;;  %v2390_v49 = vsel %vm468_vm3, %v4920_v60, -inf }
 0x685   :  { %vm2137_vm14 = vcmp.gt.f32.partialorder %v2129_v20, 0.0  ;;  %v2145_v56 = vmul.f32 0.2, %v2129_v20 }
 0x686   :  { %v1722_v48 = vmul.f32 0.2, %v1706_v14  ;;  %vm1714_vm7 = vcmp.gt.f32.partialorder %v1706_v14, 0.0 }
 0x687   :  { %v2153_v41 = vsel %vm2137_vm14, %v2129_v20, %v2145_v56 }
 0x688   :  { %v4908_v16 = vadd.f32 %v4226_v34, %v2153_v41  ;;  %v1893_v46 = vpop.permute.xlu0 %1892 }
 0x689   :  { %v1912_v57 = vadd.f32 %v4825_v63, %v1893_v46  ;;  %v4935_v46 = vadd.f32 %v4226_v34, %v1729_v21 }
 0x68a   :  { %v2175_v38 = vsel %vm468_vm3, %v4908_v16, -inf }
 0x68b   :  { %vm1920_vm2 = vcmp.gt.f32.partialorder %v1912_v57, 0.0  ;;  %v1928_v51 = vmul.f32 0.2, %v1912_v57  ;;  %v1751_v52 = vsel %vm468_vm3, %v4935_v46, -inf }
 0x68c   :  { %2173 = vmax.xlane.f32.xlu2 %v2172_v10  ;;  %2176 = vmax.xlane.f32.xlu0 %v2175_v38  ;;  %v1901_v0 = vpop.permute.xlu2 %1900 }
 0x68d   :  { %v1936_v42 = vsel %vm1920_vm2, %v1912_v57, %v1928_v51  ;;  %v1914_v10 = vadd.f32 %v4825_v63, %v1901_v0 }
 0x68e   :  { %v4917_v15 = vadd.f32 %v4249_v3, %v1936_v42  ;;  %v1730_v42 = vsel %vm1714_vm7, %v1706_v14, %v1722_v48 }
 0x68f   :  { %vm1922_vm9 = vcmp.gt.f32.partialorder %v1914_v10, 0.0 }
 0x690   :  { %v2333_v33 = vpop.permute.xlu1 %2332  ;;  %v1960_v11 = vsel %vm468_vm3, %v4917_v15, -inf }
 0x691   :  { %v2111_v55 = vpop.permute.xlu0 %2110  ;;  %1961 = vmax.xlane.f32.xlu1 %v1960_v11  ;;  %v2349_v43 = vadd.f32 %v4832_v17, %v2333_v33  ;;  %v1930_v33 = vmul.f32 0.2, %v1914_v10  ;;  %v4949_v11 = vadd.f32 %v4249_v3, %v1730_v42 }
 0x692   :  { %v2130_v20 = vadd.f32 %v4830_v5, %v2111_v55 }
 0x693   :  { %v2365_v57 = vmul.f32 0.2, %v2349_v43  ;;  %vm2357_vm8 = vcmp.gt.f32.partialorder %v2349_v43, 0.0  ;;  %v1754_v14 = vsel %vm468_vm3, %v4949_v11, -inf }
 0x694   :  { %vm2138_vm5 = vcmp.gt.f32.partialorder %v2130_v20, 0.0  ;;  %v2146_v56 = vmul.f32 0.2, %v2130_v20  ;;  %2391 = vmax.xlane.f32.xlu2 %v2390_v49  ;;  %2394 = vmax.xlane.f32.xlu0 %v2393_v26 }
 0x695   :  { %v2373_v61 = vsel %vm2357_vm8, %v2349_v43, %v2365_v57  ;;  %v2119_v49 = vpop.permute.xlu2 %2118 }
 0x696   :  { %v2154_v41 = vsel %vm2138_vm5, %v2130_v20, %v2146_v56  ;;  %v4952_v55 = vadd.f32 %v4299_v13, %v2373_v61  ;;  %v1913_v56 = vadd.f32 %v4825_v63, %v4896_v59  ;;  %v2132_v0 = vadd.f32 %v4830_v5, %v2119_v49 }
 0x697   :  { %v4938_v40 = vadd.f32 %v4249_v3, %v2154_v41  ;;  %v1938_v41 = vsel %vm1922_vm9, %v1914_v10, %v1930_v33 }
 0x698   :  { %v2399_v43 = vsel %vm468_vm3, %v4952_v55, -inf  ;;  %v1929_v42 = vmul.f32 0.2, %v1913_v56  ;;  %v2148_v61 = vmul.f32 0.2, %v2132_v0  ;;  %vm1921_vm12 = vcmp.gt.f32.partialorder %v1913_v56, 0.0 }
 0x699   :  { %v4940_v38 = vpop.permute.xlu1 %2336  ;;  %v2178_v45 = vsel %vm468_vm3, %v4938_v40, -inf  ;;  %vm2140_vm13 = vcmp.gt.f32.partialorder %v2132_v0, 0.0 }
 0x69a   :  { %v2329_v51 = vpop.permute.xlu0 %2328 }
 0x69b   :  { %v2348_v35 = vadd.f32 %v4832_v17, %v2329_v51  ;;  %v2131_v51 = vadd.f32 %v4830_v5, %v2115_v50 }
 0x69c   :  { %1752 = vmax.xlane.f32.xlu2 %v1751_v52  ;;  %2179 = vmax.xlane.f32.xlu0 %v2178_v45  ;;  %v4969_v45 = vadd.f32 %v4272_v28, %v1938_v41  ;;  %v1937_v41 = vsel %vm1921_vm12, %v1913_v56, %v1929_v42  ;;  %vm2837_vm12 = vcmask 1043456  }
 0x69d   :  { %v2364_v20 = vmul.f32 0.2, %v2348_v35  ;;  %vm2356_vm10 = vcmp.gt.f32.partialorder %v2348_v35, 0.0  ;;  %v2147_v33 = vmul.f32 0.2, %v2131_v51  ;;  %vm2139_vm14 = vcmp.gt.f32.partialorder %v2131_v51, 0.0 }
 0x69f   :  { %v2372_v57 = vsel %vm2356_vm10, %v2348_v35, %v2364_v20 }
 0x6a0   :  { %v4966_v59 = vadd.f32 %v4249_v3, %v2372_v57 }
 0x6a2   :  { %v4954_v26 = vpop.permute.xlu1 %2122  ;;  %v2396_v20 = vsel %vm468_vm3, %v4966_v59, -inf }
 0x6a3   :  { %v1689_v21 = vpop.permute.xlu0 %1688 }
 0x6a4   :  { %v1707_v48 = vadd.f32 %v4823_v62, %v1689_v21  ;;  %1755 = vmax.xlane.f32.xlu2 %v1754_v14  ;;  %2400 = vmax.xlane.f32.xlu0 %v2399_v43  ;;  %v1966_v21 = vsel %vm468_vm3, %v4969_v45, -inf }
 0x6a6   :  { %vm1715_vm11 = vcmp.gt.f32.partialorder %v1707_v48, 0.0  ;;  %v1723_v52 = vmul.f32 0.2, %v1707_v48 }
 0x6a8   :  { %v1731_v10 = vsel %vm1715_vm11, %v1707_v48, %v1723_v52  ;;  %v2156_v48 = vsel %vm2140_vm13, %v2132_v0, %v2148_v61  ;;  %v2155_v52 = vsel %vm2139_vm14, %v2131_v51, %v2147_v33  ;;  %v2350_v33 = vadd.f32 %v4832_v17, %v4940_v38 }
 0x6a9   :  { %v4972_v49 = vadd.f32 %v4299_v13, %v1731_v10  ;;  %v4983_v10 = vadd.f32 %v4299_v13, %v1937_v41  ;;  %v4986_v3 = vadd.f32 %v4272_v28, %v2156_v48  ;;  %v4989_v53 = vadd.f32 %v4299_v13, %v2155_v52 }
 0x6aa   :  { %vm2358_vm4 = vcmp.gt.f32.partialorder %v2350_v33, 0.0 }
 0x6ab   :  { %v2341_v35 = vpop.permute.xlu1 %2340  ;;  %v1694_v50 = vpop.permute.xlu0 %1693  ;;  %v1757_v14 = vsel %vm468_vm3, %v4972_v49, -inf  ;;  %v1963_v56 = vsel %vm468_vm3, %v4983_v10, -inf  ;;  %v2184_v0 = vsel %vm468_vm3, %v4986_v3, -inf  ;;  %v2181_v42 = vsel %vm468_vm3, %v4989_v53, -inf }
 0x6ac   :  { %v2351_v43 = vadd.f32 %v4832_v17, %v2341_v35  ;;  %2397 = vmax.xlane.f32.xlu2 %v2396_v20  ;;  %1967 = vmax.xlane.f32.xlu0 %v1966_v21  ;;  %v1708_v57 = vadd.f32 %v4823_v62, %v1694_v50 }
 0x6ad   :  { %1758 = vmax.xlane.f32.xlu1 %v1757_v14 }
 0x6ae   :  { %v2367_v34 = vmul.f32 0.2, %v2351_v43  ;;  %vm2359_vm15 = vcmp.gt.f32.partialorder %v2351_v43, 0.0  ;;  %v1724_v35 = vmul.f32 0.2, %v1708_v57  ;;  %vm1716_vm1 = vcmp.gt.f32.partialorder %v1708_v57, 0.0 }
 0x6b0   :  { %v2375_v61 = vsel %vm2359_vm15, %v2351_v43, %v2367_v34  ;;  %v1732_v50 = vsel %vm1716_vm1, %v1708_v57, %v1724_v35 }
 0x6b1   :  { %v5001_v14 = vadd.f32 %v4357_v6, %v2375_v61  ;;  %v5004_v48 = vadd.f32 %v4272_v28, %v1732_v50 }
 0x6b3   :  { %v1699_v20 = vpop.permute.xlu0 %1698  ;;  %v2405_v34 = vsel %vm468_vm3, %v5001_v14, -inf  ;;  %v1760_v43 = vsel %vm468_vm3, %v5004_v48, -inf }
 0x6b4   :  { %v1709_v51 = vadd.f32 %v4823_v62, %v1699_v20  ;;  %1964 = vmax.xlane.f32.xlu2 %v1963_v56  ;;  %2185 = vmax.xlane.f32.xlu0 %v2184_v0  ;;  %v2366_v62 = vmul.f32 0.2, %v2350_v33 }
 0x6b5   :  { %2182 = vmax.xlane.f32.xlu1 %v2181_v42 }
 0x6b6   :  { %vm1717_vm2 = vcmp.gt.f32.partialorder %v1709_v51, 0.0  ;;  %v1725_v21 = vmul.f32 0.2, %v1709_v51  ;;  %v2374_v35 = vsel %vm2358_vm4, %v2350_v33, %v2366_v62 }
 0x6b7   :  { %v5017_v20 = vadd.f32 %v4272_v28, %v2374_v35 }
 0x6b8   :  { %v1733_v41 = vsel %vm1717_vm2, %v1709_v51, %v1725_v21  ;;  %v2133_v51 = vadd.f32 %v4830_v5, %v4954_v26 }
 0x6b9   :  { %v5007_v52 = vadd.f32 %v4357_v6, %v1733_v41  ;;  %v2402_v0 = vsel %vm468_vm3, %v5017_v20, -inf }
 0x6ba   :  { %v2149_v50 = vmul.f32 0.2, %v2133_v51  ;;  %vm2141_vm7 = vcmp.gt.f32.partialorder %v2133_v51, 0.0 }
 0x6bb   :  { %v1763_v17 = vsel %vm468_vm3, %v5007_v52, -inf }
 0x6bc   :  { %v1905_v38 = vpop.permute.xlu0 %1904  ;;  %2406 = vmax.xlane.f32.xlu0 %v2405_v34  ;;  %1764 = vmax.xlane.f32.xlu2 %v1763_v17  ;;  %v2157_v33 = vsel %vm2141_vm7, %v2133_v51, %v2149_v50 }
 0x6bd   :  { %v1915_v57 = vadd.f32 %v4825_v63, %v1905_v38  ;;  %1761 = vmax.xlane.f32.xlu1 %v1760_v43  ;;  %v5029_v21 = vadd.f32 %v4357_v6, %v2157_v33 }
 0x6bf   :  { %v1931_v56 = vmul.f32 0.2, %v1915_v57  ;;  %vm1923_vm5 = vcmp.gt.f32.partialorder %v1915_v57, 0.0  ;;  %v2187_v41 = vsel %vm468_vm3, %v5029_v21, -inf }
 0x6c1   :  { %v1939_v42 = vsel %vm1923_vm5, %v1915_v57, %v1931_v56 }
 0x6c2   :  { %v5024_v61 = vadd.f32 %v4357_v6, %v1939_v42 }
 0x6c4   :  { %v1969_v63 = vsel %vm468_vm3, %v5024_v61, -inf }
 0x6c5   :  { %2403 = vmax.xlane.f32.xlu1 %v2402_v0 }
 0x6cd   :  { %1970 = vmax.xlane.f32.xlu1 %v1969_v63 }
 0x6d5   :  { %2188 = vmax.xlane.f32.xlu1 %v2187_v41 }
 0x6d6   :  { %v1744_v5 = vpop.xlane.xlu1 %1743 }
 0x6d7   :  { %v1766_v26 = vsub.f32 %v4837_v58, %v1744_v5  ;;  %v1950_v62 = vpop.xlane.xlu2 %1949 }
 0x6d8   :  { %v1972_v34 = vsub.f32 %v4840_v4, %v1950_v62 }
 0x6d9   :  { %v1774_v17 = vmul.f32 1.442695, %v1766_v26 }
 0x6da   :  { %v1980_v38 = vmul.f32 1.442695, %v1972_v34 }
 0x6db   :  { %3754 = vpow2.f32 %v1774_v17 }
 0x6dc   :  { %3756 = vpow2.f32 %v1980_v38 }
 0x6de   :  { %v2168_v43 = vpop.xlane.xlu1 %2167 }
 0x6df   :  { %v2190_v57 = vsub.f32 %v4850_v2, %v2168_v43  ;;  %v2386_v35 = vpop.xlane.xlu2 %2385 }
 0x6e0   :  { %v2408_v42 = vsub.f32 %v4853_v36, %v2386_v35 }
 0x6e1   :  { %v5036_v56 = vpop.eup %3754  ;;  %v2198_v0 = vmul.f32 1.442695, %v2190_v57 }
 0x6e2   :  { %v5038_v51 = vpop.eup %3756  ;;  %v1790_v58 = vsel %vm468_vm3, %v5036_v56, 0.0  ;;  %v2416_v50 = vmul.f32 1.442695, %v2408_v42 }
 0x6e3   :  { %3758 = vpow2.f32 %v2198_v0  ;;  %1791 = vadd.xlane.f32.xlu0 %v1790_v58  ;;  %v1996_v4 = vsel %vm468_vm3, %v5038_v51, 0.0 }
 0x6e4   :  { %1997 = vadd.xlane.f32.xlu1 %v1996_v4  ;;  %3760 = vpow2.f32 %v2416_v50 }
 0x6e6   :  { %v2171_v63 = vpop.xlane.xlu1 %2170 }
 0x6e7   :  { %v2191_v2 = vsub.f32 %v4862_v39, %v2171_v63  ;;  %v1747_v33 = vpop.xlane.xlu2 %1746  ;;  %v2389_v41 = vpop.xlane.xlu0 %2388 }
 0x6e8   :  { %v2409_v5 = vsub.f32 %v4868_v1, %v2389_v41  ;;  %v1767_v62 = vsub.f32 %v4865_v44, %v1747_v33 }
 0x6e9   :  { %v5047_v26 = vpop.eup %3758  ;;  %v2200_v36 = vmul.f32 1.442695, %v2191_v2 }
 0x6ea   :  { %v2418_v34 = vmul.f32 1.442695, %v2409_v5  ;;  %v2214_v17 = vsel %vm468_vm3, %v5047_v26, 0.0  ;;  %v1776_v38 = vmul.f32 1.442695, %v1767_v62  ;;  %v5052_v39 = vpop.eup %3760 }
 0x6eb   :  { %3762 = vpow2.f32 %v2200_v36  ;;  %v2432_v0 = vsel %vm468_vm3, %v5052_v39, 0.0 }
 0x6ec   :  { %2215 = vadd.xlane.f32.xlu1 %v2214_v17  ;;  %3764 = vpow2.f32 %v2418_v34 }
 0x6ed   :  { %3766 = vpow2.f32 %v1776_v38 }
 0x6ef   :  { %v1953_v43 = vpop.xlane.xlu2 %1952  ;;  %v1750_v4 = vpop.xlane.xlu0 %1749 }
 0x6f0   :  { %v1973_v1 = vsub.f32 %v4879_v54, %v1953_v43  ;;  %v1768_v54 = vsub.f32 %v4882_v23, %v1750_v4 }
 0x6f1   :  { %v5054_v57 = vpop.eup %3762 }
 0x6f2   :  { %v2217_v35 = vsel %vm468_vm3, %v5054_v57, 0.0  ;;  %v5059_v44 = vpop.eup %3764  ;;  %v1982_v58 = vmul.f32 1.442695, %v1973_v1  ;;  %v1778_v33 = vmul.f32 1.442695, %v1768_v54 }
 0x6f3   :  { %2218 = vadd.xlane.f32.xlu2 %v2217_v35  ;;  %v2435_v42 = vsel %vm468_vm3, %v5059_v44, 0.0  ;;  %v5067_v63 = vpop.eup %3766 }
 0x6f4   :  { %2433 = vadd.xlane.f32.xlu1 %v2432_v0  ;;  %2436 = vadd.xlane.f32.xlu0 %v2435_v42  ;;  %3768 = vpow2.f32 %v1982_v58  ;;  %v1793_v2 = vsel %vm468_vm3, %v5067_v63, 0.0 }
 0x6f5   :  { %3770 = vpow2.f32 %v1778_v33 }
 0x6f7   :  { %v5065_v50 = vpop.xlane.xlu2 %1955  ;;  %v1959_v43 = vpop.xlane.xlu0 %1958 }
 0x6f8   :  { %v1975_v18 = vsub.f32 %v4893_v12, %v1959_v43 }
 0x6fa   :  { %v5072_v5 = vpop.eup %3768  ;;  %v1986_v22 = vmul.f32 1.442695, %v1975_v18 }
 0x6fb   :  { %v1999_v36 = vsel %vm468_vm3, %v5072_v5, 0.0  ;;  %v5078_v34 = vpop.eup %3770 }
 0x6fc   :  { %1794 = vadd.xlane.f32.xlu1 %v1793_v2  ;;  %v1796_v23 = vsel %vm468_vm3, %v5078_v34, 0.0 }
 0x6ff   :  { %v2174_v41 = vpop.xlane.xlu2 %2173  ;;  %v2177_v2 = vpop.xlane.xlu0 %2176 }
 0x700   :  { %v2193_v28 = vsub.f32 %v4908_v16, %v2177_v2 }
 0x704   :  { %2000 = vadd.xlane.f32.xlu1 %v1999_v36  ;;  %v5083_v0 = vpop.xlane.xlu1 %1961 }
 0x707   :  { %v5076_v62 = vpop.xlane.xlu2 %2391 }
 0x70c   :  { %1797 = vadd.xlane.f32.xlu1 %v1796_v23 }
 0x70f   :  { %v1753_v17 = vpop.xlane.xlu2 %1752 }
 0x710   :  { %v1769_v38 = vsub.f32 %v4935_v46, %v1753_v17 }
 0x712   :  { %v1780_v1 = vmul.f32 1.442695, %v1769_v38 }
 0x714   :  { %3772 = vpow2.f32 %v1780_v1 }
 0x717   :  { %v1756_v35 = vpop.xlane.xlu2 %1755 }
 0x718   :  { %v1770_v42 = vsub.f32 %v4949_v11, %v1756_v35  ;;  %v2395_v11 = vpop.xlane.xlu0 %2394 }
 0x71a   :  { %v5086_v58 = vpop.eup %3772  ;;  %v1782_v4 = vmul.f32 1.442695, %v1770_v42 }
 0x71b   :  { %v1799_v54 = vsel %vm468_vm3, %v5086_v58, 0.0 }
 0x71c   :  { %3774 = vpow2.f32 %v1782_v4  ;;  %1800 = vadd.xlane.f32.xlu2 %v1799_v54 }
 0x720   :  { %v1759_v33 = vpop.xlane.xlu1 %1758  ;;  %v5101_v42 = vpop.xlane.xlu0 %2179 }
 0x721   :  { %v1771_v46 = vsub.f32 %v4972_v49, %v1759_v33  ;;  %v2192_v33 = vsub.f32 %v4905_v37, %v2174_v41  ;;  %v2204_v37 = vmul.f32 1.442695, %v2193_v28 }
 0x722   :  { %v5091_v36 = vpop.eup %3774 }
 0x723   :  { %v1784_v23 = vmul.f32 1.442695, %v1771_v46  ;;  %v1802_v17 = vsel %vm468_vm3, %v5091_v36, 0.0  ;;  %v2202_v46 = vmul.f32 1.442695, %v2192_v33 }
 0x724   :  { %1803 = vadd.xlane.f32.xlu2 %v1802_v17 }
 0x725   :  { %3776 = vpow2.f32 %v1784_v23 }
 0x728   :  { %v5095_v38 = vpop.xlane.xlu1 %2182  ;;  %v5105_v17 = vpop.xlane.xlu0 %2400 }
 0x72b   :  { %v5097_v1 = vpop.eup %3776 }
 0x72c   :  { %v1805_v35 = vsel %vm468_vm3, %v5097_v1, 0.0 }
 0x72d   :  { %1806 = vadd.xlane.f32.xlu0 %v1805_v35  ;;  %v5112_v35 = vpop.xlane.xlu2 %2397 }
 0x730   :  { %v1762_v49 = vpop.xlane.xlu1 %1761 }
 0x731   :  { %v1772_v4 = vsub.f32 %v5004_v48, %v1762_v49  ;;  %v5122_v49 = vpop.xlane.xlu0 %1967 }
 0x733   :  { %v1786_v54 = vmul.f32 1.442695, %v1772_v4 }
 0x735   :  { %3778 = vpow2.f32 %v1786_v54  ;;  %v5128_v2 = vpop.xlane.xlu2 %1964 }
 0x736   :  { %3780 = vpow2.f32 %v2202_v46 }
 0x737   :  { %3782 = vpow2.f32 %v2204_v37 }
 0x738   :  { %v5107_v23 = vpop.xlane.xlu1 %2403 }
 0x739   :  { %v5134_v33 = vpop.xlane.xlu0 %2185 }
 0x73b   :  { %v5109_v6 = vpop.eup %3778 }
 0x73c   :  { %2258 = vrot.lane.b32.xlu2 %v4772_v7, %s3932_s15  ;;  %v1808_v48 = vsel %vm468_vm3, %v5109_v6, 0.0  ;;  %v5118_v41 = vpop.eup %3780 }
 0x73d   :  { %1809 = vadd.xlane.f32.xlu1 %v1808_v48  ;;  %v2220_v16 = vsel %vm468_vm3, %v5118_v41, 0.0  ;;  %v5130_v54 = vpop.eup %3782  ;;  %v1765_v46 = vpop.xlane.xlu2 %1764 }
 0x73e   :  { %v2223_v28 = vsel %vm468_vm3, %v5130_v54, 0.0  ;;  %v1773_v48 = vsub.f32 %v5007_v52, %v1765_v46  ;;  %v2411_v52 = vsub.f32 %v4923_v8, %v2395_v11  ;;  %v2410_v46 = vsub.f32 %v4920_v60, %v5076_v62 }
 0x73f   :  { %v1976_v60 = vsub.f32 %v4917_v15, %v5083_v0 }
 0x740   :  { %v5124_v4 = vpop.xlane.xlu1 %1970  ;;  %v1788_v37 = vmul.f32 1.442695, %v1773_v48 }
 0x741   :  { %2478 = vrot.lane.b32.xlu0 %v4777_v24, %s3931_s5  ;;  %v5139_v29 = vpop.xlane.xlu0 %2406 }
 0x742   :  { %3784 = vpow2.f32 %v1788_v37 }
 0x743   :  { %3786 = vpow2.f32 %v1986_v22 }
 0x745   :  { %2221 = vadd.xlane.f32.xlu1 %v2220_v16  ;;  %v1974_v16 = vsub.f32 %v4890_v47, %v5065_v50  ;;  %v2422_v47 = vmul.f32 1.442695, %v2411_v52  ;;  %v2420_v50 = vmul.f32 1.442695, %v2410_v46  ;;  %v2412_v46 = vsub.f32 %v4966_v59, %v5112_v35 }
 0x747   :  { %v1984_v27 = vmul.f32 1.442695, %v1974_v16  ;;  %v1988_v16 = vmul.f32 1.442695, %v1976_v60 }
 0x748   :  { %v5136_v24 = vpop.xlane.xlu1 %2188  ;;  %v5146_v25 = vpop.eup %3784 }
 0x749   :  { %3788 = vpow2.f32 %v1984_v27  ;;  %v1811_v12 = vsel %vm468_vm3, %v5146_v25, 0.0  ;;  %v5155_v43 = vpop.eup %3786  ;;  %v2194_v27 = vsub.f32 %v4938_v40, %v5101_v42 }
 0x74a   :  { %v2005_v8 = vsel %vm468_vm3, %v5155_v43, 0.0 }
 0x74b   :  { %v2206_v11 = vmul.f32 1.442695, %v2194_v27 }
 0x74d   :  { %2224 = vadd.xlane.f32.xlu1 %v2223_v28 }
 0x74f   :  { %v5157_v48 = vpop.eup %3788 }
 0x756   :  { %v1792_v28 = vpop.xlane.xlu0 %1791 }
 0x757   :  { %v1998_v13 = vpop.xlane.xlu1 %1997 }
 0x75f   :  { %v5144_v30 = vpop.xlane.xlu1 %2215 }
 0x765   :  { %1812 = vadd.xlane.f32.xlu2 %v1811_v12 }
 0x766   :  { %2476 = vrot.lane.b32.xlu1 %v4772_v7, %s3931_s5  ;;  %v2002_v7 = vsel %vm468_vm3, %v5157_v48, 0.0 }
 0x767   :  { %v2434_v18 = vpop.xlane.xlu1 %2433  ;;  %v2437_v22 = vpop.xlane.xlu0 %2436 }
 0x768   :  { %3790 = vrcp.f32 %v2434_v18  ;;  %v2424_v18 = vmul.f32 1.442695, %v2412_v46  ;;  %v2196_v46 = vsub.f32 %v4986_v3, %v5134_v33 }
 0x769   :  { %3792 = vrcp.f32 %v2437_v22 }
 0x76a   :  { %3794 = vpow2.f32 %v2422_v47 }
 0x76b   :  { %3796 = vpow2.f32 %v2420_v50  ;;  %2006 = vadd.xlane.f32.xlu0 %v2005_v8  ;;  %v1978_v8 = vsub.f32 %v4969_v45, %v5122_v49  ;;  %v1977_v45 = vsub.f32 %v4983_v10, %v5128_v2 }
 0x76c   :  { %3798 = vrcp.f32 %v1792_v28 }
 0x76d   :  { %2003 = vadd.xlane.f32.xlu2 %v2002_v7  ;;  %v2413_v7 = vsub.f32 %v4952_v55, %v5105_v17 }
 0x76e   :  { %v3791_v62 = vpop.eup %3790 }
 0x76f   :  { %v3793_v37 = vpop.eup %3792  ;;  %v5168_v52 = vmul.f32 %v3791_v62, %v5052_v39  ;;  %v1795_v40 = vpop.xlane.xlu1 %1794  ;;  %v2195_v39 = vsub.f32 %v4989_v53, %v5095_v38 }
 0x770   :  { %v5170_v42 = vpop.eup %3794  ;;  %v5173_v15 = vmul.f32 %v3793_v37, %v5059_v44  ;;  %3800 = vrcp.f32 %v1795_v40  ;;  %v2426_v37 = vmul.f32 1.442695, %v2413_v7 }
 0x771   :  { %v5175_v0 = vpop.eup %3796  ;;  %3802 = vpow2.f32 %v2206_v11  ;;  %v2441_v12 = vsel %vm468_vm3, %v5170_v42, 0.0  ;;  %v2208_v59 = vmul.f32 1.442695, %v2195_v39  ;;  %v1992_v11 = vmul.f32 1.442695, %v1978_v8 }
 0x772   :  { %v2472_v28 = vpack.c.bf16 %v5173_v15, %v5168_v52  ;;  %3804 = vpow2.f32 %v1988_v16  ;;  %v3799_v47 = vpop.eup %3798  ;;  %v2438_v44 = vsel %vm468_vm3, %v5175_v0, 0.0  ;;  %v1990_v39 = vmul.f32 1.442695, %v1977_v45 }
 0x773   :  { %2442 = vadd.xlane.f32.xlu0 %v2441_v12  ;;  %3806 = vrcp.f32 %v1998_v13  ;;  %v1822_v35 = vmul.f32 %v3799_v47, %v5036_v56  ;;  %v1979_v12 = vsub.f32 %v5024_v61, %v5124_v4  ;;  %v2219_v47 = vpop.xlane.xlu2 %2218  ;;  %v2414_v61 = vsub.f32 %v5017_v20, %v5107_v23 }
 0x774   :  { %v2197_v4 = vsub.f32 %v5029_v21, %v5136_v24  ;;  %v2415_v24 = vsub.f32 %v5001_v14, %v5139_v29 }
 0x775   :  { %2439 = vadd.xlane.f32.xlu2 %v2438_v44  ;;  %v1994_v2 = vmul.f32 1.442695, %v1979_v12 }
 0x776   :  { %v3801_v50 = vpop.eup %3800 }
 0x777   :  { %v1823_v22 = vmul.f32 %v3801_v50, %v5067_v63  ;;  %v2001_v27 = vpop.xlane.xlu1 %2000  ;;  %v5189_v60 = vpop.eup %3802 }
 0x778   :  { %3808 = vrcp.f32 %v2001_v27  ;;  %v5191_v53 = vpop.eup %3804  ;;  %v2226_v13 = vsel %vm468_vm3, %v5189_v60, 0.0 }
 0x779   :  { %v1830_v38 = vpack.c.bf16 %v1823_v22, %v1822_v35  ;;  %3810 = vpow2.f32 %v2424_v18  ;;  %v3807_v56 = vpop.eup %3806  ;;  %v2008_v63 = vsel %vm468_vm3, %v5191_v53, 0.0  ;;  %v2428_v35 = vmul.f32 1.442695, %v2414_v61 }
 0x77a   :  { %3812 = vpow2.f32 %v2208_v59  ;;  %v2028_v55 = vmul.f32 %v3807_v56, %v5038_v51  ;;  %v2212_v22 = vmul.f32 1.442695, %v2197_v4  ;;  %v2430_v56 = vmul.f32 1.442695, %v2415_v24 }
 0x77b   :  { %3369 = vmatmul.msk.bf16.vlgmr.msrb.gmra.mxu1 %vm468_vm3, %v1830_v38  ;;  %2227 = vadd.xlane.f32.xlu0 %v2226_v13  ;;  %3814 = vpow2.f32 %v1992_v11 }
 0x77c   :  { %3816 = vpow2.f32 %v2426_v37 }
 0x77d   :  { %2009 = vadd.xlane.f32.xlu2 %v2008_v63  ;;  %3818 = vpow2.f32 %v1990_v39 }
 0x77e   :  { %v3809_v62 = vpop.eup %3808 }
 0x77f   :  { %v2029_v17 = vmul.f32 %v3809_v62, %v5072_v5  ;;  %v5206_v49 = vpop.eup %3810  ;;  %v2210_v5 = vmul.f32 1.442695, %v2196_v46  ;;  %v1798_v44 = vpop.xlane.xlu1 %1797 }
 0x780   :  { %v5208_v16 = vpop.eup %3812  ;;  %v2444_v10 = vsel %vm468_vm3, %v5206_v49, 0.0 }
 0x781   :  { %v2036_v40 = vpack.c.bf16 %v2029_v17, %v2028_v55  ;;  %v2229_v51 = vsel %vm468_vm3, %v5208_v16, 0.0  ;;  %v5219_v3 = vpop.eup %3814  ;;  %3820 = vpow2.f32 %v2210_v5 }
 0x782   :  { %v5221_v33 = vpop.eup %3816  ;;  %3822 = vpow2.f32 %v1994_v2  ;;  %v2014_v50 = vsel %vm468_vm3, %v5219_v3, 0.0 }
 0x783   :  { %3373 = vmatmul.msk.bf16.vlgmr.msra.gmra.mxu3 %vm468_vm3, %v2036_v40  ;;  %2445 = vadd.xlane.f32.xlu0 %v2444_v10  ;;  %v2447_v18 = vsel %vm468_vm3, %v5221_v33, 0.0  ;;  %v5231_v59 = vpop.eup %3818  ;;  %3824 = vrcp.f32 %v1798_v44 }
 0x784   :  { %v2011_v21 = vsel %vm468_vm3, %v5231_v59, 0.0 }
 0x785   :  { %2230 = vadd.xlane.f32.xlu2 %v2229_v51 }
 0x787   :  { %v5233_v20 = vpop.eup %3820 }
 0x788   :  { %v5237_v23 = vpop.eup %3822  ;;  %v2232_v38 = vsel %vm468_vm3, %v5233_v20, 0.0 }
 0x789   :  { %v3825_v8 = vpop.eup %3824  ;;  %v2017_v7 = vsel %vm468_vm3, %v5237_v23, 0.0 }
 0x78a   :  { %v1824_v62 = vmul.f32 %v3825_v8, %v5078_v34 }
 0x78b   :  { %2015 = vadd.xlane.f32.xlu0 %v2014_v50 }
 0x78d   :  { %2448 = vadd.xlane.f32.xlu2 %v2447_v18 }
 0x78f   :  { %v1801_v27 = vpop.xlane.xlu2 %1800 }
 0x790   :  { %3826 = vrcp.f32 %v1801_v27  ;;  %2012 = vadd.xlane.f32.xlu1 %v2011_v21 }
 0x791   :  { %3828 = vpow2.f32 %v2428_v35 }
 0x792   :  { %3830 = vpow2.f32 %v2212_v22 }
 0x793   :  { %3832 = vrcp.f32 %v2219_v47  ;;  %2233 = vadd.xlane.f32.xlu0 %v2232_v38 }
 0x794   :  { %3834 = vrcp.f32 %v5144_v30 }
 0x795   :  { %2018 = vadd.xlane.f32.xlu2 %v2017_v7  ;;  %3836 = vpow2.f32 %v2430_v56 }
 0x796   :  { %v3827_v13 = vpop.eup %3826 }
 0x797   :  { %v1804_v63 = vpop.xlane.xlu2 %1803  ;;  %v1825_v29 = vmul.f32 %v3827_v13, %v5086_v58  ;;  %v5248_v14 = vpop.eup %3828 }
 0x798   :  { %v5250_v11 = vpop.eup %3830  ;;  %v2450_v55 = vsel %vm468_vm3, %v5248_v14, 0.0  ;;  %3838 = vrcp.f32 %v1804_v63 }
 0x799   :  { %v1831_v37 = vpack.c.bf16 %v1825_v29, %v1824_v62  ;;  %v3833_v45 = vpop.eup %3832  ;;  %v2235_v30 = vsel %vm468_vm3, %v5250_v11, 0.0 }
 0x79a   :  { %v3835_v17 = vpop.eup %3834  ;;  %v2247_v34 = vmul.f32 %v3833_v45, %v5054_v57 }
 0x79b   :  { %3370 = vmatmul.msk.bf16.gmra.mxu1 %vm468_vm3, %v1831_v37  ;;  %2451 = vadd.xlane.f32.xlu0 %v2450_v55  ;;  %v2246_v58 = vmul.f32 %v3835_v17, %v5047_v26  ;;  %v5259_v46 = vpop.eup %3836 }
 0x79c   :  { %v2453_v10 = vsel %vm468_vm3, %v5259_v46, 0.0 }
 0x79d   :  { %2236 = vadd.xlane.f32.xlu2 %v2235_v30  ;;  %v2254_v39 = vpack.c.bf16 %v2247_v34, %v2246_v58 }
 0x79e   :  { %v3839_v51 = vpop.eup %3838 }
 0x79f   :  { %v2259_v40 = vpop.permute.xlu2 %2258  ;;  %v1826_v57 = vmul.f32 %v3839_v51, %v5091_v36 }
 0x7a0   :  { %2289 = vmatpush.bf16.msrb.mxu2 %v2259_v40  ;;  %v1807_v12 = vpop.xlane.xlu0 %1806 }
 0x7a1   :  { %3840 = vrcp.f32 %v1807_v12 }
 0x7a3   :  { %3377 = vmatmul.msk.bf16.vlgmr.msrb.gmra.mxu2 %vm468_vm3, %v2254_v39 }
 0x7a5   :  { %2454 = vadd.xlane.f32.xlu2 %v2453_v10 }
 0x7a7   :  { %v3841_v5 = vpop.eup %3840 }
 0x7a8   :  { %v1827_v26 = vmul.f32 %v3841_v5, %v5097_v1 }
 0x7aa   :  { %v1832_v2 = vpack.c.bf16 %v1827_v26, %v1826_v57 }
 0x7ac   :  { %3371 = vmatmul.msk.bf16.gmra.mxu1 %vm468_vm3, %v1832_v2 }
 0x7b0   :  { %v1810_v47 = vpop.xlane.xlu1 %1809 }
 0x7b3   :  { %v2479_v61 = vpop.permute.xlu0 %2478 }
 0x7b4   :  { %2506 = vmatpush.bf16.msra.mxu1 %v2479_v61 }
 0x7b8   :  { %v2222_v4 = vpop.xlane.xlu1 %2221 }
 0x7b9   :  { %3842 = vrcp.f32 %v2222_v4 }
 0x7bf   :  { %v3843_v50 = vpop.eup %3842 }
 0x7c0   :  { %v2225_v44 = vpop.xlane.xlu1 %2224  ;;  %v2248_v35 = vmul.f32 %v3843_v50, %v5118_v41 }
 0x7c1   :  { %3844 = vrcp.f32 %v2225_v44 }
 0x7c2   :  { %3846 = vrcp.f32 %v1810_v47 }
 0x7c7   :  { %v3845_v18 = vpop.eup %3844 }
 0x7c8   :  { %v2249_v22 = vmul.f32 %v3845_v18, %v5130_v54  ;;  %v3847_v21 = vpop.eup %3846 }
 0x7c9   :  { %v1828_v7 = vmul.f32 %v3847_v21, %v5109_v6 }
 0x7ca   :  { %v2255_v27 = vpack.c.bf16 %v2249_v22, %v2248_v35 }
 0x7cc   :  { %3378 = vmatmul.msk.bf16.gmra.mxu2 %vm468_vm3, %v2255_v27 }
 0x7d8   :  { %v1813_v36 = vpop.xlane.xlu2 %1812  ;;  %v2477_v1 = vpop.permute.xlu1 %2476 }
 0x7d9   :  { %3848 = vrcp.f32 %v1813_v36  ;;  %2507 = vmatpush.bf16.msra.mxu1 %v2477_v1 }
 0x7de   :  { %v2007_v38 = vpop.xlane.xlu0 %2006 }
 0x7df   :  { %v3849_v24 = vpop.eup %3848  ;;  %3850 = vrcp.f32 %v2007_v38 }
 0x7e0   :  { %v2004_v8 = vpop.xlane.xlu2 %2003  ;;  %v1829_v13 = vmul.f32 %v3849_v24, %v5146_v25 }
 0x7e1   :  { %3852 = vrcp.f32 %v2004_v8 }
 0x7e2   :  { %v1833_v41 = vpack.c.bf16 %v1829_v13, %v1828_v7 }
 0x7e4   :  { %3372 = vmatmul.msk.bf16.gmra.mxu1 %vm468_vm3, %v1833_v41 }
 0x7e5   :  { %v3851_v54 = vpop.eup %3850 }
 0x7e6   :  { %v2443_v63 = vpop.xlane.xlu0 %2442  ;;  %v2031_v37 = vmul.f32 %v3851_v54, %v5155_v43 }
 0x7e7   :  { %v3853_v56 = vpop.eup %3852 }
 0x7e8   :  { %v2440_v62 = vpop.xlane.xlu2 %2439  ;;  %v2030_v29 = vmul.f32 %v3853_v56, %v5157_v48 }
 0x7e9   :  { %3854 = vrcp.f32 %v2440_v62 }
 0x7ea   :  { %v2037_v45 = vpack.c.bf16 %v2031_v37, %v2030_v29  ;;  %3856 = vrcp.f32 %v2443_v63 }
 0x7ec   :  { %3374 = vmatmul.msk.bf16.gmra.mxu3 %vm468_vm3, %v2037_v45 }
 0x7ee   :  { %v2228_v55 = vpop.xlane.xlu0 %2227 }
 0x7ef   :  { %3858 = vrcp.f32 %v2228_v55  ;;  %v3855_v30 = vpop.eup %3854 }
 0x7f0   :  { %v2010_v17 = vpop.xlane.xlu2 %2009  ;;  %v3857_v48 = vpop.eup %3856  ;;  %v2466_v43 = vmul.f32 %v3855_v30, %v5175_v0 }
 0x7f1   :  { %v2467_v40 = vmul.f32 %v3857_v48, %v5170_v42 }
 0x7f3   :  { %v2473_v10 = vpack.c.bf16 %v2467_v40, %v2466_v43 }
 0x7f4   :  { %3381 = vmatmul.msk.bf16.vlgmr.msra.gmra.mxu1 %vm468_vm3, %v2472_v28 }
 0x7f5   :  { %v3859_v34 = vpop.eup %3858 }
 0x7f6   :  { %v2446_v6 = vpop.xlane.xlu0 %2445  ;;  %v2250_v52 = vmul.f32 %v3859_v34, %v5189_v60 }
 0x7f8   :  { %v2231_v25 = vpop.xlane.xlu2 %2230 }
 0x7f9   :  { %3860 = vrcp.f32 %v2231_v25 }
 0x7fa   :  { %3862 = vrcp.f32 %v2010_v17 }
 0x7fe   :  { %v2016_v39 = vpop.xlane.xlu0 %2015 }
 0x7ff   :  { %v3861_v58 = vpop.eup %3860 }
 0x800   :  { %v2449_v12 = vpop.xlane.xlu2 %2448  ;;  %v2251_v15 = vmul.f32 %v3861_v58, %v5208_v16  ;;  %v3863_v5 = vpop.eup %3862 }
 0x801   :  { %3864 = vrcp.f32 %v2449_v12  ;;  %v2032_v16 = vmul.f32 %v3863_v5, %v5191_v53  ;;  %v3510_v12 = vld [vmem:[%s5529_s9 + $0x30] sm:$0xff] }
 0x802   :  { %v2256_v28 = vpack.c.bf16 %v2251_v15, %v2250_v52 }
 0x803   :  { %v2013_v51 = vpop.xlane.xlu1 %2012 }
 0x804   :  { %3379 = vmatmul.msk.bf16.gmra.mxu2 %vm468_vm3, %v2256_v28  ;;  %3382 = vmatmul.msk.bf16.gmra.mxu1 %vm468_vm3, %v2473_v10  ;;  %3866 = vrcp.f32 %v2013_v51 }
 0x805   :  { %3868 = vrcp.f32 %v2446_v6 }
 0x806   :  { %v2073_v0 = vpop.f32.mrf.mxu3  ;;  %v2234_v60 = vpop.xlane.xlu0 %2233 }
 0x807   :  { %2537 = vrot.lane.b32.xlu1 %v2073_v0, %s3931_s5  ;;  %v3865_v57 = vpop.eup %3864  ;;  %3870 = vrcp.f32 %v2234_v60  ;;  %v3509_v60 = vld [vmem:[%s5529_s9 + $0x28] sm:$0xff] }
 0x808   :  { %v2019_v42 = vpop.xlane.xlu2 %2018  ;;  %v2469_v61 = vmul.f32 %v3865_v57, %v5221_v33 }
 0x809   :  { %3872 = vrcp.f32 %v2019_v42 }
 0x80a   :  { %v3867_v26 = vpop.eup %3866 }
 0x80b   :  { %v2033_v2 = vmul.f32 %v3867_v26, %v5231_v59  ;;  %v3869_v47 = vpop.eup %3868  ;;  %v3508_v26 = vld [vmem:[%s5529_s9 + $0x20] sm:$0xff] }
 0x80c   :  { %v2468_v50 = vmul.f32 %v3869_v47, %v5206_v49 }
 0x80d   :  { %v2038_v44 = vpack.c.bf16 %v2033_v2, %v2032_v16  ;;  %v3871_v59 = vpop.eup %3870  ;;  %v3507_v16 = vld [vmem:[%s5529_s9 + $0x18] sm:$0xff] }
 0x80e   :  { %v2075_v4 = vpop.f32.mrf.mxu3  ;;  %v2474_v35 = vpack.c.bf16 %v2469_v61, %v2468_v50  ;;  %v2452_v53 = vpop.xlane.xlu0 %2451  ;;  %v2252_v27 = vmul.f32 %v3871_v59, %v5233_v20  ;;  %v3506_v61 = vld [vmem:[%s5529_s9 + $0x10] sm:$0xff] }
 0x80f   :  { %2539 = vrot.lane.b32.xlu0 %v2075_v4, %s3931_s5  ;;  %3375 = vmatmul.msk.bf16.gmra.mxu3 %vm468_vm3, %v2038_v44  ;;  %v3873_v22 = vpop.eup %3872  ;;  %v3505_v4 = vld [vmem:[%s5529_s9 + $0x8] sm:$0xff] }
 0x810   :  { %v2237_v18 = vpop.xlane.xlu2 %2236  ;;  %v2035_v24 = vmul.f32 %v3873_v22, %v5237_v23  ;;  %v5304_v23 = vpop.f32.mrf.mxu1 }
 0x811   :  { %3874 = vrcp.f32 %v2237_v18 }
 0x812   :  { %3876 = vrcp.f32 %v2016_v39  ;;  %v3511_v39 = vld [vmem:[%s5529_s9 + $0x38] sm:$0xff] }
 0x813   :  { %3878 = vrcp.f32 %v2452_v53  ;;  %2773 = vmatpush.bf16.msra.mxu0 %v3511_v39  ;;  %v3504_v53 = vld [vmem:[%s5529_s9] sm:$0xff] }
 0x814   :  { %3383 = vmatmul.msk.bf16.gmra.mxu1 %vm468_vm3, %v2474_v35 }
 0x817   :  { %v3875_v33 = vpop.eup %3874  ;;  %2774 = vmatpush.bf16.msra.mxu0 %v3510_v12 }
 0x818   :  { %v2253_v36 = vmul.f32 %v3875_v33, %v5250_v11  ;;  %v2455_v1 = vpop.xlane.xlu2 %2454  ;;  %v3877_v49 = vpop.eup %3876 }
 0x819   :  { %3880 = vrcp.f32 %v2455_v1  ;;  %v2034_v38 = vmul.f32 %v3877_v49, %v5219_v3  ;;  %v3879_v8 = vpop.eup %3878  ;;  %v5307_v3 = vpop.f32.mrf.mxu1 }
 0x81a   :  { %v2257_v21 = vpack.c.bf16 %v2253_v36, %v2252_v27  ;;  %v2470_v41 = vmul.f32 %v3879_v8, %v5248_v14 }
 0x81b   :  { %v2039_v7 = vpack.c.bf16 %v2035_v24, %v2034_v38  ;;  %2775 = vmatpush.bf16.msra.mxu0 %v3509_v60 }
 0x81c   :  { %3380 = vmatmul.msk.bf16.gmra.mxu2 %vm468_vm3, %v2257_v21 }
 0x81f   :  { %v3881_v13 = vpop.eup %3880  ;;  %3376 = vmatmul.msk.bf16.gmra.mxu3 %vm468_vm3, %v2039_v7  ;;  %2776 = vmatpush.bf16.msra.mxu0 %v3508_v26 }
 0x820   :  { %v2471_v54 = vmul.f32 %v3881_v13, %v5259_v46 }
 0x821   :  { %v5309_v63 = vpop.f32.mrf.mxu1 }
 0x822   :  { %v2475_v20 = vpack.c.bf16 %v2471_v54, %v2470_v41 }
 0x823   :  { %2777 = vmatpush.bf16.msra.mxu0 %v3507_v16 }
 0x824   :  { %3384 = vmatmul.msk.bf16.gmra.mxu1 %vm468_vm3, %v2475_v20 }
 0x826   :  { %v2291_v11 = vpop.f32.mrf.mxu2 }
 0x827   :  { %2569 = vrot.lane.b32.xlu2 %v2291_v11, %s3932_s15  ;;  %2778 = vmatpush.bf16.msra.mxu0 %v3506_v61 }
 0x829   :  { %v5311_v14 = vpop.f32.mrf.mxu1 }
 0x82b   :  { %2779 = vmatpush.bf16.msra.mxu0 %v3505_v4 }
 0x82e   :  { %v2293_v56 = vpop.f32.mrf.mxu2 }
 0x82f   :  { %2571 = vrot.lane.b32.xlu0 %v2293_v56, %s3932_s15  ;;  %2780 = vmatpush.bf16.msra.mxu0 %v3504_v53 }
 0x831   :  { %v5313_v46 = vpop.f32.mrf.mxu1 }
 0x839   :  { %v5315_v62 = vpop.f32.mrf.mxu1 }
 0x84f   :  { %v2296_v45 = vpop.f32.mrf.mxu2 }
 0x857   :  { %v2298_v6 = vpop.f32.mrf.mxu2 }
 0x861   :  { %v5317_v29 = vpop.f32.mrf.mxu1 }
 0x869   :  { %v5319_v37 = vpop.f32.mrf.mxu1 }
 0x86f   :  { %v2078_v55 = vpop.f32.mrf.mxu3 }
 0x870   :  { %2541 = vrot.lane.b32.xlu0 %v2078_v55, %s3931_s5 }
 0x871   :  { %v2509_v17 = vpop.f32.mrf.mxu1 }
 0x872   :  { %2601 = vrot.lane.b32.xlu1 %v2509_v17, %s3930_s1 }
 0x877   :  { %v2080_v25 = vpop.f32.mrf.mxu3 }
 0x878   :  { %2575 = vrot.lane.b32.xlu0 %v2298_v6, %s3932_s15 }
 0x879   :  { %v2511_v30 = vpop.f32.mrf.mxu1  ;;  %v2538_v22 = vpop.permute.xlu1 %2537 }
 0x87a   :  { %2543 = vrot.lane.b32.xlu1 %v2080_v25, %s3931_s5  ;;  %2603 = vrot.lane.b32.xlu2 %v2511_v30, %s3930_s1  ;;  %v2625_v36 = vsel %vm206_vm0, %v5304_v23, %v2538_v22 }
 0x881   :  { %v2514_v48 = vpop.f32.mrf.mxu1  ;;  %v2540_v2 = vpop.permute.xlu0 %2539 }
 0x882   :  { %2573 = vrot.lane.b32.xlu2 %v2296_v45, %s3932_s15  ;;  %2605 = vrot.lane.b32.xlu1 %v2514_v48, %s3930_s1  ;;  %v2570_v47 = vpop.permute.xlu2 %2569  ;;  %v2626_v18 = vsel %vm206_vm0, %v5307_v3, %v2540_v2 }
 0x883   :  { %v2633_v49 = vsel %vm468_vm3, %v2625_v36, %v2570_v47  ;;  %v5558_v47 = vld [vmem:[#allocation11_spill] sm:$0xff]  ;;  %v2836_v36 = vld [vmem:[%s5530_s11] sm:$0xf] }
 0x887   :  { %v2301_v43 = vpop.f32.mrf.mxu2 }
 0x889   :  { %v2516_v34 = vpop.f32.mrf.mxu1 }
 0x88a   :  { %2607 = vrot.lane.b32.xlu2 %v2516_v34, %s3930_s1 }
 0x88f   :  { %v2303_v52 = vpop.f32.mrf.mxu2 }
 0x891   :  { %v2519_v58 = vpop.f32.mrf.mxu1 }
 0x892   :  { %v2083_v40 = vpop.f32.mrf.mxu3  ;;  %2577 = vrot.lane.b32.xlu2 %v2301_v43, %s3932_s15 }
 0x893   :  { %2545 = vrot.lane.b32.xlu0 %v2083_v40, %s3931_s5 }
 0x899   :  { %v2521_v15 = vpop.f32.mrf.mxu1 }
 0x89a   :  { %v2085_v28 = vpop.f32.mrf.mxu3  ;;  %2611 = vrot.lane.b32.xlu2 %v2521_v15, %s3930_s1 }
 0x89b   :  { %2579 = vrot.lane.b32.xlu0 %v2303_v52, %s3932_s15  ;;  %2547 = vrot.lane.b32.xlu1 %v2085_v28, %s3931_s5 }
 0x89f   :  { %v2306_v10 = vpop.f32.mrf.mxu2 }
 0x8a1   :  { %v2524_v51 = vpop.f32.mrf.mxu1  ;;  %v2572_v44 = vpop.permute.xlu0 %2571 }
 0x8a2   :  { %v2088_v0 = vpop.f32.mrf.mxu3  ;;  %2581 = vrot.lane.b32.xlu2 %v2306_v10, %s3932_s15  ;;  %v2634_v35 = vsel %vm468_vm3, %v2626_v18, %v2572_v44 }
 0x8a3   :  { %2549 = vrot.lane.b32.xlu0 %v2088_v0, %s3931_s5  ;;  %2609 = vrot.lane.b32.xlu1 %v2519_v58, %s3930_s1 }
 0x8a7   :  { %v2308_v5 = vpop.f32.mrf.mxu2 }
 0x8a9   :  { %v2526_v42 = vpop.f32.mrf.mxu1 }
 0x8aa   :  { %v2090_v57 = vpop.f32.mrf.mxu3  ;;  %2615 = vrot.lane.b32.xlu2 %v2526_v42, %s3930_s1 }
 0x8ab   :  { %2583 = vrot.lane.b32.xlu0 %v2308_v5, %s3932_s15  ;;  %2551 = vrot.lane.b32.xlu1 %v2090_v57, %s3931_s5 }
 0x8b3   :  { %2613 = vrot.lane.b32.xlu1 %v2524_v51, %s3930_s1 }
 0x8d4   :  { %v2604_v50 = vpop.permute.xlu2 %2603 }
 0x8d5   :  { %v2642_v59 = vsel %vm1368_vm6, %v2634_v35, %v2604_v50 }
 0x8d6   :  { %v2650_v33 = vadd.f32 %v2642_v59, %v4712_v32 }
 0x8d8   :  { %v2666_v27 = vmin.f32 %v2650_v33, 0.0  ;;  %vm2658_vm8 = vcmp.gt.f32.partialorder %v2650_v33, 0.0 }
 0x8da   :  { %v2675_v21 = vmul.f32 1.442695, %v2666_v27 }
 0x8dc   :  { %v2574_v24 = vpop.permute.xlu2 %2573  ;;  %3882 = vpow2.f32 %v2675_v21 }
 0x8e2   :  { %v2542_v1 = vpop.permute.xlu0 %2541  ;;  %v3883_v11 = vpop.eup %3882 }
 0x8e3   :  { %v3386_v55 = vadd.f32 -1.0, %v3883_v11 }
 0x8e4   :  { %v2602_v38 = vpop.permute.xlu1 %2601  ;;  %v2608_v23 = vpop.permute.xlu2 %2607 }
 0x8e5   :  { %v2641_v8 = vsel %vm1368_vm6, %v2633_v49, %v2602_v38  ;;  %v2698_v30 = vsel %vm2658_vm8, %v2650_v33, %v3386_v55  ;;  %v5559_v33 = vld [vmem:[#allocation10_spill] sm:$0xff] }
 0x8e6   :  { %v2649_v7 = vadd.f32 %v2641_v8, %v4710_v9  ;;  %v2627_v9 = vsel %vm206_vm0, %v5309_v63, %v2542_v1  ;;  %v2839_v1 = vsel %vm2837_vm12, %v2836_v36, 0 }
 0x8e7   :  { %2848 = vmatpush.bf16.msra.mxu2 %v2839_v1 }
 0x8e8   :  { %v2665_v13 = vmin.f32 %v2649_v7, 0.0  ;;  %vm2657_vm9 = vcmp.gt.f32.partialorder %v2649_v7, 0.0 }
 0x8ea   :  { %v2673_v41 = vmul.f32 1.442695, %v2665_v13  ;;  %v2576_v32 = vpop.permute.xlu0 %2575 }
 0x8ec   :  { %3884 = vpow2.f32 %v2673_v41  ;;  %v2544_v54 = vpop.permute.xlu1 %2543  ;;  %v2578_v52 = vpop.permute.xlu2 %2577  ;;  %v5560_v41 = vld [vmem:[#allocation13_spill] sm:$0xff] }
 0x8ed   :  { %v2628_v20 = vsel %vm206_vm0, %v5311_v14, %v2544_v54  ;;  %v2635_v14 = vsel %vm468_vm3, %v2627_v9, %v2574_v24 }
 0x8ee   :  { %v2636_v56 = vsel %vm468_vm3, %v2628_v20, %v2576_v32 }
 0x8ef   :  { %v2644_v3 = vsel %vm1368_vm6, %v2636_v56, %v2608_v23 }
 0x8f0   :  { %v2652_v45 = vadd.f32 %v2644_v3, %v4720_v31 }
 0x8f2   :  { %v3885_v17 = vpop.eup %3884  ;;  %v2668_v6 = vmin.f32 %v2652_v45, 0.0  ;;  %vm2660_vm11 = vcmp.gt.f32.partialorder %v2652_v45, 0.0 }
 0x8f3   :  { %v3385_v25 = vadd.f32 -1.0, %v3885_v17 }
 0x8f4   :  { %v2606_v34 = vpop.permute.xlu1 %2605  ;;  %v2679_v43 = vmul.f32 1.442695, %v2668_v6  ;;  %v5561_v6 = vld [vmem:[#allocation12_spill] sm:$0xff] }
 0x8f5   :  { %v2697_v48 = vsel %vm2657_vm9, %v2649_v7, %v3385_v25  ;;  %v2643_v40 = vsel %vm1368_vm6, %v2635_v14, %v2606_v34 }
 0x8f6   :  { %v5383_v58 = vpack.c.bf16 %v2698_v30, %v2697_v48  ;;  %v2651_v31 = vadd.f32 %v2643_v40, %v4718_v19  ;;  %3886 = vpow2.f32 %v2679_v43  ;;  %v2612_v19 = vpop.permute.xlu2 %2611 }
 0x8f8   :  { %2781 = vmatmul.bf16.vlgmr.msra.gmra.mxu0 %v5383_v58  ;;  %v2667_v39 = vmin.f32 %v2651_v31, 0.0  ;;  %vm2659_vm10 = vcmp.gt.f32.partialorder %v2651_v31, 0.0 }
 0x8fa   :  { %v2677_v63 = vmul.f32 1.442695, %v2667_v39 }
 0x8fc   :  { %3888 = vpow2.f32 %v2677_v63  ;;  %v3887_v12 = vpop.eup %3886 }
 0x8fd   :  { %v3388_v15 = vadd.f32 -1.0, %v3887_v12 }
 0x8fe   :  { %v2582_v50 = vpop.permute.xlu2 %2581 }
 0x8ff   :  { %v2700_v42 = vsel %vm2660_vm11, %v2652_v45, %v3388_v15 }
 0x902   :  { %v3889_v28 = vpop.eup %3888 }
 0x903   :  { %v3387_v10 = vadd.f32 -1.0, %v3889_v28 }
 0x905   :  { %v2546_v51 = vpop.permute.xlu0 %2545  ;;  %v2699_v0 = vsel %vm2659_vm10, %v2651_v31, %v3387_v10 }
 0x906   :  { %v5388_v5 = vpack.c.bf16 %v2700_v42, %v2699_v0  ;;  %v2629_v4 = vsel %vm206_vm0, %v5313_v46, %v2546_v51  ;;  %v2616_v8 = vpop.permute.xlu2 %2615 }
 0x907   :  { %v2637_v35 = vsel %vm468_vm3, %v2629_v4, %v2578_v52 }
 0x908   :  { %2786 = vmatmul.bf16.gmra.mxu0 %v5388_v5 }
 0x90d   :  { %v2580_v57 = vpop.permute.xlu0 %2579  ;;  %v2548_v60 = vpop.permute.xlu1 %2547 }
 0x90e   :  { %v2630_v26 = vsel %vm206_vm0, %v5315_v62, %v2548_v60 }
 0x90f   :  { %v2638_v16 = vsel %vm468_vm3, %v2630_v26, %v2580_v57 }
 0x910   :  { %v2646_v2 = vsel %vm1368_vm6, %v2638_v16, %v2612_v19 }
 0x911   :  { %v2654_v61 = vadd.f32 %v2646_v2, %v5558_v47 }
 0x913   :  { %v2670_v44 = vmin.f32 %v2654_v61, 0.0  ;;  %vm2662_vm14 = vcmp.gt.f32.partialorder %v2654_v61, 0.0 }
 0x915   :  { %v2550_v18 = vpop.permute.xlu0 %2549  ;;  %v2610_v53 = vpop.permute.xlu1 %2609  ;;  %v2683_v59 = vmul.f32 1.442695, %v2670_v44  ;;  %v3518_v44 = vld [vmem:[%s5531_s12 + $0x30] sm:$0xff] }
 0x916   :  { %v2645_v22 = vsel %vm1368_vm6, %v2637_v35, %v2610_v53  ;;  %v2631_v32 = vsel %vm206_vm0, %v5317_v29, %v2550_v18  ;;  %v3517_v18 = vld [vmem:[%s5531_s12 + $0x28] sm:$0xff]  ;;  %v3516_v35 = vld [vmem:[%s5531_s12 + $0x20] sm:$0xff]  ;;  %v3515_v53 = vld [vmem:[%s5531_s12 + $0x18] sm:$0xff] }
 0x917   :  { %v2653_v62 = vadd.f32 %v2645_v22, %v5559_v33  ;;  %3890 = vpow2.f32 %v2683_v59  ;;  %v2639_v3 = vsel %vm468_vm3, %v2631_v32, %v2582_v50  ;;  %v2806_v50 = vld [vmem:[%s5532_s10] sm:$0x1]  ;;  %v3514_v59 = vld [vmem:[%s5531_s12 + $0x10] sm:$0xff]  ;;  %v3513_v22 = vld [vmem:[%s5531_s12 + $0x8] sm:$0xff] }
 0x918   :  { %v3512_v33 = vld [vmem:[%s5531_s12] sm:$0xff] }
 0x919   :  { %v2669_v27 = vmin.f32 %v2653_v62, 0.0  ;;  %vm2661_vm13 = vcmp.gt.f32.partialorder %v2653_v62, 0.0 }
 0x91b   :  { %v2681_v46 = vmul.f32 1.442695, %v2669_v27 }
 0x91d   :  { %3892 = vpow2.f32 %v2681_v46  ;;  %v2584_v49 = vpop.permute.xlu0 %2583  ;;  %v2552_v21 = vpop.permute.xlu1 %2551 }
 0x91e   :  { %v2632_v24 = vsel %vm206_vm0, %v5319_v37, %v2552_v21  ;;  %v3891_v38 = vpop.eup %3890 }
 0x91f   :  { %v2640_v7 = vsel %vm468_vm3, %v2632_v24, %v2584_v49  ;;  %v3390_v20 = vadd.f32 -1.0, %v3891_v38 }
 0x920   :  { %v2648_v13 = vsel %vm1368_vm6, %v2640_v7, %v2616_v8 }
 0x921   :  { %v2656_v54 = vadd.f32 %v2648_v13, %v5560_v41  ;;  %v2702_v9 = vsel %vm2662_vm14, %v2654_v61, %v3390_v20  ;;  %v3519_v61 = vld [vmem:[%s5531_s12 + $0x38] sm:$0xff] }
 0x923   :  { %v3893_v11 = vpop.eup %3892  ;;  %v2672_v23 = vmin.f32 %v2656_v54, 0.0  ;;  %vm2664_vm15 = vcmp.gt.f32.partialorder %v2656_v54, 0.0 }
 0x924   :  { %v3389_v56 = vadd.f32 -1.0, %v3893_v11 }
 0x925   :  { %v2614_v45 = vpop.permute.xlu1 %2613  ;;  %v2687_v37 = vmul.f32 1.442695, %v2672_v23 }
 0x926   :  { %v2647_v55 = vsel %vm1368_vm6, %v2639_v3, %v2614_v45  ;;  %v2701_v17 = vsel %vm2661_vm13, %v2653_v62, %v3389_v56  ;;  %vm2807_vm6 = vcmask 64512   ;;  %v5563_v45 = vld [vmem:[#allocation2_spill] sm:$0xff] }
 0x927   :  { %v2655_v25 = vadd.f32 %v2647_v55, %v5561_v6  ;;  %v5414_v30 = vpack.c.bf16 %v2702_v9, %v2701_v17  ;;  %3894 = vpow2.f32 %v2687_v37 }
 0x929   :  { %v2671_v48 = vmin.f32 %v2655_v25, 0.0  ;;  %2791 = vmatmul.bf16.gmra.mxu0 %v5414_v30  ;;  %vm2663_vm0 = vcmp.gt.f32.partialorder %v2655_v25, 0.0 }
 0x92b   :  { %v2685_v29 = vmul.f32 1.442695, %v2671_v48 }
 0x92d   :  { %3896 = vpow2.f32 %v2685_v29  ;;  %v3895_v14 = vpop.eup %3894 }
 0x92e   :  { %v3392_v34 = vadd.f32 -1.0, %v3895_v14 }
 0x930   :  { %v2704_v39 = vsel %vm2664_vm15, %v2656_v54, %v3392_v34  ;;  %v5562_v54 = vld [vmem:[#allocation4_spill] sm:$0xff] }
 0x933   :  { %v3897_v43 = vpop.eup %3896 }
 0x934   :  { %v3391_v40 = vadd.f32 -1.0, %v3897_v43 }
 0x936   :  { %v2703_v31 = vsel %vm2663_vm0, %v2655_v25, %v3391_v40 }
 0x937   :  { %v2708_v63 = vpack.c.bf16 %v2704_v39, %v2703_v31 }
 0x939   :  { %2796 = vmatmul.bf16.gmra.mxu0 %v2708_v63 }
 0x975   :  { %v2782_v12 = vpop.f32.mrf.mxu0 }
 0x97d   :  { %v2784_v52 = vpop.f32.mrf.mxu0 }
 0x97e   :  { %v2802_v15 = vpack.c.bf16 %v2784_v52, %v2782_v12  ;;  %v5565_v12 = vld [vmem:[#allocation5_spill] sm:$0xff] }
 0x980   :  { %3426 = vmatmul.msk.bf16.vlgmr.msra.gmra.mxu2 %vm2807_vm6, %v2802_v15  ;;  %v2812_v4 = vsel %vm2807_vm6, %v2802_v15, 0 }
 0x985   :  { %v2787_v28 = vpop.f32.mrf.mxu0 }
 0x98d   :  { %v2789_v10 = vpop.f32.mrf.mxu0 }
 0x98e   :  { %v2803_v51 = vpack.c.bf16 %v2789_v10, %v2787_v28  ;;  %v5566_v28 = vld [vmem:[#allocation6_spill] sm:$0xff] }
 0x990   :  { %3427 = vmatmul.msk.bf16.gmra.mxu2 %vm2807_vm6, %v2803_v51  ;;  %v2815_v47 = vsel %vm2807_vm6, %v2803_v51, 0 }
 0x9a6   :  { %v2792_v0 = vpop.f32.mrf.mxu0 }
 0x9ae   :  { %v2794_v42 = vpop.f32.mrf.mxu0 }
 0x9af   :  { %v2804_v19 = vpack.c.bf16 %v2794_v42, %v2792_v0 }
 0x9b1   :  { %3428 = vmatmul.msk.bf16.gmra.mxu2 %vm2807_vm6, %v2804_v19  ;;  %v2818_v2 = vsel %vm2807_vm6, %v2804_v19, 0 }
 0x9b6   :  { %v2797_v57 = vpop.f32.mrf.mxu0 }
 0x9be   :  { %v2799_v60 = vpop.f32.mrf.mxu0 }
 0x9bf   :  { %v2805_v26 = vpack.c.bf16 %v2799_v60, %v2797_v57 }
 0x9c1   :  { %3429 = vmatmul.msk.bf16.gmra.mxu2 %vm2807_vm6, %v2805_v26  ;;  %3152 = vmatpush.bf16.msrb.mxu1 %v2805_v26  ;;  %v2821_v16 = vsel %vm2807_vm6, %v2805_v26, 0  ;;  %v5567_v26 = vld [vmem:[#allocation8_spill] sm:$0xff] }
 0x9c2   :  { %2827 = vmatpush.bf16.xpose.msrb.mxu3 %v2821_v16 }
 0x9c5   :  { %3153 = vmatpush.bf16.msrb.mxu1 %v2804_v19 }
 0x9c9   :  { %3154 = vmatpush.bf16.msrb.mxu1 %v2803_v51 }
 0x9ca   :  { %2828 = vmatpush.bf16.xpose.msrb.mxu3 %v2818_v2 }
 0x9cd   :  { %3155 = vmatpush.bf16.msrb.mxu1 %v2802_v15 }
 0x9d2   :  { %2829 = vmatpush.bf16.xpose.msrb.mxu3 %v2815_v47 }
 0x9da   :  { %2830 = vmatpush.bf16.xpose.msrb.mxu3 %v2812_v4 }
 0x9e1   :  { %3425 = vmatmul.msk.bf16.vlgmr.msrb.gmra.mxu3 %vm2807_vm6, %v2806_v50  ;;  %v5568_v50 = vld [vmem:[#allocation7_spill] sm:$0xff] }
 0x9e2   :  { %3107 = vmatpush.bf16.msra.mxu3 %v3519_v61 }
 0x9e6   :  { %3108 = vmatpush.bf16.msra.mxu3 %v3518_v44 }
 0x9ea   :  { %3109 = vmatpush.bf16.msra.mxu3 %v3517_v18 }
 0x9ee   :  { %3110 = vmatpush.bf16.msra.mxu3 %v3516_v35 }
 0x9f2   :  { %3111 = vmatpush.bf16.msra.mxu3 %v3515_v53 }
 0x9f6   :  { %3112 = vmatpush.bf16.msra.mxu3 %v3514_v59 }
 0x9fa   :  { %3113 = vmatpush.bf16.msra.mxu3 %v3513_v22 }
 0x9fe   :  { %3114 = vmatpush.bf16.msra.mxu3 %v3512_v33 }
 0xa01   :  { %3115 = vmatmul.bf16.vlgmr.msra.gmra.mxu3 %v5383_v58 }
 0xa03   :  { %v2850_v62 = vpop.f32.mrf.mxu2 }
 0xa04   :  { %2872 = vperm.xlu0 %3607, %v2850_v62   ;;  %v5569_v62 = vld [vmem:[#allocation9_spill] sm:$0xff] }
 0xa0b   :  { %v2852_v27 = vpop.f32.mrf.mxu2 }
 0xa0c   :  { %2877 = vperm.xlu1 %3608, %v2852_v27  }
 0xa11   :  { %3120 = vmatmul.bf16.gmra.mxu3 %v5388_v5 }
 0xa13   :  { %v2855_v36 = vpop.f32.mrf.mxu2 }
 0xa14   :  { %2882 = vperm.xlu2 %3609, %v2855_v36  }
 0xa1b   :  { %v2857_v1 = vpop.f32.mrf.mxu2 }
 0xa1c   :  { %2887 = vperm.xlu1 %3608, %v2857_v1  }
 0xa21   :  { %3125 = vmatmul.bf16.gmra.mxu3 %v5414_v30  ;;  %v5564_v30 = vld [vmem:[#allocation3_spill] sm:$0xff] }
 0xa31   :  { %3130 = vmatmul.bf16.gmra.mxu3 %v2708_v63 }
 0xa34   :  { %v2860_v46 = vpop.f32.mrf.mxu2 }
 0xa35   :  { %2892 = vperm.xlu2 %3609, %v2860_v46  }
 0xa3c   :  { %v2862_v49 = vpop.f32.mrf.mxu2 }
 0xa3d   :  { %2897 = vperm.xlu0 %3607, %v2862_v49  }
 0xa44   :  { %v2865_v21 = vpop.f32.mrf.mxu2 }
 0xa45   :  { %2902 = vperm.xlu0 %3607, %v2865_v21  }
 0xa4c   :  { %v2867_v58 = vpop.f32.mrf.mxu2 }
 0xa4d   :  { %2907 = vperm.xlu0 %3607, %v2867_v58  }
 0xa64   :  { %v2832_v24 = vpop.f32.mrf.mxu3 }
 0xa65   :  { %v2910_v38 = vperm.slane %v2832_v24, 0 }
 0xa6c   :  { %v2834_v5 = vpop.f32.mrf.mxu3 }
 0xa6e   :  { %v2883_v8 = vpop.permute.xlu2 %2882 }
 0xa6f   :  { %v2913_v7 = vadd.f32 %v2910_v38, %v2883_v8 }
 0xa71   :  { %vm2921_vm1 = vcmp.gt.f32.partialorder %v2913_v7, 0.0  ;;  %v2929_v13 = vmul.f32 0.2, %v2913_v7 }
 0xa73   :  { %v2937_v41 = vsel %vm2921_vm1, %v2913_v7, %v2929_v13 }
 0xa74   :  { %v2945_v32 = vadd.f32 %v5562_v54, %v2937_v41 }
 0xa76   :  { %v2873_v20 = vpop.permute.xlu0 %2872  ;;  %v2957_v23 = vsel %vm468_vm3, %v2945_v32, -inf }
 0xa77   :  { %v2911_v11 = vadd.f32 %v2910_v38, %v2873_v20  ;;  %2958 = vmax.xlane.f32.xlu0 %v2957_v23 }
 0xa79   :  { %vm2919_vm2 = vcmp.gt.f32.partialorder %v2911_v11, 0.0  ;;  %v2927_v56 = vmul.f32 0.2, %v2911_v11 }
 0xa7b   :  { %v2935_v3 = vsel %vm2919_vm2, %v2911_v11, %v2927_v56 }
 0xa7c   :  { %v2943_v37 = vadd.f32 %v5563_v45, %v2935_v3 }
 0xa7e   :  { %v2878_v55 = vpop.permute.xlu1 %2877  ;;  %v2951_v17 = vsel %vm468_vm3, %v2943_v37, -inf }
 0xa7f   :  { %v2912_v9 = vadd.f32 %v2910_v38, %v2878_v55  ;;  %2952 = vmax.xlane.f32.xlu1 %v2951_v17 }
 0xa81   :  { %vm2920_vm4 = vcmp.gt.f32.partialorder %v2912_v9, 0.0  ;;  %v2928_v6 = vmul.f32 0.2, %v2912_v9 }
 0xa83   :  { %v2936_v25 = vsel %vm2920_vm4, %v2912_v9, %v2928_v6 }
 0xa84   :  { %v2944_v48 = vadd.f32 %v5564_v30, %v2936_v25 }
 0xa86   :  { %v2954_v29 = vsel %vm468_vm3, %v2944_v48, -inf }
 0xa87   :  { %2955 = vmax.xlane.f32.xlu2 %v2954_v29 }
 0xa8e   :  { %v2888_v14 = vpop.permute.xlu1 %2887 }
 0xa8f   :  { %v2914_v34 = vadd.f32 %v2910_v38, %v2888_v14  ;;  %v2893_v43 = vpop.permute.xlu2 %2892 }
 0xa90   :  { %v2915_v40 = vadd.f32 %v2910_v38, %v2893_v43 }
 0xa91   :  { %vm2922_vm5 = vcmp.gt.f32.partialorder %v2914_v34, 0.0  ;;  %v2930_v31 = vmul.f32 0.2, %v2914_v34 }
 0xa92   :  { %vm2923_vm7 = vcmp.gt.f32.partialorder %v2915_v40, 0.0  ;;  %v2931_v39 = vmul.f32 0.2, %v2915_v40 }
 0xa93   :  { %v2938_v63 = vsel %vm2922_vm5, %v2914_v34, %v2930_v31 }
 0xa94   :  { %v2946_v52 = vadd.f32 %v5565_v12, %v2938_v63  ;;  %v2939_v15 = vsel %vm2923_vm7, %v2915_v40, %v2931_v39 }
 0xa95   :  { %v2947_v10 = vadd.f32 %v5566_v28, %v2939_v15 }
 0xa96   :  { %v2960_v51 = vsel %vm468_vm3, %v2946_v52, -inf }
 0xa97   :  { %2961 = vmax.xlane.f32.xlu1 %v2960_v51  ;;  %v2963_v0 = vsel %vm468_vm3, %v2947_v10, -inf }
 0xa98   :  { %2964 = vmax.xlane.f32.xlu2 %v2963_v0 }
 0xaaf   :  { %v2898_v42 = vpop.permute.xlu0 %2897 }
 0xab0   :  { %v2916_v19 = vadd.f32 %v2910_v38, %v2898_v42 }
 0xab2   :  { %vm2924_vm8 = vcmp.gt.f32.partialorder %v2916_v19, 0.0  ;;  %v2932_v57 = vmul.f32 0.2, %v2916_v19 }
 0xab4   :  { %v2940_v60 = vsel %vm2924_vm8, %v2916_v19, %v2932_v57 }
 0xab5   :  { %v2948_v16 = vadd.f32 %v5567_v26, %v2940_v60 }
 0xab7   :  { %v2903_v2 = vpop.permute.xlu0 %2902  ;;  %v2966_v47 = vsel %vm468_vm3, %v2948_v16, -inf }
 0xab8   :  { %v2917_v61 = vadd.f32 %v2910_v38, %v2903_v2  ;;  %2967 = vmax.xlane.f32.xlu1 %v2966_v47 }
 0xaba   :  { %vm2925_vm9 = vcmp.gt.f32.partialorder %v2917_v61, 0.0  ;;  %v2933_v4 = vmul.f32 0.2, %v2917_v61 }
 0xabc   :  { %v2941_v44 = vsel %vm2925_vm9, %v2917_v61, %v2933_v4 }
 0xabd   :  { %v2949_v18 = vadd.f32 %v5568_v50, %v2941_v44 }
 0xabf   :  { %v2908_v35 = vpop.permute.xlu0 %2907  ;;  %v2969_v53 = vsel %vm468_vm3, %v2949_v18, -inf }
 0xac0   :  { %v2918_v59 = vadd.f32 %v2910_v38, %v2908_v35  ;;  %2970 = vmax.xlane.f32.xlu2 %v2969_v53 }
 0xac2   :  { %vm2926_vm10 = vcmp.gt.f32.partialorder %v2918_v59, 0.0  ;;  %v2934_v22 = vmul.f32 0.2, %v2918_v59 }
 0xac4   :  { %v2942_v33 = vsel %vm2926_vm10, %v2918_v59, %v2934_v22 }
 0xac5   :  { %v2950_v27 = vadd.f32 %v5569_v62, %v2942_v33 }
 0xac7   :  { %v2972_v36 = vsel %vm468_vm3, %v2950_v27, -inf }
 0xac8   :  { %2973 = vmax.xlane.f32.xlu1 %v2972_v36 }
 0xaea   :  { %v2959_v1 = vpop.xlane.xlu0 %2958 }
 0xaeb   :  { %v2977_v46 = vsub.f32 %v2945_v32, %v2959_v1 }
 0xaed   :  { %v2987_v49 = vmul.f32 1.442695, %v2977_v46 }
 0xaef   :  { %3898 = vpow2.f32 %v2987_v49 }
 0xaf2   :  { %v2953_v21 = vpop.xlane.xlu1 %2952 }
 0xaf3   :  { %v2975_v58 = vsub.f32 %v2943_v37, %v2953_v21 }
 0xaf5   :  { %v2983_v24 = vmul.f32 1.442695, %v2975_v58  ;;  %v5472_v5 = vpop.eup %3898  ;;  %v3116_v58 = vpop.f32.mrf.mxu3 }
 0xaf6   :  { %v3005_v38 = vsel %vm468_vm3, %v5472_v5, 0.0 }
 0xaf7   :  { %3900 = vpow2.f32 %v2983_v24  ;;  %3006 = vadd.xlane.f32.xlu1 %v3005_v38 }
 0xafa   :  { %v2956_v8 = vpop.xlane.xlu2 %2955 }
 0xafb   :  { %v2976_v7 = vsub.f32 %v2944_v48, %v2956_v8 }
 0xafd   :  { %v3901_v13 = vpop.eup %3900  ;;  %v2985_v41 = vmul.f32 1.442695, %v2976_v7  ;;  %v3118_v38 = vpop.f32.mrf.mxu3 }
 0xafe   :  { %v2999_v54 = vsel %vm468_vm3, %v3901_v13, 0.0 }
 0xaff   :  { %3902 = vpow2.f32 %v2985_v41  ;;  %3000 = vadd.xlane.f32.xlu2 %v2999_v54 }
 0xb05   :  { %v3903_v32 = vpop.eup %3902 }
 0xb06   :  { %v3002_v20 = vsel %vm468_vm3, %v3903_v32, 0.0 }
 0xb07   :  { %3003 = vadd.xlane.f32.xlu0 %v3002_v20 }
 0xb0a   :  { %v2962_v11 = vpop.xlane.xlu1 %2961 }
 0xb0b   :  { %v2978_v23 = vsub.f32 %v2946_v52, %v2962_v11  ;;  %v2965_v56 = vpop.xlane.xlu2 %2964 }
 0xb0c   :  { %v2979_v3 = vsub.f32 %v2947_v10, %v2965_v56 }
 0xb0d   :  { %v2989_v45 = vmul.f32 1.442695, %v2978_v23 }
 0xb0e   :  { %v2991_v37 = vmul.f32 1.442695, %v2979_v3 }
 0xb0f   :  { %3904 = vpow2.f32 %v2989_v45 }
 0xb10   :  { %3906 = vpow2.f32 %v2991_v37 }
 0xb15   :  { %v3905_v55 = vpop.eup %3904 }
 0xb16   :  { %v3907_v17 = vpop.eup %3906  ;;  %v3008_v9 = vsel %vm468_vm3, %v3905_v55, 0.0 }
 0xb17   :  { %3009 = vadd.xlane.f32.xlu2 %v3008_v9  ;;  %v3011_v6 = vsel %vm468_vm3, %v3907_v17, 0.0 }
 0xb18   :  { %3012 = vadd.xlane.f32.xlu0 %v3011_v6 }
 0xb2b   :  { %v2968_v25 = vpop.xlane.xlu1 %2967 }
 0xb2c   :  { %v2980_v30 = vsub.f32 %v2948_v16, %v2968_v25 }
 0xb2e   :  { %v2993_v48 = vmul.f32 1.442695, %v2980_v30 }
 0xb30   :  { %3908 = vpow2.f32 %v2993_v48 }
 0xb33   :  { %v2971_v29 = vpop.xlane.xlu2 %2970 }
 0xb34   :  { %v2981_v14 = vsub.f32 %v2949_v18, %v2971_v29 }
 0xb36   :  { %v3909_v34 = vpop.eup %3908  ;;  %v2995_v43 = vmul.f32 1.442695, %v2981_v14 }
 0xb37   :  { %v3014_v40 = vsel %vm468_vm3, %v3909_v34, 0.0 }
 0xb38   :  { %3910 = vpow2.f32 %v2995_v43  ;;  %3015 = vadd.xlane.f32.xlu1 %v3014_v40 }
 0xb3b   :  { %v2974_v31 = vpop.xlane.xlu1 %2973 }
 0xb3c   :  { %v2982_v39 = vsub.f32 %v2950_v27, %v2974_v31 }
 0xb3e   :  { %v3911_v63 = vpop.eup %3910  ;;  %v2997_v12 = vmul.f32 1.442695, %v2982_v39 }
 0xb3f   :  { %v3017_v52 = vsel %vm468_vm3, %v3911_v63, 0.0 }
 0xb40   :  { %3912 = vpow2.f32 %v2997_v12  ;;  %3018 = vadd.xlane.f32.xlu2 %v3017_v52 }
 0xb46   :  { %v3913_v15 = vpop.eup %3912 }
 0xb47   :  { %v3020_v28 = vsel %vm468_vm3, %v3913_v15, 0.0 }
 0xb48   :  { %3021 = vadd.xlane.f32.xlu0 %v3020_v28 }
 0xb6a   :  { %v3007_v26 = vpop.xlane.xlu1 %3006 }
 0xb72   :  { %v3001_v10 = vpop.xlane.xlu2 %3000 }
 0xb73   :  { %3914 = vrcp.f32 %v3001_v10 }
 0xb79   :  { %v3915_v0 = vpop.eup %3914 }
 0xb7a   :  { %v3004_v51 = vpop.xlane.xlu0 %3003  ;;  %v3031_v19 = vmul.f32 %v3915_v0, %v3901_v13  ;;  %v3121_v13 = vpop.f32.mrf.mxu3 }
 0xb7b   :  { %3916 = vrcp.f32 %v3004_v51 }
 0xb7c   :  { %3918 = vrcp.f32 %v3007_v26 }
 0xb81   :  { %v3917_v42 = vpop.eup %3916 }
 0xb82   :  { %v3032_v57 = vmul.f32 %v3917_v42, %v3903_v32  ;;  %v3919_v2 = vpop.eup %3918  ;;  %v3123_v32 = vpop.f32.mrf.mxu3 }
 0xb83   :  { %v3033_v61 = vmul.f32 %v3919_v2, %v5472_v5 }
 0xb84   :  { %v3039_v60 = vpack.c.bf16 %v3032_v57, %v3031_v19 }
 0xb86   :  { %3462 = vmatmul.msk.bf16.vlgmr.msrb.gmra.mxu1 %vm468_vm3, %v3039_v60 }
 0xb8a   :  { %v3010_v16 = vpop.xlane.xlu2 %3009  ;;  %v3126_v23 = vpop.f32.mrf.mxu3 }
 0xb8b   :  { %3920 = vrcp.f32 %v3010_v16  ;;  %v3013_v50 = vpop.xlane.xlu0 %3012 }
 0xb8c   :  { %3922 = vrcp.f32 %v3013_v50 }
 0xb91   :  { %v3921_v47 = vpop.eup %3920 }
 0xb92   :  { %v3034_v4 = vmul.f32 %v3921_v47, %v3905_v55  ;;  %v3923_v35 = vpop.eup %3922  ;;  %v3128_v45 = vpop.f32.mrf.mxu3 }
 0xb93   :  { %v3035_v59 = vmul.f32 %v3923_v35, %v3907_v17 }
 0xb94   :  { %v3040_v44 = vpack.c.bf16 %v3034_v4, %v3033_v61 }
 0xb96   :  { %3463 = vmatmul.msk.bf16.gmra.mxu1 %vm468_vm3, %v3040_v44 }
 0xb9a   :  { %v3131_v17 = vpop.f32.mrf.mxu3 }
 0xba2   :  { %v3133_v25 = vpop.f32.mrf.mxu3 }
 0xbab   :  { %v3016_v18 = vpop.xlane.xlu1 %3015 }
 0xbac   :  { %3924 = vrcp.f32 %v3016_v18 }
 0xbb2   :  { %v3925_v53 = vpop.eup %3924 }
 0xbb3   :  { %v3036_v22 = vmul.f32 %v3925_v53, %v3909_v34  ;;  %v3019_v62 = vpop.xlane.xlu2 %3018 }
 0xbb4   :  { %3926 = vrcp.f32 %v3019_v62 }
 0xbb5   :  { %v3041_v33 = vpack.c.bf16 %v3036_v22, %v3035_v59 }
 0xbb7   :  { %3464 = vmatmul.msk.bf16.gmra.mxu1 %vm468_vm3, %v3041_v33 }
 0xbba   :  { %v3927_v36 = vpop.eup %3926 }
 0xbbb   :  { %v3022_v27 = vpop.xlane.xlu0 %3021  ;;  %v3037_v46 = vmul.f32 %v3927_v36, %v3911_v63 }
 0xbbc   :  { %3928 = vrcp.f32 %v3022_v27 }
 0xbc2   :  { %v3929_v1 = vpop.eup %3928 }
 0xbc3   :  { %v3038_v49 = vmul.f32 %v3929_v1, %v3913_v15 }
 0xbc5   :  { %v3042_v21 = vpack.c.bf16 %v3038_v49, %v3037_v46 }
 0xbc7   :  { %3465 = vmatmul.msk.bf16.gmra.mxu1 %vm468_vm3, %v3042_v21 }
 0xc03   :  { %v3157_v24 = vpop.f32.mrf.mxu1 }
 0xc04   :  { %v3158_v5 = vadd.f32 %v3157_v24, %v3116_v58 }
 0xc06   :  { %3177 = vst.msk [vmem:[%s5533_s13] sm:$0xff] %vm2807_vm6, %v3158_v5 }
 0xc0b   :  { %v3159_v8 = vpop.f32.mrf.mxu1 }
 0xc0c   :  { %v3160_v7 = vadd.f32 %v3159_v8, %v3118_v38 }
 0xc0e   :  { %3178 = vst.msk [vmem:[%s5533_s13 + $0x8] sm:$0xff] %vm2807_vm6, %v3160_v7 }
 0xc13   :  { %v3162_v41 = vpop.f32.mrf.mxu1 }
 0xc14   :  { %v3163_v54 = vadd.f32 %v3162_v41, %v3121_v13 }
 0xc16   :  { %3179 = vst.msk [vmem:[%s5533_s13 + $0x10] sm:$0xff] %vm2807_vm6, %v3163_v54 }
 0xc1b   :  { %v3164_v20 = vpop.f32.mrf.mxu1 }
 0xc1c   :  { %v3165_v11 = vadd.f32 %v3164_v20, %v3123_v32 }
 0xc1e   :  { %3180 = vst.msk [vmem:[%s5533_s13 + $0x18] sm:$0xff] %vm2807_vm6, %v3165_v11 }
 0xc34   :  { %v3167_v56 = vpop.f32.mrf.mxu1 }
 0xc35   :  { %v3168_v3 = vadd.f32 %v3167_v56, %v3126_v23 }
 0xc37   :  { %3181 = vst.msk [vmem:[%s5533_s13 + $0x20] sm:$0xff] %vm2807_vm6, %v3168_v3 }
 0xc3c   :  { %v3169_v37 = vpop.f32.mrf.mxu1 }
 0xc3d   :  { %v3170_v55 = vadd.f32 %v3169_v37, %v3128_v45 }
 0xc3f   :  { %3182 = vst.msk [vmem:[%s5533_s13 + $0x28] sm:$0xff] %vm2807_vm6, %v3170_v55 }
 0xc44   :  { %v3172_v9 = vpop.f32.mrf.mxu1 }
 0xc45   :  { %v3173_v6 = vadd.f32 %v3172_v9, %v3131_v17 }
 0xc47   :  { %3183 = vst.msk [vmem:[%s5533_s13 + $0x30] sm:$0xff] %vm2807_vm6, %v3173_v6 }
 0xc4c   :  { %v3174_v30 = vpop.f32.mrf.mxu1 }
 0xc4d   :  { %v3175_v48 = vadd.f32 %v3174_v30, %v3133_v25 }
 0xc4f   :  { %3184 = vst.msk [vmem:[%s5533_s13 + $0x38] sm:$0xff] %vm2807_vm6, %v3175_v48 }

</bundles_post_ra>
